<compile_context>
chip_gen: v7x
topology: tpu7x:2x2x1
jax: 0.10.0
libtpu: 0.0.40
codegen_flags: <defaults>
</compile_context>

<pallas_src>
import jax
import jax.numpy as jnp
from jax.experimental import pallas as pl
from jax.experimental.pallas import tpu as pltpu

TILE_N = 2048         # points (lanes) processed per grid step
HIDDEN = 128          # hidden width of the MLP


def _mlp_kernel(x_ref, w1t_ref, b1_ref, w2t_ref, b2_ref, w3_ref, b3_ref, o_ref):
    # x_ref:   (2, TILE_N)        row 0 = u, row 1 = v   (points on lanes)
    # w1t_ref: (HIDDEN, 2)        = W1^T
    # b1_ref:  (HIDDEN, 1)
    # w2t_ref: (HIDDEN, HIDDEN)   = W2^T
    # b2_ref:  (HIDDEN, 1)
    # w3_ref:  (HIDDEN, 1)
    # b3_ref:  (1,) scalar in SMEM
    # o_ref:   (1, TILE_N)        lane-dense output slab
    u = x_ref[0:1, :]                       # (1, TILE_N)
    v = x_ref[1:2, :]                       # (1, TILE_N)

    # Layer 1 (fan-in 2): broadcast FMA on the VPU — no degenerate K=2 MXU pass.
    h1 = w1t_ref[:, 0:1] * u + w1t_ref[:, 1:2] * v + b1_ref[...]   # (HIDDEN, TILE_N)
    h1 = jnp.maximum(h1, 0.0)

    # Layer 2 (128x128): the one real MXU matmul, activations lane-dense.
    h2 = jnp.dot(w2t_ref[...], h1, preferred_element_type=jnp.float32) + b2_ref[...]
    h2 = jnp.maximum(h2, 0.0)

    # Layer 3 (fan-out 1): elementwise multiply + sublane reduction (VPU/XLU),
    # result is already lane-dense (1, TILE_N).
    z = jnp.sum(h2 * w3_ref[...], axis=0, keepdims=True) + b3_ref[0]
    o_ref[...] = jax.nn.sigmoid(z)


@jax.jit
def copula_density_forward(u, v, params):
    w1, b1, w2, b2, w3, b3 = params
    orig_shape = u.shape
    n = u.size

    # Glue (XLA side): flatten, pad to a multiple of TILE_N, stack as (2, N_pad)
    # so the point index sits on the lane axis.
    n_pad = pl.cdiv(n, TILE_N) * TILE_N
    u_flat = jnp.pad(u.reshape(-1).astype(jnp.float32), (0, n_pad - n))
    v_flat = jnp.pad(v.reshape(-1).astype(jnp.float32), (0, n_pad - n))
    x = jnp.stack([u_flat, v_flat], axis=0)                 # (2, n_pad)

    # Pre-transpose / reshape weights once (layout plumbing, tiny).
    w1t = w1.T                                              # (HIDDEN, 2)
    w2t = w2.T                                              # (HIDDEN, HIDDEN)
    b1c = b1.reshape(HIDDEN, 1)
    b2c = b2.reshape(HIDDEN, 1)
    w3c = w3.reshape(HIDDEN, 1)
    b3s = b3.reshape(1)

    grid = (n_pad // TILE_N,)

    out = pl.pallas_call(
        _mlp_kernel,
        out_shape=jax.ShapeDtypeStruct((1, n_pad), jnp.float32),
        grid_spec=pltpu.PrefetchScalarGridSpec(
            num_scalar_prefetch=0,
            grid=grid,
            in_specs=[
                pl.BlockSpec((2, TILE_N), lambda i: (0, i)),          # x tile (u,v rows)
                pl.BlockSpec((HIDDEN, 2), lambda i: (0, 0)),          # W1^T (resident)
                pl.BlockSpec((HIDDEN, 1), lambda i: (0, 0)),          # b1
                pl.BlockSpec((HIDDEN, HIDDEN), lambda i: (0, 0)),     # W2^T (resident)
                pl.BlockSpec((HIDDEN, 1), lambda i: (0, 0)),          # b2
                pl.BlockSpec((HIDDEN, 1), lambda i: (0, 0)),          # w3
                pl.BlockSpec(memory_space=pltpu.MemorySpace.SMEM),    # b3 scalar
            ],
            out_specs=pl.BlockSpec((1, TILE_N), lambda i: (0, i)),    # lane-dense out
        ),
        compiler_params=pltpu.CompilerParams(
            dimension_semantics=("parallel",),
        ),
    )(x, w1t, b1c, w2t, b2c, w3c, b3s)

    return out.reshape(-1)[:n].reshape(orig_shape)


def init_params(key):
    """Deterministic init mimicking nn.Linear default (uniform +/- 1/sqrt(fan_in))."""
    ks = jax.random.split(key, 6)

    def lin(kw, kb, fan_in, fan_out):
        bound = 1.0 / jnp.sqrt(float(fan_in))
        w = jax.random.uniform(kw, (fan_in, fan_out), jnp.float32, -bound, bound)
        b = jax.random.uniform(kb, (fan_out,), jnp.float32, -bound, bound)
        return w, b

    w1, b1 = lin(ks[0], ks[1], 2, HIDDEN)
    w2, b2 = lin(ks[2], ks[3], HIDDEN, HIDDEN)
    w3, b3 = lin(ks[4], ks[5], HIDDEN, 1)
    return (w1, b1, w2, b2, w3, b3)


def _ref_forward(u, v, params):
    """Pure-JAX reference for correctness check (highest-precision matmuls)."""
    w1, b1, w2, b2, w3, b3 = params
    hp = jax.lax.Precision.HIGHEST
    x = jnp.stack([u.reshape(-1), v.reshape(-1)], axis=-1).astype(jnp.float32)
    h1 = jnp.maximum(jnp.dot(x, w1, precision=hp) + b1, 0.0)
    h2 = jnp.maximum(jnp.dot(h1, w2, precision=hp) + b2, 0.0)
    z = jnp.dot(h2, w3, precision=hp) + b3
    return jax.nn.sigmoid(z)[:, 0].reshape(u.shape)


if __name__ == "__main__":
    key = jax.random.PRNGKey(0)
    k_params, k_u, k_v = jax.random.split(key, 3)

    params = init_params(k_params)

    # Small example inputs: u, v in [0, 1], shape (2, 64, 64) -> N = 8192 points
    # (gives a 4-step grid at TILE_N=2048, so megacore sharding / pipelining is live).
    u = jax.random.uniform(k_u, (2, 64, 64), jnp.float32)
    v = jax.random.uniform(k_v, (2, 64, 64), jnp.float32)

    out = copula_density_forward(u, v, params)
    out = jax.block_until_ready(out)

    ref = _ref_forward(u, v, params)
    assert out.shape == u.shape
    assert jnp.allclose(out, ref, atol=2e-5, rtol=2e-5), "mismatch vs reference"

    print("KERNEL_OK")
</pallas_src>

<mosaic_0001>
module attributes {stable_mosaic.version = 11 : i64} {
  func.func @_mlp_kernel(%arg0: i32, %arg1: memref<2x2048xf32, #tpu.memory_space<vmem>>, %arg2: memref<128x2xf32, #tpu.memory_space<vmem>>, %arg3: memref<128x1xf32, #tpu.memory_space<vmem>>, %arg4: memref<128x128xf32, #tpu.memory_space<vmem>>, %arg5: memref<128x1xf32, #tpu.memory_space<vmem>>, %arg6: memref<128x1xf32, #tpu.memory_space<vmem>>, %arg7: memref<1xf32, #tpu.memory_space<smem>>, %arg8: memref<1x2048xf32, #tpu.memory_space<vmem>>) attributes {dimension_semantics = [#tpu.dimension_semantics<parallel>], iteration_bounds = array<i64: 4>, scalar_prefetch = 0 : i64, scratch_operands = 0 : i64, tpu.core_type = #tpu.core_type<tc>, window_params = [{transform_indices = @transform_0, window_bounds = array<i64: 2, 2048>}, {pipeline_mode = #tpu.pipeline_mode<synchronous>, transform_indices = @transform_1, window_bounds = array<i64: 128, 2>}, {pipeline_mode = #tpu.pipeline_mode<synchronous>, transform_indices = @transform_2, window_bounds = array<i64: 128, 1>}, {pipeline_mode = #tpu.pipeline_mode<synchronous>, transform_indices = @transform_3, window_bounds = array<i64: 128, 128>}, {pipeline_mode = #tpu.pipeline_mode<synchronous>, transform_indices = @transform_4, window_bounds = array<i64: 128, 1>}, {pipeline_mode = #tpu.pipeline_mode<synchronous>, transform_indices = @transform_5, window_bounds = array<i64: 128, 1>}, {transform_indices = @transform_6, window_bounds = array<i64: 1>}, {transform_indices = @transform_7, window_bounds = array<i64: 1, 2048>}]} {
    %c0 = arith.constant 0 : index
    %c0_0 = arith.constant 0 : index
    %0 = vector.load %arg1[%c0, %c0_0] : memref<2x2048xf32, #tpu.memory_space<vmem>>, vector<1x2048xf32>
    %c1 = arith.constant 1 : index
    %c0_1 = arith.constant 0 : index
    %1 = vector.load %arg1[%c1, %c0_1] : memref<2x2048xf32, #tpu.memory_space<vmem>>, vector<1x2048xf32>
    %c0_2 = arith.constant 0 : index
    %c0_3 = arith.constant 0 : index
    %2 = vector.load %arg2[%c0_2, %c0_3] : memref<128x2xf32, #tpu.memory_space<vmem>>, vector<128x1xf32>
    %3 = vector.broadcast %2 : vector<128x1xf32> to vector<128x2048xf32>
    %4 = vector.broadcast %0 : vector<1x2048xf32> to vector<128x2048xf32>
    %5 = arith.mulf %3, %4 : vector<128x2048xf32>
    %c0_4 = arith.constant 0 : index
    %c1_5 = arith.constant 1 : index
    %6 = vector.load %arg2[%c0_4, %c1_5] : memref<128x2xf32, #tpu.memory_space<vmem>>, vector<128x1xf32>
    %7 = vector.broadcast %6 : vector<128x1xf32> to vector<128x2048xf32>
    %8 = vector.broadcast %1 : vector<1x2048xf32> to vector<128x2048xf32>
    %9 = arith.mulf %7, %8 : vector<128x2048xf32>
    %10 = arith.addf %5, %9 : vector<128x2048xf32>
    %c0_6 = arith.constant 0 : index
    %c0_7 = arith.constant 0 : index
    %11 = vector.load %arg3[%c0_6, %c0_7] : memref<128x1xf32, #tpu.memory_space<vmem>>, vector<128x1xf32>
    %12 = vector.broadcast %11 : vector<128x1xf32> to vector<128x2048xf32>
    %13 = arith.addf %10, %12 : vector<128x2048xf32>
    %cst = arith.constant 0.000000e+00 : f32
    %14 = vector.broadcast %cst : f32 to vector<128x2048xf32>
    %15 = arith.maximumf %13, %14 : vector<128x2048xf32>
    %c0_8 = arith.constant 0 : index
    %c0_9 = arith.constant 0 : index
    %16 = vector.load %arg4[%c0_8, %c0_9] : memref<128x128xf32, #tpu.memory_space<vmem>>, vector<128x128xf32>
    %cst_10 = arith.constant dense<0.000000e+00> : vector<128x2048xf32>
    %17 = tpu.matmul %16, %15, %cst_10 {dimension_numbers = #tpu.dot_dimension_numbers<[1], [0], [0], [1], [0, 0, 1, 1], [], []>} : vector<128x128xf32>, vector<128x2048xf32>, vector<128x2048xf32> -> vector<128x2048xf32>
    %c0_11 = arith.constant 0 : index
    %c0_12 = arith.constant 0 : index
    %18 = vector.load %arg5[%c0_11, %c0_12] : memref<128x1xf32, #tpu.memory_space<vmem>>, vector<128x1xf32>
    %19 = vector.broadcast %18 : vector<128x1xf32> to vector<128x2048xf32>
    %20 = arith.addf %17, %19 : vector<128x2048xf32>
    %cst_13 = arith.constant 0.000000e+00 : f32
    %21 = vector.broadcast %cst_13 : f32 to vector<128x2048xf32>
    %22 = arith.maximumf %20, %21 : vector<128x2048xf32>
    %c0_14 = arith.constant 0 : index
    %c0_15 = arith.constant 0 : index
    %23 = vector.load %arg6[%c0_14, %c0_15] : memref<128x1xf32, #tpu.memory_space<vmem>>, vector<128x1xf32>
    %24 = vector.broadcast %23 : vector<128x1xf32> to vector<128x2048xf32>
    %25 = arith.mulf %22, %24 : vector<128x2048xf32>
    %cst_16 = arith.constant dense<0.000000e+00> : vector<2048xf32>
    %26 = vector.multi_reduction <add>, %25, %cst_16 [0] : vector<128x2048xf32> to vector<2048xf32>
    %27 = vector.shape_cast %26 : vector<2048xf32> to vector<1x2048xf32>
    %c0_17 = arith.constant 0 : index
    %28 = memref.load %arg7[%c0_17] : memref<1xf32, #tpu.memory_space<smem>>
    %29 = vector.broadcast %28 : f32 to vector<1x2048xf32>
    %30 = arith.addf %27, %29 : vector<1x2048xf32>
    %31 = arith.negf %30 : vector<1x2048xf32>
    %32 = math.exp %31 : vector<1x2048xf32>
    %cst_18 = arith.constant 1.000000e+00 : f32
    %33 = vector.broadcast %cst_18 : f32 to vector<1x2048xf32>
    %34 = arith.addf %33, %32 : vector<1x2048xf32>
    %35 = arith.divf %33, %34 : vector<1x2048xf32>
    %c0_19 = arith.constant 0 : index
    %c0_20 = arith.constant 0 : index
    %36 = vector.load %arg8[%c0_19, %c0_20] : memref<1x2048xf32, #tpu.memory_space<vmem>>, vector<1x2048xf32>
    tpu.vector_store %arg8[%c0_19, %c0_20], %35 {strides = array<i32>} : memref<1x2048xf32, #tpu.memory_space<vmem>>, vector<1x2048xf32>,
    return
  }
  func.func @transform_0(%arg0: i32) -> (i32, i32) {
    %c0_i32 = arith.constant 0 : i32
    %c0_i32_0 = arith.constant 0 : i32
    return %c0_i32, %arg0 : i32, i32
  }
  func.func @transform_1(%arg0: i32) -> (i32, i32) {
    %c0_i32 = arith.constant 0 : i32
    %c0_i32_0 = arith.constant 0 : i32
    %c0_i32_1 = arith.constant 0 : i32
    return %c0_i32, %c0_i32_0 : i32, i32
  }
  func.func @transform_2(%arg0: i32) -> (i32, i32) {
    %c0_i32 = arith.constant 0 : i32
    %c0_i32_0 = arith.constant 0 : i32
    %c0_i32_1 = arith.constant 0 : i32
    return %c0_i32, %c0_i32_0 : i32, i32
  }
  func.func @transform_3(%arg0: i32) -> (i32, i32) {
    %c0_i32 = arith.constant 0 : i32
    %c0_i32_0 = arith.constant 0 : i32
    %c0_i32_1 = arith.constant 0 : i32
    return %c0_i32, %c0_i32_0 : i32, i32
  }
  func.func @transform_4(%arg0: i32) -> (i32, i32) {
    %c0_i32 = arith.constant 0 : i32
    %c0_i32_0 = arith.constant 0 : i32
    %c0_i32_1 = arith.constant 0 : i32
    return %c0_i32, %c0_i32_0 : i32, i32
  }
  func.func @transform_5(%arg0: i32) -> (i32, i32) {
    %c0_i32 = arith.constant 0 : i32
    %c0_i32_0 = arith.constant 0 : i32
    %c0_i32_1 = arith.constant 0 : i32
    return %c0_i32, %c0_i32_0 : i32, i32
  }
  func.func @transform_6(%arg0: i32) -> i32 {
    %c0_i32 = arith.constant 0 : i32
    %c0_i32_0 = arith.constant 0 : i32
    return %c0_i32 : i32
  }
  func.func @transform_7(%arg0: i32) -> (i32, i32) {
    %c0_i32 = arith.constant 0 : i32
    %c0_i32_0 = arith.constant 0 : i32
    return %c0_i32, %arg0 : i32, i32
  }
}

</mosaic_0001>

<bundles_post_ra>
// kernel: copula_density_forward.1
= control target key start
LH: loop header
LB: loop body
LE: loop exit
PB: predicated region body
PF: predicated region fallthrough
CT: control target
= control target key end

     0   :  { %s5067_s26 = smov 0   ;;  %s8592_s0 = inlined_call_operand.vmem [shape: f32[2,8192], index: 0, kind: input, shape index: {}]   ;;  %s8593_s1 = inlined_call_operand.vmem [shape: f32[128,2], index: 1, kind: input, shape index: {}]   ;;  %s8594_s2 = inlined_call_operand.vmem [shape: f32[128,1], index: 2, kind: input, shape index: {}]   ;;  %s8595_s3 = inlined_call_operand.vmem [shape: f32[128,128], index: 3, kind: input, shape index: {}]   ;;  %s8596_s4 = inlined_call_operand.vmem [shape: f32[128,1], index: 4, kind: input, shape index: {}]   ;;  %s8597_s5 = inlined_call_operand.vmem [shape: f32[128,1], index: 5, kind: input, shape index: {}]   ;;  %s8598_s6 = inlined_call_operand.<no memory space> [shape: f32[1], index: 6, kind: input, shape index: {}]   ;;  %s8599_s7 = inlined_call_operand.vmem [shape: f32[1,8192], index: 7, kind: output, shape index: {}]  }
   0x1   :  { %12 = sst [smem:[#allocation2]] %s8598_s6 }
   0x2 LB: > { %s4614_s27 = sadd.s32 4294967295, %s5018_s26   ;;  %p4618_p0 = scmp.ge.s32.totalorder %s5018_s26, 1  ;;  %s5018_s26 = sphi %s5067_s26, %s18_s26  }
   0x3   : > { %p239_p1 = scmp.lt.s32.totalorder %s5018_s26, 5 }
   0x5   : > { %p240_p2 = pnand %p4618_p0, %p239_p1 }
   0x7   : > { %243 = sbr.rel (%p240_p2) target bundleno = 866 (0x362), region = 48 }
   0xe   : > { %v290_v0 = vld [vmem:[%s8593_s1 + $0x10] sm:$0xff]  ;;  %v288_v1 = vld [vmem:[%s8593_s1] sm:$0xff]  ;;  %v5020_v2 = vmov 1   ;;  %v289_v4 = vld [vmem:[%s8593_s1 + $0x8] sm:$0xff]  ;;  %v5021_v7 = vmov 0   ;;  %s4619_s16 = sshll.u32 %s4614_s27, 4  ;;  %v386_v44 = vlaneseq }
   0xf   : > { %4913 = vset.pattern.permute.xlu0 %v5020_v2  ;;  %4911 = vset.pattern.permute.xlu1 %v5020_v2  ;;  %v292_v3 = vld [vmem:[%s8593_s1 + $0x20] sm:$0xff]  ;;  %v294_v5 = vld [vmem:[%s8593_s1 + $0x30] sm:$0xff]  ;;  %v291_v6 = vld [vmem:[%s8593_s1 + $0x18] sm:$0xff]  ;;  %p271_p3 = scmp.lt.s32.totalorder %s4619_s16, 63  ;;  %s7704_s28 = sld [smem:[#allocation2]] }
  0x10   : > { %731 = vperm.xlu0 %4913, %v290_v0   ;;  %723 = vperm.xlu1 %4911, %v288_v1   ;;  %v296_v8 = vld [vmem:[%s8593_s1 + $0x40] sm:$0xff]  ;;  %v298_v9 = vld [vmem:[%s8593_s1 + $0x50] sm:$0xff]  ;;  %v293_v13 = vld [vmem:[%s8593_s1 + $0x28] sm:$0xff]  ;;  %v5233_v46 = vshrl.u32 %v386_v44, 7 }
  0x11   : > { %v1380_v10 = vld [vmem:[%s8594_s2] sm:$0xff]  ;;  %v5116_v12 = vld [vmem:[%s8593_s1 + $0x70] sm:$0xff]  ;;  %v1381_v15 = vld [vmem:[%s8594_s2 + $0x8] sm:$0xff]  ;;  %s9143_s16 = smov (!%p271_p3, %s4619_s16), 63 }
  0x12   : > { %v5109_v11 = vld [vmem:[%s8593_s1 + $0x60] sm:$0xff]  ;;  %v1382_v14 = vld [vmem:[%s8594_s2 + $0x10] sm:$0xff]  ;;  %v1383_v16 = vld [vmem:[%s8594_s2 + $0x18] sm:$0xff]  ;;  %s4620_s24 = sshll.u32 %s9143_s16, 1  ;;  %8802 = vst [vmem:[#allocation3_spill] sm:$0xff] %v5233_v46  ;;  %v5248_v49 = vsub.s32 1, %v5233_v46  ;;  %s8374_s8 = scalar_lea.vmem %s8599_s7, %s9143_s16 }
  0x13   : > { %v295_v17 = vld [vmem:[%s8593_s1 + $0x38] sm:$0xff]  ;;  %v1385_v18 = vld [vmem:[%s8594_s2 + $0x28] sm:$0xff]  ;;  %v1384_v20 = vld [vmem:[%s8594_s2 + $0x20] sm:$0xff]  ;;  %s5242_s30 = scalar_lea.vmem %s8592_s0, %s4620_s24  ;;  %v5251_v50 = vsub.s32 3, %v5233_v46  ;;  %v5256_v53 = vsub.s32 0, %v5233_v46  ;;  %v5259_v54 = vsub.s32 2, %v5233_v46 }
  0x14   : > { %739 = vperm.xlu0 %4913, %v292_v3   ;;  %727 = vperm.xlu1 %4911, %v289_v4   ;;  %v1387_v19 = vld [vmem:[%s8594_s2 + $0x38] sm:$0xff]  ;;  %v1389_v21 = vld [vmem:[%s8594_s2 + $0x48] sm:$0xff]  ;;  %v2004_v25 = vld [vmem:[%s8596_s4] sm:$0xff]  ;;  %v5266_v56 = vsub.s32 5, %v5233_v46  ;;  %v5269_v57 = vsub.s32 7, %v5233_v46  ;;  %v5276_v60 = vsub.s32 4, %v5233_v46 }
  0x15   : > { %v1391_v22 = vld [vmem:[%s8594_s2 + $0x58] sm:$0xff]  ;;  %v297_v23 = vld [vmem:[%s8593_s1 + $0x48] sm:$0xff]  ;;  %v2006_v26 = vld [vmem:[%s8596_s4 + $0x10] sm:$0xff]  ;;  %8803 = vst [vmem:[#allocation4_spill] sm:$0xff] %v5251_v50  ;;  %v5279_v61 = vsub.s32 6, %v5233_v46 }
  0x16   : > { %v1393_v24 = vld [vmem:[%s8594_s2 + $0x68] sm:$0xff]  ;;  %v1386_v27 = vld [vmem:[%s8594_s2 + $0x30] sm:$0xff]  ;;  %v3644_v28 = vld [vmem:[%s8597_s5] sm:$0xff]  ;;  %8804 = vst [vmem:[#allocation5_spill] sm:$0xff] %v5256_v53 }
  0x17   : > { %v2008_v29 = vld [vmem:[%s8596_s4 + $0x20] sm:$0xff]  ;;  %v299_v30 = vld [vmem:[%s8593_s1 + $0x58] sm:$0xff]  ;;  %v2009_v31 = vld [vmem:[%s8596_s4 + $0x28] sm:$0xff]  ;;  %8805 = vst [vmem:[#allocation6_spill] sm:$0xff] %v5259_v54 }
  0x18   : > { %747 = vperm.xlu0 %4913, %v294_v5   ;;  %4912 = vset.pattern.permute.xlu1 %v5021_v7  ;;  %v2010_v32 = vld [vmem:[%s8596_s4 + $0x30] sm:$0xff]  ;;  %v1388_v33 = vld [vmem:[%s8594_s2 + $0x40] sm:$0xff]  ;;  %v2011_v34 = vld [vmem:[%s8596_s4 + $0x38] sm:$0xff]  ;;  %8806 = vst [vmem:[#allocation7_spill] sm:$0xff] %v5266_v56 }
  0x19   : > { %321 = vperm.xlu1 %4912, %v291_v6   ;;  %v2012_v35 = vld [vmem:[%s8596_s4 + $0x40] sm:$0xff]  ;;  %v301_v36 = vld [vmem:[%s8593_s1 + $0x68] sm:$0xff]  ;;  %v2014_v38 = vld [vmem:[%s8596_s4 + $0x50] sm:$0xff]  ;;  %8807 = vst [vmem:[#allocation8_spill] sm:$0xff] %v5269_v57 }
  0x1a   : > { %v2013_v37 = vld [vmem:[%s8596_s4 + $0x48] sm:$0xff]  ;;  %v2015_v39 = vld [vmem:[%s8596_s4 + $0x58] sm:$0xff]  ;;  %v1390_v40 = vld [vmem:[%s8594_s2 + $0x50] sm:$0xff]  ;;  %8810 = vst [vmem:[#allocation11_spill] sm:$0xff] %v5276_v60 }
  0x1b   : > { %v2016_v41 = vld [vmem:[%s8596_s4 + $0x60] sm:$0xff]  ;;  %v2017_v42 = vld [vmem:[%s8596_s4 + $0x68] sm:$0xff]  ;;  %v303_v43 = vld [vmem:[%s8593_s1 + $0x78] sm:$0xff]  ;;  %8811 = vst [vmem:[#allocation12_spill] sm:$0xff] %v5279_v61 }
  0x1c   : > { %755 = vperm.xlu0 %4913, %v296_v8   ;;  %v2018_v45 = vld [vmem:[%s8596_s4 + $0x70] sm:$0xff]  ;;  %v2019_v47 = vld [vmem:[%s8596_s4 + $0x78] sm:$0xff]  ;;  %v1392_v48 = vld [vmem:[%s8594_s2 + $0x60] sm:$0xff] }
  0x1d   : > { %4914 = vset.pattern.permute.xlu1 %v5020_v2  ;;  %v281_v51 = vld [vmem:[%s5242_s30] ss:$2 sm:$0xff]  ;;  %v4623_v52 = vld [vmem:[%s5242_s30 + $0x1] ss:$2 sm:$0xff]  ;;  %v3658_v55 = vld [vmem:[%s8597_s5 + $0x70] sm:$0xff] }
  0x1e   : > { %735 = vperm.xlu1 %4914, %v291_v6   ;;  %v1394_v62 = vld [vmem:[%s8594_s2 + $0x70] sm:$0xff]  ;;  %v5285_v63 = vrot.slane %v281_v51, %v5248_v49 }
  0x1f   : > { %v4622_v6 = vld [vmem:[%s5242_s30 + $0x10] ss:$2 sm:$0xff] }
  0x20   : > { %763 = vperm.xlu0 %4913, %v298_v9  }
  0x22   : > { %4915 = vset.pattern.permute.xlu1 %v5021_v7 }
  0x23   : > { %1398 = vperm.xlu1 %4915, %v1380_v10   ;;  %v5316_v10 = vrot.slane %v4623_v52, %v5269_v57 }
  0x24   : > { %771 = vperm.xlu0 %4913, %v5109_v11  }
  0x25   : > { %8814 = vst [vmem:[#allocation15_spill] sm:$0xff] %v5316_v10 }
  0x27   : > { %326 = vperm.xlu1 %4915, %v292_v3   ;;  %v5297_v3 = vrot.slane %v281_v51, %v5256_v53 }
  0x28   : > { %779 = vperm.xlu0 %4913, %v5116_v12  }
  0x2b   : > { %331 = vperm.xlu1 %4915, %v293_v13  }
  0x2c   : > { %4926 = vset.pattern.permute.xlu0 %v5021_v7 }
  0x2d   : > { %306 = vperm.xlu0 %4926, %v288_v1   ;;  %v5291_v1 = vrot.slane %v4623_v52, %v5251_v50 }
  0x2f   : > { %4916 = vset.pattern.permute.xlu1 %v5020_v2 }
  0x30   : > { %743 = vperm.xlu1 %4916, %v293_v13   ;;  %v5323_v13 = vrot.slane %v281_v51, %v5269_v57 }
  0x31   : > { %311 = vperm.xlu0 %4926, %v289_v4   ;;  %v5300_v4 = vrot.slane %v4623_v52, %v5256_v53 }
  0x34   : > { %4917 = vset.pattern.permute.xlu1 %v5021_v7 }
  0x35   : > { %316 = vperm.xlu0 %4926, %v290_v0   ;;  %1408 = vperm.xlu1 %4917, %v1382_v14   ;;  %v5288_v0 = vrot.slane %v4623_v52, %v5248_v49  ;;  %v5326_v14 = vrot.slane %v281_v51, %v5276_v60 }
  0x39   : > { %1403 = vperm.xlu0 %4926, %v1381_v15   ;;  %336 = vperm.xlu1 %4917, %v294_v5   ;;  %v5303_v5 = vrot.slane %v4623_v52, %v5259_v54  ;;  %v5329_v15 = vrot.slane %v4623_v52, %v5276_v60 }
  0x3b   : > { %8812 = vst [vmem:[#allocation13_spill] sm:$0xff] %v5303_v5  ;;  %8817 = vst [vmem:[#allocation18_spill] sm:$0xff] %v5329_v15 }
  0x3d   : > { %1413 = vperm.xlu0 %4926, %v1383_v16   ;;  %341 = vperm.xlu1 %4917, %v295_v17   ;;  %v5332_v16 = vrot.slane %v4623_v52, %v5279_v61 }
  0x3f   : > { %8818 = vst [vmem:[#allocation19_spill] sm:$0xff] %v5332_v16 }
  0x41   : > { %1423 = vperm.xlu0 %4926, %v1385_v18   ;;  %4918 = vset.pattern.permute.xlu1 %v5020_v2 }
  0x42   : > { %751 = vperm.xlu1 %4918, %v295_v17   ;;  %v1395_v17 = vld [vmem:[%s8594_s2 + $0x78] sm:$0xff] }
  0x45   : > { %1433 = vperm.xlu0 %4926, %v1387_v19  }
  0x46   : > { %4919 = vset.pattern.permute.xlu1 %v5021_v7 }
  0x47   : > { %1418 = vperm.xlu1 %4919, %v1384_v20   ;;  %v5346_v20 = vrot.slane %v281_v51, %v5279_v61 }
  0x49   : > { %1443 = vperm.xlu0 %4926, %v1389_v21   ;;  %v5349_v21 = vrot.slane %v4622_v6, %v5248_v49 }
  0x4b   : > { %346 = vperm.xlu1 %4919, %v296_v8   ;;  %v5310_v8 = vrot.slane %v281_v51, %v5266_v56  ;;  %8819 = vst [vmem:[#allocation20_spill] sm:$0xff] %v5349_v21 }
  0x4d   : > { %1453 = vperm.xlu0 %4926, %v1391_v22  }
  0x4f   : > { %351 = vperm.xlu1 %4919, %v297_v23  }
  0x51   : > { %1463 = vperm.xlu0 %4926, %v1393_v24  }
  0x53   : > { %4920 = vset.pattern.permute.xlu1 %v5020_v2 }
  0x54   : > { %759 = vperm.xlu1 %4920, %v297_v23  }
  0x55   : > { %2022 = vperm.xlu0 %4926, %v2004_v25  }
  0x58   : > { %4921 = vset.pattern.permute.xlu1 %v5021_v7 }
  0x59   : > { %2032 = vperm.xlu0 %4926, %v2006_v26   ;;  %1428 = vperm.xlu1 %4921, %v1386_v27  }
  0x5d   : > { %3662 = vperm.xlu0 %4926, %v3644_v28   ;;  %356 = vperm.xlu1 %4921, %v298_v9   ;;  %v5313_v9 = vrot.slane %v4623_v52, %v5266_v56 }
  0x5f   : > { %8813 = vst [vmem:[#allocation14_spill] sm:$0xff] %v5313_v9 }
  0x61   : > { %2042 = vperm.xlu0 %4926, %v2008_v29   ;;  %361 = vperm.xlu1 %4921, %v299_v30  }
  0x65   : > { %2047 = vperm.xlu0 %4926, %v2009_v31   ;;  %4922 = vset.pattern.permute.xlu1 %v5020_v2 }
  0x66   : > { %767 = vperm.xlu1 %4922, %v299_v30  }
  0x69   : > { %2052 = vperm.xlu0 %4926, %v2010_v32  }
  0x6a   : > { %4923 = vset.pattern.permute.xlu1 %v5021_v7 }
  0x6b   : > { %1438 = vperm.xlu1 %4923, %v1388_v33  }
  0x6d   : > { %2057 = vperm.xlu0 %4926, %v2011_v34  }
  0x6f   : > { %366 = vperm.xlu1 %4923, %v5109_v11  }
  0x71   : > { %2062 = vperm.xlu0 %4926, %v2012_v35  }
  0x73   : > { %371 = vperm.xlu1 %4923, %v301_v36  }
  0x75   : > { %2067 = vperm.xlu0 %4926, %v2013_v37  }
  0x77   : > { %4924 = vset.pattern.permute.xlu1 %v5020_v2 }
  0x78   : > { %775 = vperm.xlu1 %4924, %v301_v36   ;;  %v2005_v36 = vld [vmem:[%s8596_s4 + $0x8] sm:$0xff] }
  0x79   : > { %2072 = vperm.xlu0 %4926, %v2014_v38  }
  0x7c   : > { %4925 = vset.pattern.permute.xlu1 %v5021_v7 }
  0x7d   : > { %2077 = vperm.xlu0 %4926, %v2015_v39   ;;  %1448 = vperm.xlu1 %4925, %v1390_v40  }
  0x81   : > { %2082 = vperm.xlu0 %4926, %v2016_v41   ;;  %376 = vperm.xlu1 %4925, %v5116_v12  }
  0x85   : > { %2087 = vperm.xlu0 %4926, %v2017_v42   ;;  %381 = vperm.xlu1 %4925, %v303_v43  }
  0x89   : > { %2092 = vperm.xlu0 %4926, %v2018_v45   ;;  %4927 = vset.pattern.permute.xlu1 %v5020_v2  ;;  %v5294_v2 = vrot.slane %v281_v51, %v5251_v50 }
  0x8a   : > { %783 = vperm.xlu1 %4927, %v303_v43  }
  0x8d   : > { %2097 = vperm.xlu0 %4926, %v2019_v47  }
  0x8e   : > { %4928 = vset.pattern.permute.xlu1 %v5021_v7  ;;  %v5307_v7 = vrot.slane %v281_v51, %v5259_v54 }
  0x8f   : > { %1458 = vperm.xlu1 %4928, %v1392_v48   ;;  %v5271_v58 = vpop.permute.xlu1 %723  ;;  %v5273_v59 = vpop.permute.xlu0 %731 }
  0x90   : > { %8808 = vst [vmem:[#allocation9_spill] sm:$0xff] %v5271_v58  ;;  %8809 = vst [vmem:[#allocation10_spill] sm:$0xff] %v5273_v59  ;;  %v5339_v18 = vmul.f32 %v5288_v0, %v5271_v58  ;;  %v5343_v19 = vmul.f32 %v5291_v1, %v5271_v58  ;;  %v5353_v22 = vmul.f32 %v5300_v4, %v5271_v58 }
  0x91   : > { %3732 = vperm.xlu0 %4926, %v3658_v55   ;;  %v5357_v23 = vmul.f32 %v5303_v5, %v5271_v58  ;;  %v5361_v24 = vmul.f32 %v5288_v0, %v5273_v59  ;;  %v5365_v25 = vmul.f32 %v5291_v1, %v5273_v59  ;;  %v5369_v26 = vmul.f32 %v5300_v4, %v5273_v59 }
  0x92   : > { %v5373_v27 = vmul.f32 %v5303_v5, %v5273_v59  ;;  %v5377_v28 = vmul.f32 %v5313_v9, %v5271_v58  ;;  %v5381_v29 = vmul.f32 %v5316_v10, %v5271_v58  ;;  %v5387_v31 = vmul.f32 %v5329_v15, %v5271_v58 }
  0x93   : > { %1468 = vperm.xlu1 %4928, %v1394_v62   ;;  %v5318_v11 = vpop.permute.xlu1 %727  ;;  %v5320_v12 = vpop.permute.xlu0 %739  ;;  %v5391_v32 = vmul.f32 %v5332_v16, %v5271_v58  ;;  %v5395_v33 = vmul.f32 %v5313_v9, %v5273_v59  ;;  %v5399_v34 = vmul.f32 %v5316_v10, %v5273_v59  ;;  %v5416_v39 = vmul.f32 %v5329_v15, %v5273_v59 }
  0x94   : > { %8815 = vst [vmem:[#allocation16_spill] sm:$0xff] %v5318_v11  ;;  %8816 = vst [vmem:[#allocation17_spill] sm:$0xff] %v5320_v12  ;;  %v5408_v37 = vmul.f32 %v5288_v0, %v5318_v11  ;;  %v5412_v38 = vmul.f32 %v5291_v1, %v5318_v11  ;;  %v5420_v40 = vmul.f32 %v5332_v16, %v5273_v59 }
  0x95   : > { %8820 = vst [vmem:[#allocation21_spill] sm:$0xff] %v5381_v29  ;;  %8822 = vst [vmem:[#allocation23_spill] sm:$0xff] %v5387_v31  ;;  %v5424_v41 = vmul.f32 %v5300_v4, %v5318_v11  ;;  %v5428_v42 = vmul.f32 %v5303_v5, %v5318_v11  ;;  %v5432_v43 = vmul.f32 %v5288_v0, %v5320_v12 }
  0x96   : > { %8823 = vst [vmem:[#allocation24_spill] sm:$0xff] %v5391_v32  ;;  %8824 = vst [vmem:[#allocation25_spill] sm:$0xff] %v5395_v33  ;;  %v5436_v44 = vmul.f32 %v5291_v1, %v5320_v12  ;;  %v5440_v45 = vmul.f32 %v5300_v4, %v5320_v12  ;;  %v5444_v47 = vmul.f32 %v5303_v5, %v5320_v12 }
  0x97   : > { %1473 = vperm.xlu1 %4928, %v1395_v17   ;;  %v5383_v30 = vpop.permute.xlu0 %747  ;;  %8825 = vst [vmem:[#allocation26_spill] sm:$0xff] %v5399_v34  ;;  %8827 = vst [vmem:[#allocation28_spill] sm:$0xff] %v5416_v39  ;;  %v5448_v48 = vmul.f32 %v5313_v9, %v5318_v11  ;;  %v5452_v51 = vmul.f32 %v5316_v10, %v5318_v11  ;;  %v5458_v55 = vmul.f32 %v5329_v15, %v5318_v11  ;;  %v3645_v34 = vld [vmem:[%s8597_s5 + $0x8] sm:$0xff] }
  0x98   : > { %8821 = vst [vmem:[#allocation22_spill] sm:$0xff] %v5383_v30  ;;  %v5401_v35 = vpop.permute.xlu1 %321  ;;  %8828 = vst [vmem:[#allocation29_spill] sm:$0xff] %v5420_v40  ;;  %v5462_v62 = vmul.f32 %v5332_v16, %v5318_v11  ;;  %v5466_v6 = vmul.f32 %v5313_v9, %v5320_v12  ;;  %v5470_v17 = vmul.f32 %v5316_v10, %v5320_v12 }
  0x99   : > { %8826 = vst [vmem:[#allocation27_spill] sm:$0xff] %v5401_v35  ;;  %8829 = vst [vmem:[#allocation30_spill] sm:$0xff] %v5448_v48  ;;  %v5477_v46 = vmul.f32 %v5288_v0, %v5383_v30  ;;  %v5481_v61 = vmul.f32 %v5291_v1, %v5383_v30  ;;  %v5485_v60 = vmul.f32 %v5329_v15, %v5320_v12 }
  0x9a   : > { %8830 = vst [vmem:[#allocation31_spill] sm:$0xff] %v5452_v51  ;;  %8832 = vst [vmem:[#allocation33_spill] sm:$0xff] %v5458_v55  ;;  %v5489_v57 = vmul.f32 %v5332_v16, %v5320_v12  ;;  %v515_v59 = vmul.f32 %v5285_v63, %v5401_v35  ;;  %v517_v54 = vmul.f32 %v5294_v2, %v5401_v35 }
  0x9b   : > { %2027 = vperm.xlu1 %4928, %v2005_v36   ;;  %v5454_v52 = vpop.permute.xlu0 %755  ;;  %8833 = vst [vmem:[#allocation34_spill] sm:$0xff] %v5462_v62  ;;  %v2007_v36 = vld [vmem:[%s8596_s4 + $0x18] sm:$0xff]  ;;  %8834 = vst [vmem:[#allocation35_spill] sm:$0xff] %v5477_v46  ;;  %v5499_v53 = vmul.f32 %v5300_v4, %v5383_v30  ;;  %v5503_v50 = vmul.f32 %v5303_v5, %v5383_v30  ;;  %v514_v12 = vmul.f32 %v5297_v3, %v5401_v35  ;;  %v8626_v62 = vmov 0.0  }
  0x9c   : > { %8831 = vst [vmem:[#allocation32_spill] sm:$0xff] %v5454_v52  ;;  %8835 = vst [vmem:[#allocation36_spill] sm:$0xff] %v5481_v61  ;;  %v516_v11 = vmul.f32 %v5307_v7, %v5401_v35  ;;  %v519_v58 = vmul.f32 %v5310_v8, %v5401_v35  ;;  %v521_v21 = vmul.f32 %v5323_v13, %v5401_v35  ;;  %2164 = vmatprep.mubr.f32.mxu0 %v8626_v62 }
  0x9d   : > { %8836 = vst [vmem:[#allocation37_spill] sm:$0xff] %v5485_v60  ;;  %8837 = vst [vmem:[#allocation38_spill] sm:$0xff] %v5489_v57  ;;  %v5491_v56 = vpop.permute.xlu1 %735  ;;  %v518_v32 = vmul.f32 %v5326_v14, %v5401_v35  ;;  %v520_v55 = vmul.f32 %v5346_v20, %v5401_v35  ;;  %2325 = vmatprep.mubr.f32.mxu1 %v8626_v62  ;;  %v5544_v48 = vmul.f32 %v5316_v10, %v5383_v30 }
  0x9e   : > { %8838 = vst [vmem:[#allocation39_spill] sm:$0xff] %v5491_v56  ;;  %8839 = vst [vmem:[#allocation40_spill] sm:$0xff] %v5499_v53  ;;  %v921_v60 = vmul.f32 %v5313_v9, %v5491_v56  ;;  %v923_v40 = vmul.f32 %v5316_v10, %v5491_v56  ;;  %v920_v39 = vmul.f32 %v5329_v15, %v5491_v56 }
  0x9f   : > { %8840 = vst [vmem:[#allocation41_spill] sm:$0xff] %v5503_v50  ;;  %2037 = vperm.xlu1 %4928, %v2007_v36   ;;  %v5513_v57 = vpop.permute.xlu0 %763  ;;  %v917_v33 = vmul.f32 %v5288_v0, %v5491_v56  ;;  %v919_v36 = vmul.f32 %v5291_v1, %v5491_v56  ;;  %v916_v31 = vmul.f32 %v5300_v4, %v5491_v56  ;;  %8843 = vst [vmem:[#allocation44_spill] sm:$0xff] %v5544_v48 }
  0xa0   : > { %8841 = vst [vmem:[#allocation42_spill] sm:$0xff] %v5513_v57  ;;  %v918_v51 = vmul.f32 %v5303_v5, %v5491_v56  ;;  %v5540_v50 = vmul.f32 %v5313_v9, %v5383_v30  ;;  %v5548_v61 = vadd.f32 %v921_v60, %v519_v58  ;;  %v5550_v35 = vadd.f32 %v923_v40, %v521_v21  ;;  %v3646_v21 = vld [vmem:[%s8597_s5 + $0x10] sm:$0xff] }
  0xa1   : > { %v5552_v46 = vadd.f32 %v920_v39, %v518_v32  ;;  %v922_v29 = vmul.f32 %v5332_v16, %v5491_v56  ;;  %v5564_v48 = vmul.f32 %v5291_v1, %v5454_v52  ;;  %v5568_v58 = vmul.f32 %v5329_v15, %v5383_v30 }
  0xa2   : > { %8842 = vst [vmem:[#allocation43_spill] sm:$0xff] %v5540_v50  ;;  %v5546_v53 = vpop.permute.xlu1 %1398  ;;  %8845 = vst [vmem:[#allocation46_spill] sm:$0xff] %v5548_v61  ;;  %v5560_v50 = vmul.f32 %v5288_v0, %v5454_v52  ;;  %v5572_v60 = vmul.f32 %v5332_v16, %v5383_v30  ;;  %v5577_v32 = vadd.f32 %v917_v33, %v515_v59 }
  0xa3   : > { %8844 = vst [vmem:[#allocation45_spill] sm:$0xff] %v5546_v53  ;;  %8846 = vst [vmem:[#allocation47_spill] sm:$0xff] %v5550_v35  ;;  %3667 = vperm.xlu1 %4928, %v3645_v34   ;;  %v5556_v62 = vpop.permute.xlu0 %771  ;;  %v5579_v34 = vadd.f32 %v919_v36, %v517_v54  ;;  %v5583_v39 = vmul.f32 %v5300_v4, %v5454_v52  ;;  %v5587_v40 = vmul.f32 %v5303_v5, %v5454_v52 }
  0xa4   : > { %8847 = vst [vmem:[#allocation48_spill] sm:$0xff] %v5552_v46  ;;  %8848 = vst [vmem:[#allocation49_spill] sm:$0xff] %v5556_v62  ;;  %v5589_v56 = vadd.f32 %v916_v31, %v514_v12  ;;  %v5591_v30 = vadd.f32 %v918_v51, %v516_v11  ;;  %v5597_v59 = vadd.f32 %v922_v29, %v520_v55  ;;  %v4624_v29 = vld [vmem:[%s5242_s30 + $0x11] ss:$2 sm:$0xff] }
  0xa5   : > { %8849 = vst [vmem:[#allocation50_spill] sm:$0xff] %v5560_v50  ;;  %8850 = vst [vmem:[#allocation51_spill] sm:$0xff] %v5564_v48  ;;  %v5603_v33 = vmul.f32 %v5291_v1, %v5513_v57  ;;  %v5607_v36 = vmul.f32 %v5300_v4, %v5513_v57  ;;  %v5611_v11 = vmul.f32 %v5303_v5, %v5513_v57 }
  0xa6   : > { %8851 = vst [vmem:[#allocation52_spill] sm:$0xff] %v5568_v58  ;;  %8852 = vst [vmem:[#allocation53_spill] sm:$0xff] %v5572_v60  ;;  %v5595_v60 = vmul.f32 %v5288_v0, %v5513_v57  ;;  %v5599_v54 = vpop.permute.xlu1 %326  ;;  %v5615_v12 = vmul.f32 %v5313_v9, %v5454_v52  ;;  %v5626_v58 = vmul.f32 %v5316_v10, %v5454_v52 }
  0xa7   : > { %8853 = vst [vmem:[#allocation54_spill] sm:$0xff] %v5583_v39  ;;  %8854 = vst [vmem:[#allocation55_spill] sm:$0xff] %v5587_v40  ;;  %3672 = vperm.xlu1 %4928, %v3646_v21   ;;  %v5618_v31 = vpop.permute.xlu0 %779  ;;  %v531_v51 = vmul.f32 %v5285_v63, %v5599_v54  ;;  %v533_v55 = vmul.f32 %v5294_v2, %v5599_v54  ;;  %v5630_v57 = vmul.f32 %v5329_v15, %v5454_v52  ;;  %v3647_v21 = vld [vmem:[%s8597_s5 + $0x18] sm:$0xff] }
  0xa8   : > { %8855 = vst [vmem:[#allocation56_spill] sm:$0xff] %v5595_v60  ;;  %8856 = vst [vmem:[#allocation57_spill] sm:$0xff] %v5597_v59  ;;  %v532_v9 = vmul.f32 %v5307_v7, %v5599_v54  ;;  %v5641_v59 = vmul.f32 %v5288_v0, %v5556_v62  ;;  %v5653_v15 = vmul.f32 %v5300_v4, %v5556_v62 }
  0xa9   : > { %8857 = vst [vmem:[#allocation58_spill] sm:$0xff] %v5599_v54  ;;  %8858 = vst [vmem:[#allocation59_spill] sm:$0xff] %v5603_v33  ;;  %v5657_v10 = vmul.f32 %v5303_v5, %v5556_v62  ;;  %v5660_v46 = vrot.slane %v4624_v29, %v5248_v49  ;;  %v5677_v49 = vadd.f32 %v5432_v43, %v531_v51 }
  0xaa   : > { %8859 = vst [vmem:[#allocation60_spill] sm:$0xff] %v5607_v36  ;;  %8860 = vst [vmem:[#allocation61_spill] sm:$0xff] %v5611_v11  ;;  %v5680_v29 = vadd.f32 %v5436_v44, %v533_v55  ;;  %v5699_v44 = vadd.f32 %v5444_v47, %v532_v9  ;;  %v5725_v47 = vmul.f32 %v5326_v14, %v5599_v54 }
  0xab   : > { %8861 = vst [vmem:[#allocation62_spill] sm:$0xff] %v5615_v12  ;;  %8862 = vst [vmem:[#allocation63_spill] sm:$0xff] %v5618_v31  ;;  %v530_v12 = vmul.f32 %v5297_v3, %v5599_v54  ;;  %3677 = vperm.xlu1 %4928, %v3647_v21   ;;  %v3648_v21 = vld [vmem:[%s8597_s5 + $0x20] sm:$0xff] }
  0xac   : > { %8863 = vst [vmem:[#allocation64_spill] sm:$0xff] %v5626_v58  ;;  %8864 = vst [vmem:[#allocation65_spill] sm:$0xff] %v5630_v57  ;;  %v5645_v58 = vmul.f32 %v5332_v16, %v5454_v52  ;;  %v5649_v57 = vmul.f32 %v5291_v1, %v5556_v62  ;;  %v5666_v52 = vmul.f32 %v5288_v0, %v5618_v31 }
  0xad   : > { %8865 = vst [vmem:[#allocation66_spill] sm:$0xff] %v5641_v59  ;;  %8868 = vst [vmem:[#allocation69_spill] sm:$0xff] %v5653_v15  ;;  %v5662_v59 = vpop.permute.xlu1 %331  ;;  %v535_v16 = vmul.f32 %v5310_v8, %v5599_v54  ;;  %v537_v62 = vmul.f32 %v5323_v13, %v5599_v54  ;;  %v5696_v43 = vadd.f32 %v5440_v45, %v530_v12 }
  0xae   : > { %8866 = vst [vmem:[#allocation67_spill] sm:$0xff] %v5645_v58  ;;  %8867 = vst [vmem:[#allocation68_spill] sm:$0xff] %v5649_v57  ;;  %v5670_v58 = vmul.f32 %v5291_v1, %v5618_v31  ;;  %v5717_v9 = vmul.f32 %v5285_v63, %v5662_v59 }
  0xaf   : > { %8869 = vst [vmem:[#allocation70_spill] sm:$0xff] %v5657_v10  ;;  %8870 = vst [vmem:[#allocation71_spill] sm:$0xff] %v5660_v46  ;;  %v5684_v46 = vmul.f32 %v5300_v4, %v5618_v31  ;;  %v5702_v51 = vadd.f32 %v5466_v6, %v535_v16  ;;  %v5705_v55 = vadd.f32 %v5470_v17, %v537_v62  ;;  %3682 = vperm.xlu1 %4928, %v3648_v21   ;;  %v3649_v21 = vld [vmem:[%s8597_s5 + $0x28] sm:$0xff] }
  0xb0   : > { %8871 = vst [vmem:[#allocation72_spill] sm:$0xff] %v5662_v59  ;;  %8872 = vst [vmem:[#allocation73_spill] sm:$0xff] %v5666_v52  ;;  %v5690_v52 = vpop.permute.xlu0 %306  ;;  %v5721_v16 = vmul.f32 %v5294_v2, %v5662_v59  ;;  %v5729_v62 = vmul.f32 %v5346_v20, %v5599_v54  ;;  %v5741_v10 = vmul.f32 %v5307_v7, %v5662_v59 }
  0xb1   : > { %8873 = vst [vmem:[#allocation74_spill] sm:$0xff] %v5670_v58  ;;  %8874 = vst [vmem:[#allocation75_spill] sm:$0xff] %v5684_v46  ;;  %v5688_v58 = vmul.f32 %v5303_v5, %v5618_v31  ;;  %v467_v31 = vmul.f32 %v5285_v63, %v5690_v52  ;;  %v466_v46 = vmul.f32 %v5297_v3, %v5690_v52  ;;  %v5731_v6 = vpop.permute.xlu1 %743 }
  0xb2   : > { %8876 = vst [vmem:[#allocation77_spill] sm:$0xff] %v5690_v52  ;;  %8877 = vst [vmem:[#allocation78_spill] sm:$0xff] %v5702_v51  ;;  %v468_v45 = vmul.f32 %v5307_v7, %v5690_v52  ;;  %v471_v15 = vmul.f32 %v5310_v8, %v5690_v52  ;;  %v950_v51 = vmul.f32 %v5303_v5, %v5731_v6 }
  0xb3   : > { %8875 = vst [vmem:[#allocation76_spill] sm:$0xff] %v5688_v58  ;;  %8878 = vst [vmem:[#allocation79_spill] sm:$0xff] %v5705_v55  ;;  %v469_v58 = vmul.f32 %v5294_v2, %v5690_v52  ;;  %v1125_v17 = vadd.f32 %v5339_v18, %v467_v31  ;;  %v5737_v55 = vmul.f32 %v5297_v3, %v5662_v59  ;;  %3687 = vperm.xlu1 %4928, %v3649_v21   ;;  %v3650_v21 = vld [vmem:[%s8597_s5 + $0x30] sm:$0xff] }
  0xb4   : > { %8879 = vst [vmem:[#allocation80_spill] sm:$0xff] %v5725_v47  ;;  %8880 = vst [vmem:[#allocation81_spill] sm:$0xff] %v5729_v62  ;;  %v5743_v47 = vpop.permute.xlu0 %311  ;;  %v1124_v54 = vadd.f32 %v5353_v22, %v466_v46  ;;  %v1126_v18 = vadd.f32 %v5357_v23, %v468_v45  ;;  %v473_v46 = vmul.f32 %v5323_v13, %v5690_v52 }
  0xb5   : > { %8881 = vst [vmem:[#allocation82_spill] sm:$0xff] %v5731_v6  ;;  %v1127_v12 = vadd.f32 %v5343_v19, %v469_v58  ;;  %8882 = vst [vmem:[#allocation83_spill] sm:$0xff] %v5743_v47  ;;  %v5752_v19 = vmul.f32 %v5310_v8, %v5662_v59  ;;  %v5756_v58 = vmul.f32 %v5323_v13, %v5662_v59  ;;  %v5782_v57 = vpop.permute.xlu1 %1408 }
  0xb6   : > { %v483_v31 = vmul.f32 %v5285_v63, %v5743_v47  ;;  %v1477_v62 = vadd.f32 %v5546_v53, %v1125_v17  ;;  %v485_v22 = vmul.f32 %v5294_v2, %v5743_v47  ;;  %v482_v45 = vmul.f32 %v5297_v3, %v5743_v47  ;;  %8886 = vst [vmem:[#allocation87_spill] sm:$0xff] %v5782_v57 }
  0xb7   : > { %8883 = vst [vmem:[#allocation84_spill] sm:$0xff] %v5752_v19  ;;  %8884 = vst [vmem:[#allocation85_spill] sm:$0xff] %v5756_v58  ;;  %v1479_v23 = vadd.f32 %v5546_v53, %v1127_v12  ;;  %v484_v59 = vmul.f32 %v5307_v7, %v5743_v47  ;;  %v949_v17 = vmul.f32 %v5288_v0, %v5731_v6  ;;  %3692 = vperm.xlu1 %4928, %v3650_v21  }
  0xb8   : > { %v951_v58 = vmul.f32 %v5291_v1, %v5731_v6  ;;  %v948_v19 = vmul.f32 %v5300_v4, %v5731_v6  ;;  %v5780_v12 = vpop.permute.xlu0 %316  ;;  %v1141_v35 = vadd.f32 %v5408_v37, %v483_v31  ;;  %v1733_v11 = vmax.f32 %v1477_v62, 0.0 }
  0xb9   : > { %8885 = vst [vmem:[#allocation86_spill] sm:$0xff] %v5780_v12  ;;  %v1476_v61 = vadd.f32 %v5546_v53, %v1124_v54  ;;  %v1478_v36 = vadd.f32 %v5546_v53, %v1126_v18  ;;  %v499_v33 = vmul.f32 %v5285_v63, %v5780_v12  ;;  %v501_v6 = vmul.f32 %v5294_v2, %v5780_v12  ;;  %v5807_v5 = vpop.permute.xlu1 %336 }
  0xba   : > { %v498_v60 = vmul.f32 %v5297_v3, %v5780_v12  ;;  %v500_v40 = vmul.f32 %v5307_v7, %v5780_v12  ;;  %v1143_v39 = vadd.f32 %v5412_v38, %v485_v22  ;;  %v1735_v37 = vmax.f32 %v1479_v23, 0.0  ;;  %v3651_v38 = vld [vmem:[%s8597_s5 + $0x38] sm:$0xff]  ;;  %v3652_v23 = vld [vmem:[%s8597_s5 + $0x40] sm:$0xff] }
  0xbb   : > { %v1140_v62 = vadd.f32 %v5424_v41, %v482_v45  ;;  %v1142_v54 = vadd.f32 %v5428_v42, %v484_v59  ;;  %v1157_v18 = vadd.f32 %v5361_v24, %v499_v33  ;;  %v1159_v31 = vadd.f32 %v5365_v25, %v501_v6  ;;  %v8888_v24 = vld [vmem:[#allocation21_spill] sm:$0xff]  ;;  %3697 = vperm.xlu1 %4928, %v3651_v38  }
  0xbc   : > { %v1156_v53 = vadd.f32 %v5369_v26, %v498_v60  ;;  %v1158_v48 = vadd.f32 %v5373_v27, %v500_v40  ;;  %v5805_v50 = vpop.permute.xlu0 %1403  ;;  %v1732_v41 = vmax.f32 %v1476_v61, 0.0  ;;  %v1734_v22 = vmax.f32 %v1478_v36, 0.0 }
  0xbd   : > { %8887 = vst [vmem:[#allocation88_spill] sm:$0xff] %v5805_v50  ;;  %v5813_v42 = vadd.f32 %v5377_v28, %v471_v15  ;;  %v5816_v59 = vadd.f32 %v8888_v24, %v473_v46  ;;  %v1493_v25 = vadd.f32 %v5805_v50, %v1141_v35  ;;  %v1495_v26 = vadd.f32 %v5805_v50, %v1143_v39  ;;  %v5828_v39 = vpop.permute.xlu1 %341 }
  0xbe   : > { %v1492_v27 = vadd.f32 %v5805_v50, %v1140_v62  ;;  %v1494_v60 = vadd.f32 %v5805_v50, %v1142_v54  ;;  %v1509_v40 = vadd.f32 %v5782_v57, %v1157_v18  ;;  %v1511_v33 = vadd.f32 %v5782_v57, %v1159_v31  ;;  %8890 = vst [vmem:[#allocation89_spill] sm:$0xff] %v5828_v39 }
  0xbf   : > { %v1508_v61 = vadd.f32 %v5782_v57, %v1156_v53  ;;  %v1510_v15 = vadd.f32 %v5782_v57, %v1158_v48  ;;  %v1749_v28 = vmax.f32 %v1493_v25, 0.0  ;;  %v1751_v36 = vmax.f32 %v1495_v26, 0.0  ;;  %3702 = vperm.xlu1 %4928, %v3652_v23  }
  0xc0   : > { %v1748_v6 = vmax.f32 %v1492_v27, 0.0  ;;  %v1750_v46 = vmax.f32 %v1494_v60, 0.0  ;;  %v5826_v35 = vpop.permute.xlu0 %1413  ;;  %v1205_v45 = vadd.f32 %v949_v17, %v5717_v9  ;;  %v1207_v21 = vadd.f32 %v951_v58, %v5721_v16 }
  0xc1   : > { %8889 = vst [vmem:[#allocation21_spill] sm:$0xff] %v5826_v35  ;;  %v1204_v53 = vadd.f32 %v948_v19, %v5737_v55  ;;  %v1206_v48 = vadd.f32 %v950_v51, %v5741_v10  ;;  %v4643_v62 = vpack.c.bf16 %v1749_v28, %v1733_v11  ;;  %v4675_v54 = vpack.c.bf16 %v1751_v36, %v1735_v37  ;;  %v3654_v36 = vld [vmem:[%s8597_s5 + $0x50] sm:$0xff] }
  0xc2   : > { %v4645_v18 = vpack.c.bf16 %v1748_v6, %v1732_v41  ;;  %v4677_v31 = vpack.c.bf16 %v1750_v46, %v1734_v22  ;;  %v1525_v38 = vadd.f32 %v5826_v35, %v5577_v32  ;;  %v1527_v24 = vadd.f32 %v5826_v35, %v5579_v34  ;;  %v3653_v32 = vld [vmem:[%s8597_s5 + $0x48] sm:$0xff] }
  0xc3   : > { %v1524_v25 = vadd.f32 %v5826_v35, %v5589_v56  ;;  %v1526_v9 = vadd.f32 %v5826_v35, %v5591_v30  ;;  %4644 = vmatprep.subr.bf16.mxu0 %v4643_v62  ;;  %v1765_v55 = vmax.f32 %v1509_v40, 0.0  ;;  %v1767_v10 = vmax.f32 %v1511_v33, 0.0  ;;  %4676 = vmatprep.subr.bf16.mxu1 %v4675_v54  ;;  %v5850_v30 = vpop.permute.xlu1 %751 }
  0xc4   : > { %v1764_v11 = vmax.f32 %v1508_v61, 0.0  ;;  %v1766_v51 = vmax.f32 %v1510_v15, 0.0  ;;  %v5845_v16 = vpop.permute.xlu0 %1423  ;;  %4646 = vmatpush1.bf16.msra.mxu0 %v4645_v18  ;;  %v1781_v34 = vmax.f32 %v1525_v38, 0.0  ;;  %v1783_v19 = vmax.f32 %v1527_v24, 0.0  ;;  %4678 = vmatpush1.bf16.msra.mxu1 %v4677_v31  ;;  %8892 = vst [vmem:[#allocation91_spill] sm:$0xff] %v5850_v30 }
  0xc5   : > { %8891 = vst [vmem:[#allocation90_spill] sm:$0xff] %v5845_v16  ;;  %v1780_v56 = vmax.f32 %v1524_v25, 0.0  ;;  %v1782_v58 = vmax.f32 %v1526_v9, 0.0  ;;  %v1557_v17 = vadd.f32 %v5845_v16, %v1205_v45  ;;  %v1559_v37 = vadd.f32 %v5845_v16, %v1207_v21  ;;  %3707 = vperm.xlu1 %4928, %v3653_v32  }
  0xc6   : > { %v1556_v41 = vadd.f32 %v5845_v16, %v1204_v53  ;;  %v1558_v22 = vadd.f32 %v5845_v16, %v1206_v48  ;;  %v4647_v26 = vpack.c.bf16 %v1781_v34, %v1765_v55  ;;  %v4679_v27 = vpack.c.bf16 %v1783_v19, %v1767_v10 }
  0xc7   : > { %v4649_v60 = vpack.c.bf16 %v1780_v56, %v1764_v11  ;;  %v4681_v40 = vpack.c.bf16 %v1782_v58, %v1766_v51  ;;  %v563_v33 = vmul.f32 %v5285_v63, %v5807_v5  ;;  %v5860_v61 = vmul.f32 %v5310_v8, %v5743_v47  ;;  %v5883_v18 = vpop.permute.xlu1 %1418  ;;  %v3655_v51 = vld [vmem:[%s8597_s5 + $0x58] sm:$0xff] }
  0xc8   : > { %v5864_v15 = vmul.f32 %v5326_v14, %v5690_v52  ;;  %v5868_v28 = vmul.f32 %v5346_v20, %v5690_v52  ;;  %4648 = vmatprep.subr.bf16.mxu0 %v4647_v26  ;;  %4680 = vmatprep.subr.bf16.mxu1 %v4679_v27  ;;  %v1813_v6 = vmax.f32 %v1557_v17, 0.0  ;;  %v579_v46 = vmul.f32 %v5285_v63, %v5828_v39  ;;  %v5879_v21 = vpop.permute.xlu0 %1433 }
  0xc9   : > { %v981_v23 = vmul.f32 %v5288_v0, %v5850_v30  ;;  %v565_v45 = vmul.f32 %v5294_v2, %v5807_v5  ;;  %8893 = vst [vmem:[#allocation92_spill] sm:$0xff] %v5879_v21  ;;  %4650 = vmatpush1.bf16.msra.mxu0 %v4649_v60  ;;  %4682 = vmatpush1.bf16.msra.mxu1 %v4681_v40  ;;  %v1815_v53 = vmax.f32 %v1559_v37, 0.0  ;;  %v1812_v48 = vmax.f32 %v1556_v41, 0.0 }
  0xca   : > { %v1814_v62 = vmax.f32 %v1558_v22, 0.0  ;;  %v983_v54 = vmul.f32 %v5291_v1, %v5850_v30  ;;  %8894 = vst [vmem:[#allocation93_spill] sm:$0xff] %v5883_v18  ;;  %v581_v38 = vmul.f32 %v5294_v2, %v5828_v39  ;;  %v578_v24 = vmul.f32 %v5297_v3, %v5828_v39  ;;  %3712 = vperm.xlu1 %4928, %v3654_v36   ;;  %v3656_v36 = vld [vmem:[%s8597_s5 + $0x60] sm:$0xff] }
  0xcb   : > { %v1237_v31 = vadd.f32 %v981_v23, %v579_v46  ;;  %v980_v25 = vmul.f32 %v5300_v4, %v5850_v30  ;;  %v1541_v9 = vadd.f32 %v5883_v18, %v5677_v49  ;;  %v1543_v55 = vadd.f32 %v5883_v18, %v5680_v29  ;;  %v8896_v46 = vld [vmem:[#allocation35_spill] sm:$0xff] }
  0xcc   : > { %v1540_v10 = vadd.f32 %v5883_v18, %v5696_v43  ;;  %v1542_v11 = vadd.f32 %v5883_v18, %v5699_v44  ;;  %v1239_v34 = vadd.f32 %v983_v54, %v581_v38  ;;  %v562_v49 = vmul.f32 %v5297_v3, %v5807_v5  ;;  %v5907_v43 = vpop.permute.xlu1 %346  ;;  %v8897_v54 = vld [vmem:[#allocation36_spill] sm:$0xff] }
  0xcd   : > { %v5903_v32 = vadd.f32 %v5879_v21, %v1237_v31  ;;  %v1236_v19 = vadd.f32 %v980_v25, %v578_v24  ;;  %v1797_v56 = vmax.f32 %v1541_v9, 0.0  ;;  %v1799_v29 = vmax.f32 %v1543_v55, 0.0  ;;  %8895 = vst [vmem:[#allocation94_spill] sm:$0xff] %v5907_v43  ;;  %v8898_v24 = vld [vmem:[#allocation13_spill] sm:$0xff] }
  0xce   : > { %v1796_v58 = vmax.f32 %v1540_v10, 0.0  ;;  %v1798_v17 = vmax.f32 %v1542_v11, 0.0  ;;  %v5910_v44 = vadd.f32 %v5879_v21, %v1239_v34  ;;  %v564_v41 = vmul.f32 %v5307_v7, %v5807_v5  ;;  %3717 = vperm.xlu1 %4928, %v3655_v51   ;;  %v8901_v11 = vld [vmem:[#allocation30_spill] sm:$0xff] }
  0xcf   : > { %v5913_v37 = vadd.f32 %v5879_v21, %v1236_v19  ;;  %v489_v22 = vmul.f32 %v5323_v13, %v5743_v47  ;;  %v4651_v26 = vpack.c.bf16 %v1813_v6, %v1797_v56  ;;  %v4683_v27 = vpack.c.bf16 %v1815_v53, %v1799_v29  ;;  %v8899_v53 = vld [vmem:[#allocation40_spill] sm:$0xff] }
  0xd0   : > { %v4653_v60 = vpack.c.bf16 %v1812_v48, %v1796_v58  ;;  %v4685_v40 = vpack.c.bf16 %v1814_v62, %v1798_v17  ;;  %v5923_v23 = vadd.f32 %v8896_v46, %v563_v33  ;;  %v5926_v31 = vadd.f32 %v8897_v54, %v565_v45  ;;  %v5938_v45 = vpop.permute.xlu1 %351  ;;  %v3657_v58 = vld [vmem:[%s8597_s5 + $0x68] sm:$0xff] }
  0xd1   : > { %v580_v38 = vmul.f32 %v5307_v7, %v5828_v39  ;;  %v982_v25 = vmul.f32 %v8898_v24, %v5850_v30  ;;  %4652 = vmatprep.subr.bf16.mxu0 %v4651_v26  ;;  %4684 = vmatprep.subr.bf16.mxu1 %v4683_v27  ;;  %v1220_v48 = vadd.f32 %v8899_v53, %v562_v49  ;;  %v8902_v49 = vld [vmem:[#allocation41_spill] sm:$0xff]  ;;  %v8903_v26 = vld [vmem:[#allocation50_spill] sm:$0xff] }
  0xd2   : > { %v595_v62 = vmul.f32 %v5285_v63, %v5907_v43  ;;  %v597_v33 = vmul.f32 %v5294_v2, %v5907_v43  ;;  %8900 = vst [vmem:[#allocation35_spill] sm:$0xff] %v5938_v45  ;;  %4654 = vmatpush1.bf16.msra.mxu0 %v4653_v60  ;;  %4686 = vmatpush1.bf16.msra.mxu1 %v4685_v40  ;;  %v8907_v53 = vld [vmem:[#allocation54_spill] sm:$0xff] }
  0xd3   : > { %v1238_v55 = vadd.f32 %v982_v25, %v580_v38  ;;  %v594_v10 = vmul.f32 %v5297_v3, %v5907_v43  ;;  %v1145_v51 = vadd.f32 %v8901_v11, %v5860_v61  ;;  %3722 = vperm.xlu1 %4928, %v3656_v36   ;;  %v1222_v19 = vadd.f32 %v8902_v49, %v564_v41  ;;  %v8904_v41 = vld [vmem:[#allocation51_spill] sm:$0xff]  ;;  %v8905_v36 = vld [vmem:[#allocation45_spill] sm:$0xff] }
  0xd4   : > { %v611_v56 = vmul.f32 %v5285_v63, %v5938_v45  ;;  %v596_v29 = vmul.f32 %v5307_v7, %v5907_v43  ;;  %v5958_v61 = vadd.f32 %v8903_v26, %v595_v62  ;;  %v613_v27 = vmul.f32 %v5294_v2, %v5938_v45  ;;  %v8906_v38 = vld [vmem:[#allocation31_spill] sm:$0xff]  ;;  %v5980_v26 = vpop.permute.xlu1 %759 }
  0xd5   : > { %v5955_v17 = vadd.f32 %v5879_v21, %v1238_v55  ;;  %v5963_v60 = vadd.f32 %v8904_v41, %v597_v33  ;;  %v610_v40 = vmul.f32 %v5297_v3, %v5938_v45  ;;  %v1481_v46 = vadd.f32 %v8905_v36, %v5813_v42  ;;  %v8908_v11 = vld [vmem:[#allocation23_spill] sm:$0xff] }
  0xd6   : > { %v1497_v54 = vadd.f32 %v5805_v50, %v1145_v51  ;;  %v1147_v25 = vadd.f32 %v8906_v38, %v489_v22  ;;  %v5972_v55 = vadd.f32 %v8907_v53, %v594_v10  ;;  %v1483_v62 = vadd.f32 %v8905_v36, %v5816_v59  ;;  %v3659_v59 = vld [vmem:[%s8597_s5 + $0x78] sm:$0xff]  ;;  %v8910_v53 = vld [vmem:[#allocation33_spill] sm:$0xff]  ;;  %v8912_v21 = vld [vmem:[#allocation55_spill] sm:$0xff] }
  0xd7   : > { %v486_v33 = vmul.f32 %v5326_v14, %v5743_v47  ;;  %v1128_v49 = vadd.f32 %v8908_v11, %v5864_v15  ;;  %3727 = vperm.xlu1 %4928, %v3657_v58   ;;  %v612_v42 = vmul.f32 %v5307_v7, %v5938_v45  ;;  %v1737_v51 = vmax.f32 %v1481_v46, 0.0  ;;  %v5999_v45 = vpop.permute.xlu0 %1443 }
  0xd8   : > { %v1753_v22 = vmax.f32 %v1497_v54, 0.0  ;;  %v1499_v10 = vadd.f32 %v5805_v50, %v1147_v25  ;;  %v1013_v41 = vmul.f32 %v5288_v0, %v5980_v26  ;;  %v1015_v15 = vmul.f32 %v5291_v1, %v5980_v26  ;;  %8911 = vst [vmem:[#allocation13_spill] sm:$0xff] %v5999_v45 }
  0xd9   : > { %v1012_v58 = vmul.f32 %v5300_v4, %v5980_v26  ;;  %v1014_v38 = vmul.f32 %v8898_v24, %v5980_v26  ;;  %v1739_v54 = vmax.f32 %v1483_v62, 0.0  ;;  %v1144_v11 = vadd.f32 %v8910_v53, %v486_v33 }
  0xda   : > { %v5996_v46 = vpack.c.bf16 %v1753_v22, %v1737_v51  ;;  %v1755_v25 = vmax.f32 %v1499_v10, 0.0  ;;  %v1269_v34 = vadd.f32 %v1013_v41, %v611_v56  ;;  %v1271_v9 = vadd.f32 %v1015_v15, %v613_v27  ;;  %v8914_v51 = vld [vmem:[#allocation24_spill] sm:$0xff]  ;;  %v6009_v22 = vpop.permute.xlu1 %1428 }
  0xdb   : > { %v1268_v6 = vadd.f32 %v1012_v58, %v610_v40  ;;  %v1270_v52 = vadd.f32 %v1014_v38, %v612_v42  ;;  %3737 = vperm.xlu1 %4928, %v3659_v59   ;;  %v1846_v43 = vmax.f32 %v5955_v17, 0.0  ;;  %v6003_v30 = vadd.f32 %v8912_v21, %v596_v29 }
  0xdc   : > { %8909 = vst [vmem:[#allocation36_spill] sm:$0xff] %v5996_v46  ;;  %v6005_v39 = vpack.c.bf16 %v1755_v25, %v1739_v54  ;;  %v1130_v62 = vadd.f32 %v8914_v51, %v5868_v28  ;;  %v6012_v56 = vadd.f32 %v5999_v45, %v1269_v34  ;;  %v1480_v27 = vadd.f32 %v8905_v36, %v1128_v49 }
  0xdd   : > { %v1496_v40 = vadd.f32 %v5805_v50, %v1144_v11  ;;  %v488_v17 = vmul.f32 %v5346_v20, %v5743_v47  ;;  %v1573_v21 = vadd.f32 %v6009_v22, %v5923_v23  ;;  %v1575_v29 = vadd.f32 %v6009_v22, %v5926_v31  ;;  %v6113_v47 = vpop.permute.xlu0 %1453 }
  0xde   : > { %8913 = vst [vmem:[#allocation40_spill] sm:$0xff] %v6005_v39  ;;  %v1572_v28 = vadd.f32 %v6009_v22, %v1220_v48  ;;  %v1574_v33 = vadd.f32 %v6009_v22, %v1222_v19  ;;  %v6026_v42 = vadd.f32 %v5999_v45, %v1271_v9  ;;  %v6029_v49 = vadd.f32 %v5999_v45, %v1268_v6  ;;  %v6034_v31 = vpop.permute.xlu1 %356  ;;  %v8916_v19 = vld [vmem:[#allocation34_spill] sm:$0xff] }
  0xdf   : > { %v6032_v10 = vadd.f32 %v5999_v45, %v1270_v52  ;;  %v1829_v59 = vmax.f32 %v1573_v21, 0.0  ;;  %v1831_v23 = vmax.f32 %v1575_v29, 0.0  ;;  %8915 = vst [vmem:[#allocation30_spill] sm:$0xff] %v6034_v31  ;;  %v1736_v48 = vmax.f32 %v1480_v27, 0.0  ;;  %8935 = vst [vmem:[#allocation54_spill] sm:$0xff] %v6113_v47  ;;  %v8966_v45 = vld [vmem:[#allocation19_spill] sm:$0xff] }
  0xe0   : > { %v1828_v41 = vmax.f32 %v1572_v28, 0.0  ;;  %v1830_v15 = vmax.f32 %v1574_v33, 0.0  ;;  %v1752_v58 = vmax.f32 %v1496_v40, 0.0  ;;  %v1146_v38 = vadd.f32 %v8916_v19, %v488_v17  ;;  %v8922_v33 = vld [vmem:[#allocation56_spill] sm:$0xff] }
  0xe1   : > { %v1482_v54 = vadd.f32 %v8905_v36, %v1130_v62  ;;  %v8917_v9 = vmax.f32 %v5903_v32, 0.0  ;;  %v8918_v6 = vmax.f32 %v5910_v44, 0.0  ;;  %v8919_v52 = vmax.f32 %v5913_v37, 0.0  ;;  %v8924_v19 = vld [vmem:[#allocation60_spill] sm:$0xff] }
  0xe2   : > { %v4689_v51 = vpack.c.bf16 %v1846_v43, %v1830_v15  ;;  %v627_v21 = vmul.f32 %v5285_v63, %v6034_v31  ;;  %v629_v27 = vmul.f32 %v5294_v2, %v6034_v31  ;;  %v626_v40 = vmul.f32 %v5297_v3, %v6034_v31  ;;  %v6058_v17 = vpop.permute.xlu1 %361  ;;  %v8932_v28 = vld [vmem:[#allocation28_spill] sm:$0xff] }
  0xe3   : > { %v4655_v25 = vpack.c.bf16 %v8917_v9, %v1829_v59  ;;  %v4687_v53 = vpack.c.bf16 %v8918_v6, %v1831_v23  ;;  %v4657_v11 = vpack.c.bf16 %v8919_v52, %v1828_v41  ;;  %v628_v32 = vmul.f32 %v5307_v7, %v6034_v31  ;;  %8921 = vst [vmem:[#allocation50_spill] sm:$0xff] %v6058_v17  ;;  %v8925_v6 = vld [vmem:[#allocation25_spill] sm:$0xff]  ;;  %v8926_v52 = vld [vmem:[#allocation46_spill] sm:$0xff]  ;;  %v8933_v44 = vld [vmem:[#allocation48_spill] sm:$0xff] }
  0xe4   : > { %v6053_v62 = vpack.c.bf16 %v1752_v58, %v1736_v48  ;;  %v1498_v43 = vadd.f32 %v5805_v50, %v1146_v38  ;;  %v503_v37 = vmul.f32 %v5310_v8, %v5780_v12  ;;  %v6063_v59 = vadd.f32 %v8922_v33, %v627_v21  ;;  %v8923_v48 = vld [vmem:[#allocation59_spill] sm:$0xff] }
  0xe5   : > { %4656 = vmatprep.subr.bf16.mxu0 %v4655_v25  ;;  %4688 = vmatprep.subr.bf16.mxu1 %v4687_v53  ;;  %v1738_v23 = vmax.f32 %v1482_v54, 0.0  ;;  %v643_v41 = vmul.f32 %v5285_v63, %v6058_v17  ;;  %v645_v15 = vmul.f32 %v5294_v2, %v6058_v17  ;;  %v6070_v58 = vadd.f32 %v8923_v48, %v629_v27 }
  0xe6   : > { %8920 = vst [vmem:[#allocation41_spill] sm:$0xff] %v6053_v62  ;;  %4658 = vmatpush1.bf16.msra.mxu0 %v4657_v11  ;;  %4690 = vmatpush1.bf16.msra.mxu1 %v4689_v51  ;;  %v6073_v38 = vadd.f32 %v8924_v19, %v626_v40  ;;  %v642_v9 = vmul.f32 %v5297_v3, %v6058_v17  ;;  %v1754_v25 = vmax.f32 %v1498_v43, 0.0  ;;  %v8927_v51 = vld [vmem:[#allocation61_spill] sm:$0xff] }
  0xe7   : > { %v1161_v53 = vadd.f32 %v8925_v6, %v503_v37  ;;  %v1529_v54 = vadd.f32 %v5826_v35, %v8926_v52  ;;  %v644_v11 = vmul.f32 %v5307_v7, %v6058_v17  ;;  %v6083_v21 = vadd.f32 %v8927_v51, %v628_v32  ;;  %v8929_v37 = vld [vmem:[#allocation47_spill] sm:$0xff]  ;;  %v6096_v6 = vpop.permute.xlu1 %767  ;;  %v8931_v52 = vld [vmem:[#allocation26_spill] sm:$0xff] }
  0xe8   : > { %v505_v27 = vmul.f32 %v5323_v13, %v5780_v12  ;;  %v502_v40 = vmul.f32 %v5326_v14, %v5780_v12  ;;  %v6089_v33 = vpack.c.bf16 %v1754_v25, %v1738_v23  ;;  %v1531_v48 = vadd.f32 %v5826_v35, %v8929_v37  ;;  %8930 = vst [vmem:[#allocation31_spill] sm:$0xff] %v6096_v6 }
  0xe9   : > { %v1513_v43 = vadd.f32 %v5782_v57, %v1161_v53  ;;  %v504_v19 = vmul.f32 %v5346_v20, %v5780_v12  ;;  %v1785_v32 = vmax.f32 %v1529_v54, 0.0  ;;  %v1528_v34 = vadd.f32 %v5826_v35, %v8933_v44 }
  0xea   : > { %8928 = vst [vmem:[#allocation51_spill] sm:$0xff] %v6089_v33  ;;  %v1163_v51 = vadd.f32 %v8931_v52, %v505_v27  ;;  %v1160_v29 = vadd.f32 %v8932_v28, %v502_v40  ;;  %v1045_v23 = vmul.f32 %v5288_v0, %v6096_v6  ;;  %v1047_v25 = vmul.f32 %v5291_v1, %v6096_v6  ;;  %v8934_v40 = vld [vmem:[#allocation29_spill] sm:$0xff] }
  0xeb   : > { %v1044_v53 = vmul.f32 %v5300_v4, %v6096_v6  ;;  %v1046_v37 = vmul.f32 %v8898_v24, %v6096_v6  ;;  %v1769_v54 = vmax.f32 %v1513_v43, 0.0  ;;  %v1162_v52 = vadd.f32 %v8934_v40, %v504_v19  ;;  %v6117_v39 = vpop.permute.xlu1 %1438  ;;  %v6226_v6 = vpop.permute.xlu0 %1463 }
  0xec   : > { %v1515_v27 = vadd.f32 %v5782_v57, %v1163_v51  ;;  %v1512_v28 = vadd.f32 %v5782_v57, %v1160_v29  ;;  %v1301_v44 = vadd.f32 %v1045_v23, %v643_v41  ;;  %v1303_v12 = vadd.f32 %v1047_v25, %v645_v15  ;;  %8965 = vst [vmem:[#allocation60_spill] sm:$0xff] %v6226_v6 }
  0xed   : > { %v1300_v50 = vadd.f32 %v1044_v53, %v642_v9  ;;  %v1302_v36 = vadd.f32 %v1046_v37, %v644_v11  ;;  %v6115_v17 = vpack.c.bf16 %v1785_v32, %v1769_v54  ;;  %v1787_v33 = vmax.f32 %v1531_v48, 0.0  ;;  %v8940_v37 = vld [vmem:[#allocation57_spill] sm:$0xff] }
  0xee   : > { %v1771_v31 = vmax.f32 %v1515_v27, 0.0  ;;  %v1784_v62 = vmax.f32 %v1528_v34, 0.0  ;;  %v6120_v43 = vadd.f32 %v6113_v47, %v1301_v44  ;;  %v6123_v29 = vadd.f32 %v6113_v47, %v1303_v12  ;;  %v8957_v12 = vld [vmem:[#allocation79_spill] sm:$0xff] }
  0xef   : > { %8936 = vst [vmem:[#allocation23_spill] sm:$0xff] %v6115_v17  ;;  %v6126_v41 = vadd.f32 %v6113_v47, %v1300_v50  ;;  %v1768_v15 = vmax.f32 %v1512_v28, 0.0  ;;  %v1605_v9 = vadd.f32 %v6117_v39, %v5958_v61  ;;  %v1607_v11 = vadd.f32 %v6117_v39, %v5963_v60  ;;  %v6142_v60 = vpop.permute.xlu1 %366 }
  0xf0   : > { %v1604_v34 = vadd.f32 %v6117_v39, %v5972_v55  ;;  %v1606_v48 = vadd.f32 %v6117_v39, %v6003_v30  ;;  %v6139_v50 = vadd.f32 %v6113_v47, %v1302_v36  ;;  %v1514_v32 = vadd.f32 %v5782_v57, %v1162_v52  ;;  %8937 = vst [vmem:[#allocation33_spill] sm:$0xff] %v6142_v60  ;;  %v8964_v47 = vld [vmem:[#allocation38_spill] sm:$0xff] }
  0xf1   : > { %v1861_v51 = vmax.f32 %v1605_v9, 0.0  ;;  %v1863_v61 = vmax.f32 %v1607_v11, 0.0  ;;  %v6145_v53 = vpack.c.bf16 %v1787_v33, %v1771_v31  ;;  %v6147_v30 = vpack.c.bf16 %v1784_v62, %v1768_v15  ;;  %v8945_v15 = vld [vmem:[#allocation82_spill] sm:$0xff] }
  0xf2   : > { %v1860_v23 = vmax.f32 %v1604_v34, 0.0  ;;  %v1862_v25 = vmax.f32 %v1606_v48, 0.0  ;;  %v1530_v54 = vadd.f32 %v5826_v35, %v8940_v37  ;;  %v8941_v36 = vmax.f32 %v6012_v56, 0.0  ;;  %v8947_v48 = vld [vmem:[#allocation15_spill] sm:$0xff]  ;;  %v8950_v37 = vld [vmem:[#allocation68_spill] sm:$0xff] }
  0xf3   : > { %8938 = vst [vmem:[#allocation55_spill] sm:$0xff] %v6145_v53  ;;  %8939 = vst [vmem:[#allocation24_spill] sm:$0xff] %v6147_v30  ;;  %v8942_v28 = vmax.f32 %v6026_v42, 0.0  ;;  %v8943_v52 = vmax.f32 %v6029_v49, 0.0  ;;  %v8944_v9 = vmax.f32 %v6032_v10, 0.0  ;;  %v659_v31 = vmul.f32 %v5285_v63, %v6142_v60  ;;  %v8946_v10 = vld [vmem:[#allocation14_spill] sm:$0xff] }
  0xf4   : > { %v4659_v27 = vpack.c.bf16 %v8941_v36, %v1861_v51  ;;  %v661_v62 = vmul.f32 %v5294_v2, %v6142_v60  ;;  %v658_v33 = vmul.f32 %v5297_v3, %v6142_v60  ;;  %v660_v56 = vmul.f32 %v5307_v7, %v6142_v60  ;;  %v8956_v42 = vld [vmem:[#allocation85_spill] sm:$0xff]  ;;  %v8958_v35 = vld [vmem:[#allocation72_spill] sm:$0xff] }
  0xf5   : > { %v4691_v40 = vpack.c.bf16 %v8942_v28, %v1863_v61  ;;  %v4661_v44 = vpack.c.bf16 %v8943_v52, %v1860_v23  ;;  %v4693_v11 = vpack.c.bf16 %v8944_v9, %v1862_v25  ;;  %v1786_v49 = vmax.f32 %v1530_v54, 0.0  ;;  %v6172_v61 = vpop.permute.xlu1 %371  ;;  %v8949_v23 = vld [vmem:[#allocation66_spill] sm:$0xff]  ;;  %v8952_v9 = vld [vmem:[#allocation69_spill] sm:$0xff] }
  0xf6   : > { %4660 = vmatprep.subr.bf16.mxu0 %v4659_v27  ;;  %v953_v34 = vmul.f32 %v8946_v10, %v8945_v15  ;;  %v955_v51 = vmul.f32 %v8947_v48, %v8945_v15  ;;  %8948 = vst [vmem:[#allocation34_spill] sm:$0xff] %v6172_v61  ;;  %v6175_v25 = vadd.f32 %v8949_v23, %v659_v31  ;;  %v1770_v27 = vmax.f32 %v1514_v32, 0.0  ;;  %v8951_v28 = vld [vmem:[#allocation78_spill] sm:$0xff] }
  0xf7   : > { %4692 = vmatprep.subr.bf16.mxu1 %v4691_v40  ;;  %4662 = vmatpush1.bf16.msra.mxu0 %v4661_v44  ;;  %v6178_v36 = vadd.f32 %v8950_v37, %v661_v62  ;;  %v1545_v54 = vadd.f32 %v5883_v18, %v8951_v28  ;;  %v675_v40 = vmul.f32 %v5285_v63, %v6172_v61  ;;  %v8953_v62 = vld [vmem:[#allocation70_spill] sm:$0xff]  ;;  %v8955_v37 = vld [vmem:[#allocation84_spill] sm:$0xff] }
  0xf8   : > { %4694 = vmatpush1.bf16.msra.mxu1 %v4693_v11  ;;  %v677_v52 = vmul.f32 %v5294_v2, %v6172_v61  ;;  %v674_v44 = vmul.f32 %v5297_v3, %v6172_v61  ;;  %v6189_v11 = vadd.f32 %v8952_v9, %v658_v33  ;;  %v676_v31 = vmul.f32 %v5307_v7, %v6172_v61  ;;  %v8959_v33 = vld [vmem:[#allocation18_spill] sm:$0xff] }
  0xf9   : > { %v6194_v32 = vadd.f32 %v8953_v62, %v660_v56  ;;  %v6196_v23 = vpack.c.bf16 %v1786_v49, %v1770_v27  ;;  %v1209_v28 = vadd.f32 %v953_v34, %v8955_v37  ;;  %v1211_v55 = vadd.f32 %v955_v51, %v8956_v42  ;;  %v8960_v56 = vld [vmem:[#allocation80_spill] sm:$0xff]  ;;  %v8961_v62 = vld [vmem:[#allocation37_spill] sm:$0xff]  ;;  %v6211_v27 = vpop.permute.xlu1 %775 }
  0xfa   : > { %v1547_v19 = vadd.f32 %v5883_v18, %v8957_v12  ;;  %v550_v57 = vmul.f32 %v5326_v14, %v8958_v35  ;;  %v952_v9 = vmul.f32 %v8959_v33, %v8945_v15  ;;  %v1801_v60 = vmax.f32 %v1545_v54, 0.0  ;;  %8962 = vst [vmem:[#allocation59_spill] sm:$0xff] %v6211_v27  ;;  %v8963_v37 = vld [vmem:[#allocation81_spill] sm:$0xff] }
  0xfb   : > { %8954 = vst [vmem:[#allocation56_spill] sm:$0xff] %v6196_v23  ;;  %v1561_v61 = vadd.f32 %v5845_v16, %v1209_v28  ;;  %v1192_v49 = vadd.f32 %v8961_v62, %v8960_v56  ;;  %v552_v34 = vmul.f32 %v5346_v20, %v8958_v35  ;;  %v1563_v42 = vadd.f32 %v5845_v16, %v1211_v55 }
  0xfc   : > { %v1803_v12 = vmax.f32 %v1547_v19, 0.0  ;;  %v1208_v51 = vadd.f32 %v952_v9, %v550_v57  ;;  %v1194_v23 = vadd.f32 %v8964_v47, %v8963_v37  ;;  %v1077_v30 = vmul.f32 %v5288_v0, %v6211_v27 }
  0xfd   : > { %v1079_v54 = vmul.f32 %v5291_v1, %v6211_v27  ;;  %v1076_v28 = vmul.f32 %v5300_v4, %v6211_v27  ;;  %v1078_v56 = vmul.f32 %v8898_v24, %v6211_v27  ;;  %v1817_v62 = vmax.f32 %v1561_v61, 0.0  ;;  %v6234_v61 = vpop.permute.xlu1 %1448 }
  0xfe   : > { %v1819_v35 = vmax.f32 %v1563_v42, 0.0  ;;  %v1544_v19 = vadd.f32 %v5883_v18, %v1192_v49  ;;  %v1560_v57 = vadd.f32 %v5845_v16, %v1208_v51  ;;  %v1333_v55 = vadd.f32 %v1077_v30, %v675_v40 }
  0xff   : > { %v1335_v47 = vadd.f32 %v1079_v54, %v677_v52  ;;  %v1332_v9 = vadd.f32 %v1076_v28, %v674_v44  ;;  %v1334_v37 = vadd.f32 %v1078_v56, %v676_v31  ;;  %v6228_v53 = vpack.c.bf16 %v1817_v62, %v1801_v60 }
 0x100   : > { %v6230_v17 = vpack.c.bf16 %v1819_v35, %v1803_v12  ;;  %v1800_v46 = vmax.f32 %v1544_v19, 0.0  ;;  %v954_v27 = vmul.f32 %v8966_v45, %v8945_v15  ;;  %v6237_v49 = vadd.f32 %v6226_v6, %v1333_v55  ;;  %v8983_v12 = vld [vmem:[#allocation52_spill] sm:$0xff] }
 0x101   : > { %v6240_v30 = vadd.f32 %v6226_v6, %v1335_v47  ;;  %v6243_v40 = vadd.f32 %v6226_v6, %v1332_v9  ;;  %v1816_v52 = vmax.f32 %v1560_v57, 0.0  ;;  %v1637_v35 = vadd.f32 %v6234_v61, %v6063_v59 }
 0x102   : > { %v1639_v60 = vadd.f32 %v6234_v61, %v6070_v58  ;;  %v1636_v44 = vadd.f32 %v6234_v61, %v6073_v38  ;;  %v1638_v31 = vadd.f32 %v6234_v61, %v6083_v21  ;;  %v6257_v54 = vadd.f32 %v6226_v6, %v1334_v37  ;;  %v6259_v58 = vpop.permute.xlu1 %376 }
 0x103   : > { %v1893_v28 = vmax.f32 %v1637_v35, 0.0  ;;  %8967 = vst [vmem:[#allocation25_spill] sm:$0xff] %v6259_v58  ;;  %v6261_v19 = vpack.c.bf16 %v1816_v52, %v1800_v46  ;;  %v1210_v38 = vadd.f32 %v954_v27, %v552_v34  ;;  %v1546_v21 = vadd.f32 %v5883_v18, %v1194_v23  ;;  %v8973_v52 = vld [vmem:[#allocation91_spill] sm:$0xff] }
 0x104   : > { %v1895_v59 = vmax.f32 %v1639_v60, 0.0  ;;  %v1892_v56 = vmax.f32 %v1636_v44, 0.0  ;;  %v1894_v62 = vmax.f32 %v1638_v31, 0.0  ;;  %v567_v57 = vmul.f32 %v5310_v8, %v5807_v5 }
 0x105   : > { %v8968_v55 = vmax.f32 %v6120_v43, 0.0  ;;  %v8969_v9 = vmax.f32 %v6123_v29, 0.0  ;;  %v8970_v35 = vmax.f32 %v6126_v41, 0.0  ;;  %v8971_v44 = vmax.f32 %v6139_v50, 0.0  ;;  %v8972_v50 = vld [vmem:[#allocation89_spill] sm:$0xff] }
 0x106   : > { %v691_v46 = vmul.f32 %v5285_v63, %v6259_v58  ;;  %v693_v23 = vmul.f32 %v5294_v2, %v6259_v58  ;;  %v690_v34 = vmul.f32 %v5297_v3, %v6259_v58  ;;  %v692_v43 = vmul.f32 %v5307_v7, %v6259_v58 }
 0x107   : > { %v4663_v47 = vpack.c.bf16 %v8968_v55, %v1893_v28  ;;  %v4695_v37 = vpack.c.bf16 %v8969_v9, %v1895_v59  ;;  %v4665_v60 = vpack.c.bf16 %v8970_v35, %v1892_v56  ;;  %v4697_v31 = vpack.c.bf16 %v8971_v44, %v1894_v62  ;;  %v6288_v59 = vpop.permute.xlu1 %381  ;;  %v8975_v56 = vld [vmem:[#allocation73_spill] sm:$0xff]  ;;  %v8976_v55 = vld [vmem:[#allocation74_spill] sm:$0xff]  ;;  %v8977_v9 = vld [vmem:[#allocation75_spill] sm:$0xff] }
 0x108   : > { %v1562_v41 = vadd.f32 %v5845_v16, %v1210_v38  ;;  %v583_v27 = vmul.f32 %v5310_v8, %v8972_v50  ;;  %v985_v28 = vmul.f32 %v8946_v10, %v8973_v52  ;;  %8974 = vst [vmem:[#allocation46_spill] sm:$0xff] %v6288_v59  ;;  %v6291_v62 = vadd.f32 %v8975_v56, %v691_v46  ;;  %v8978_v46 = vld [vmem:[#allocation76_spill] sm:$0xff] }
 0x109   : > { %4664 = vmatprep.subr.bf16.mxu0 %v4663_v47  ;;  %4696 = vmatprep.subr.bf16.mxu1 %v4695_v37  ;;  %v6294_v47 = vadd.f32 %v8976_v55, %v693_v23  ;;  %v6297_v37 = vadd.f32 %v8977_v9, %v690_v34  ;;  %v1802_v38 = vmax.f32 %v1546_v21, 0.0  ;;  %v707_v35 = vmul.f32 %v5285_v63, %v6288_v59  ;;  %v8979_v55 = vld [vmem:[#allocation43_spill] sm:$0xff] }
 0x10a   : > { %4666 = vmatpush1.bf16.msra.mxu0 %v4665_v60  ;;  %4698 = vmatpush1.bf16.msra.mxu1 %v4697_v31  ;;  %v709_v44 = vmul.f32 %v5294_v2, %v6288_v59  ;;  %v706_v60 = vmul.f32 %v5297_v3, %v6288_v59  ;;  %v708_v31 = vmul.f32 %v5307_v7, %v6288_v59  ;;  %v1818_v23 = vmax.f32 %v1562_v41, 0.0 }
 0x10b   : > { %v1350_v56 = vadd.f32 %v8978_v46, %v692_v43  ;;  %v1225_v29 = vadd.f32 %v8979_v55, %v567_v57  ;;  %v1241_v34 = vadd.f32 %v985_v28, %v583_v27  ;;  %v569_v21 = vmul.f32 %v5323_v13, %v5807_v5  ;;  %v8980_v43 = vld [vmem:[#allocation92_spill] sm:$0xff]  ;;  %v6323_v27 = vpop.permute.xlu1 %783 }
 0x10c   : > { %v585_v63 = vmul.f32 %v5323_v13, %v8972_v50  ;;  %v987_v2 = vmul.f32 %v8947_v48, %v8973_v52  ;;  %v566_v3 = vmul.f32 %v5326_v14, %v5807_v5  ;;  %v6317_v9 = vpack.c.bf16 %v1818_v23, %v1802_v38  ;;  %8981 = vst [vmem:[#allocation61_spill] sm:$0xff] %v6323_v27  ;;  %v8982_v28 = vld [vmem:[#allocation44_spill] sm:$0xff] }
 0x10d   : > { %v1577_v7 = vadd.f32 %v6009_v22, %v1225_v29  ;;  %v1593_v41 = vadd.f32 %v8980_v43, %v1241_v34  ;;  %v582_v57 = vmul.f32 %v5326_v14, %v8972_v50  ;;  %v1227_v46 = vadd.f32 %v8982_v28, %v569_v21 }
 0x10e   : > { %v1243_v55 = vadd.f32 %v987_v2, %v585_v63  ;;  %v984_v51 = vmul.f32 %v8959_v33, %v8973_v52  ;;  %v1224_v42 = vadd.f32 %v8983_v12, %v566_v3  ;;  %v1109_v38 = vmul.f32 %v5288_v0, %v6323_v27 }
 0x10f   : > { %v1111_v29 = vmul.f32 %v5291_v1, %v6323_v27  ;;  %v1108_v23 = vmul.f32 %v5300_v4, %v6323_v27  ;;  %v1110_v34 = vmul.f32 %v8898_v24, %v6323_v27  ;;  %v1833_v16 = vmax.f32 %v1577_v7, 0.0  ;;  %v6341_v58 = vpop.permute.xlu1 %1458 }
 0x110   : > { %v1849_v21 = vmax.f32 %v1593_v41, 0.0  ;;  %v1579_v63 = vadd.f32 %v6009_v22, %v1227_v46  ;;  %v1595_v2 = vadd.f32 %v8980_v43, %v1243_v55  ;;  %v1365_v28 = vadd.f32 %v1109_v38, %v707_v35  ;;  %8984 = vst [vmem:[#allocation47_spill] sm:$0xff] %v6341_v58 }
 0x111   : > { %v1367_v12 = vadd.f32 %v1111_v29, %v709_v44  ;;  %v1364_v3 = vadd.f32 %v1108_v23, %v706_v60  ;;  %v1366_v18 = vadd.f32 %v1110_v34, %v708_v31  ;;  %v1240_v59 = vadd.f32 %v984_v51, %v582_v57  ;;  %v8985_v57 = vld [vmem:[#allocation53_spill] sm:$0xff] }
 0x112   : > { %v6339_v0 = vpack.c.bf16 %v1849_v21, %v1833_v16  ;;  %v1835_v15 = vmax.f32 %v1579_v63, 0.0  ;;  %v1851_v1 = vmax.f32 %v1595_v2, 0.0  ;;  %v1576_v4 = vadd.f32 %v6009_v22, %v1224_v42  ;;  %v8987_v21 = vld [vmem:[#allocation94_spill] sm:$0xff] }
 0x113   : > { %v568_v24 = vmul.f32 %v5346_v20, %v5807_v5  ;;  %v584_v7 = vmul.f32 %v5346_v20, %v8972_v50  ;;  %v986_v35 = vmul.f32 %v8966_v45, %v8973_v52  ;;  %v1669_v16 = vadd.f32 %v6341_v58, %v6175_v25  ;;  %v6362_v23 = vpop.permute.xlu1 %1468 }
 0x114   : > { %v1671_v44 = vadd.f32 %v6341_v58, %v6178_v36  ;;  %v1668_v51 = vadd.f32 %v6341_v58, %v6189_v11  ;;  %v1670_v42 = vadd.f32 %v6341_v58, %v6194_v32  ;;  %v6358_v60 = vpack.c.bf16 %v1851_v1, %v1835_v15  ;;  %8986 = vst [vmem:[#allocation26_spill] sm:$0xff] %v6362_v23 }
 0x115   : > { %v1592_v31 = vadd.f32 %v8980_v43, %v1240_v59  ;;  %v1832_v41 = vmax.f32 %v1576_v4, 0.0  ;;  %v1226_v46 = vadd.f32 %v8985_v57, %v568_v24  ;;  %v1925_v55 = vmax.f32 %v1669_v16, 0.0 }
 0x116   : > { %v1927_v38 = vmax.f32 %v1671_v44, 0.0  ;;  %v1924_v29 = vmax.f32 %v1668_v51, 0.0  ;;  %v1926_v25 = vmax.f32 %v1670_v42, 0.0  ;;  %v1242_v34 = vadd.f32 %v986_v35, %v584_v7 }
 0x117   : > { %v1848_v36 = vmax.f32 %v1592_v31, 0.0  ;;  %v1578_v11 = vadd.f32 %v6009_v22, %v1226_v46  ;;  %v599_v32 = vmul.f32 %v5310_v8, %v8987_v21  ;;  %v8988_v15 = vmax.f32 %v6237_v49, 0.0  ;;  %v6387_v31 = vpop.permute.xlu1 %1473 }
 0x118   : > { %v8989_v59 = vmax.f32 %v6240_v30, 0.0  ;;  %v8990_v1 = vmax.f32 %v6243_v40, 0.0  ;;  %v8991_v24 = vmax.f32 %v6257_v54, 0.0  ;;  %v1701_v7 = vadd.f32 %v6362_v23, %v6291_v62  ;;  %v8992_v54 = vld [vmem:[#allocation35_spill] sm:$0xff]  ;;  %8993 = vst [vmem:[#allocation28_spill] sm:$0xff] %v6387_v31 }
 0x119   : > { %v4667_v63 = vpack.c.bf16 %v8988_v15, %v1925_v55  ;;  %v1703_v35 = vadd.f32 %v6362_v23, %v6294_v47  ;;  %v1700_v44 = vadd.f32 %v6362_v23, %v6297_v37  ;;  %v1702_v49 = vadd.f32 %v6362_v23, %v1350_v56 }
 0x11a   : > { %v4699_v2 = vpack.c.bf16 %v8989_v59, %v1927_v38  ;;  %v4669_v4 = vpack.c.bf16 %v8990_v1, %v1924_v29  ;;  %v4701_v16 = vpack.c.bf16 %v8991_v24, %v1926_v25  ;;  %v6382_v30 = vpack.c.bf16 %v1848_v36, %v1832_v41  ;;  %v8994_v25 = vld [vmem:[#allocation62_spill] sm:$0xff] }
 0x11b   : > { %4668 = vmatprep.subr.bf16.mxu0 %v4667_v63  ;;  %v1594_v40 = vadd.f32 %v8980_v43, %v1242_v34  ;;  %v1834_v51 = vmax.f32 %v1578_v11, 0.0  ;;  %v615_v42 = vmul.f32 %v5310_v8, %v8992_v54  ;;  %v1957_v62 = vmax.f32 %v1701_v7, 0.0 }
 0x11c   : > { %4700 = vmatprep.subr.bf16.mxu1 %v4699_v2  ;;  %4670 = vmatpush1.bf16.msra.mxu0 %v4669_v4  ;;  %v1959_v47 = vmax.f32 %v1703_v35, 0.0  ;;  %v1956_v57 = vmax.f32 %v1700_v44, 0.0  ;;  %v1958_v37 = vmax.f32 %v1702_v49, 0.0  ;;  %v1717_v56 = vadd.f32 %v6387_v31, %v1365_v28  ;;  %v8996_v44 = vld [vmem:[#allocation64_spill] sm:$0xff] }
 0x11d   : > { %4702 = vmatpush1.bf16.msra.mxu1 %v4701_v16  ;;  %v1719_v46 = vadd.f32 %v6387_v31, %v1367_v12  ;;  %v1716_v41 = vadd.f32 %v6387_v31, %v1364_v3  ;;  %v1718_v55 = vadd.f32 %v6387_v31, %v1366_v18  ;;  %v1850_v38 = vmax.f32 %v1594_v40, 0.0 }
 0x11e   : > { %v1017_v29 = vmul.f32 %v8946_v10, %v5980_v26  ;;  %v1257_v36 = vadd.f32 %v8994_v25, %v599_v32  ;;  %v601_v34 = vmul.f32 %v5323_v13, %v8987_v21  ;;  %v1973_v11 = vmax.f32 %v1717_v56, 0.0  ;;  %v8995_v32 = vld [vmem:[#allocation13_spill] sm:$0xff] }
 0x11f   : > { %v1975_v15 = vmax.f32 %v1719_v46, 0.0  ;;  %v1972_v63 = vmax.f32 %v1716_v41, 0.0  ;;  %v1974_v59 = vmax.f32 %v1718_v55, 0.0  ;;  %v6398_v28 = vpack.c.bf16 %v1850_v38, %v1834_v51  ;;  %v8997_v46 = vld [vmem:[#allocation36_spill] sm:$0xff]  ;;  %v8999_v55 = vld [vmem:[#allocation65_spill] sm:$0xff] }
 0x120   : > { %v1273_v12 = vadd.f32 %v1017_v29, %v615_v42  ;;  %v1609_v3 = vadd.f32 %v6117_v39, %v1257_v36  ;;  %v617_v18 = vmul.f32 %v5323_v13, %v8992_v54  ;;  %v4671_v2 = vpack.c.bf16 %v1973_v11, %v1957_v62  ;;  %v6416_v62 = vld [vmem:[%s8595_s3] sm:$0xff]  ;;  %v8998_v41 = vld [vmem:[#allocation40_spill] sm:$0xff] }
 0x121   : > { %v4703_v1 = vpack.c.bf16 %v1975_v15, %v1959_v47  ;;  %v4673_v4 = vpack.c.bf16 %v1972_v63, %v1956_v57  ;;  %v4705_v24 = vpack.c.bf16 %v1974_v59, %v1958_v37  ;;  %v1019_v35 = vmul.f32 %v8947_v48, %v5980_v26 }
 0x122   : > { %v1625_v16 = vadd.f32 %v8995_v32, %v1273_v12  ;;  %v1865_v7 = vmax.f32 %v1609_v3, 0.0  ;;  %v1259_v49 = vadd.f32 %v8996_v44, %v601_v34  ;;  %4672 = vmatprep.subr.bf16.mxu0 %v4671_v2  ;;  %v598_v40 = vmul.f32 %v5326_v14, %v8987_v21  ;;  %v9000_v12 = vld [vmem:[#allocation67_spill] sm:$0xff] }
 0x123   : > { %4704 = vmatprep.subr.bf16.mxu1 %v4703_v1  ;;  %v614_v51 = vmul.f32 %v5326_v14, %v8992_v54  ;;  %v1016_v42 = vmul.f32 %v8959_v33, %v5980_v26  ;;  %4674 = vmatpush1.bf16.msra.mxu0 %v4673_v4  ;;  %v1275_v57 = vadd.f32 %v1019_v35, %v617_v18  ;;  %v9001_v18 = vld [vmem:[#allocation41_spill] sm:$0xff]  ;;  %v9002_v2 = vld [vmem:[#allocation51_spill] sm:$0xff]  ;;  %v6441_v1 = vld [vmem:[%s8595_s3 + $0x8] sm:$0xff] }
 0x124   : > { %4706 = vmatpush1.bf16.msra.mxu1 %v4705_v24  ;;  %v1881_v47 = vmax.f32 %v1625_v16, 0.0  ;;  %v1611_v37 = vadd.f32 %v6117_v39, %v1259_v49  ;;  %v600_v56 = vmul.f32 %v5346_v20, %v8987_v21  ;;  %4708 = vmatprep.subr.bf16.mxu0 %v8997_v46  ;;  %v1256_v38 = vadd.f32 %v8999_v55, %v598_v40  ;;  %v9003_v16 = vld [vmem:[#allocation30_spill] sm:$0xff]  ;;  %v9005_v49 = vld [vmem:[#allocation23_spill] sm:$0xff] }
 0x125   : > { %4740 = vmatprep.subr.bf16.mxu1 %v8998_v41  ;;  %v1272_v29 = vadd.f32 %v1016_v42, %v614_v51  ;;  %v616_v25 = vmul.f32 %v5346_v20, %v8992_v54  ;;  %v1627_v34 = vadd.f32 %v8995_v32, %v1275_v57  ;;  %v1018_v15 = vmul.f32 %v8966_v45, %v5980_v26  ;;  %v9004_v35 = vld [vmem:[#allocation50_spill] sm:$0xff]  ;;  %v9006_v40 = vld [vmem:[#allocation55_spill] sm:$0xff] }
 0x126   : > { %v6426_v36 = vpack.c.bf16 %v1881_v47, %v1865_v7  ;;  %v1867_v11 = vmax.f32 %v1611_v37, 0.0  ;;  %2165 = vmatmul.mubr.f32.vlgmr.msra.gmra.mrb[0].mxu0 %v6416_v62  ;;  %v1608_v63 = vadd.f32 %v6117_v39, %v1256_v38  ;;  %v1258_v3 = vadd.f32 %v9000_v12, %v600_v56  ;;  %v9007_v57 = vld [vmem:[#allocation42_spill] sm:$0xff]  ;;  %v9009_v55 = vld [vmem:[#allocation31_spill] sm:$0xff] }
 0x127   : > { %2326 = vmatmul.mubr.f32.vlgmr.msra.gmra.mrb[0].mxu1 %v6416_v62  ;;  %v1624_v59 = vadd.f32 %v8995_v32, %v1272_v29  ;;  %4710 = vmatpush1.bf16.msra.mxu0 %v9001_v18  ;;  %v1883_v4 = vmax.f32 %v1627_v34, 0.0  ;;  %v1274_v24 = vadd.f32 %v1018_v15, %v616_v25  ;;  %v631_v7 = vmul.f32 %v5310_v8, %v9003_v16 }
 0x128   : > { %4742 = vmatpush1.bf16.msra.mxu1 %v9002_v2  ;;  %v647_v44 = vmul.f32 %v5310_v8, %v9004_v35  ;;  %4712 = vmatprep.subr.bf16.mxu0 %v9005_v49  ;;  %v1864_v51 = vmax.f32 %v1608_v63, 0.0  ;;  %v1610_v47 = vadd.f32 %v6117_v39, %v1258_v3  ;;  %v1033_v37 = vmul.f32 %v8946_v10, %v9007_v57  ;;  %v9010_v63 = vld [vmem:[#allocation24_spill] sm:$0xff]  ;;  %v9012_v49 = vld [vmem:[#allocation54_spill] sm:$0xff] }
 0x129   : > { %4744 = vmatprep.subr.bf16.mxu1 %v9006_v40  ;;  %v1880_v42 = vmax.f32 %v1624_v59, 0.0  ;;  %v9008_v56 = vmov 0.0   ;;  %v4755_v46 = vpack.c.bf16 %v1883_v4, %v1867_v11  ;;  %v1626_v41 = vadd.f32 %v8995_v32, %v1274_v24  ;;  %v9011_v59 = vld [vmem:[#allocation56_spill] sm:$0xff]  ;;  %v6468_v11 = vld [vmem:[%s8595_s3 + $0x10] sm:$0xff] }
 0x12a   : > { %2170 = vmatprep.mubr.f32.mxu0 %v9008_v56  ;;  %2331 = vmatprep.mubr.f32.mxu1 %v9008_v56  ;;  %v1049_v38 = vmul.f32 %v8946_v10, %v9009_v55  ;;  %v1866_v25 = vmax.f32 %v1610_v47, 0.0  ;;  %v1289_v34 = vadd.f32 %v1033_v37, %v631_v7  ;;  %v633_v15 = vmul.f32 %v5323_v13, %v9003_v16  ;;  %v6495_v37 = vld [vmem:[%s8595_s3 + $0x18] sm:$0xff] }
 0x12b   : > { %2171 = vmatmul.mubr.f32.gmra.mrb[2].mxu0 %v6441_v1  ;;  %2332 = vmatmul.mubr.f32.gmra.mrb[2].mxu1 %v6441_v1  ;;  %v6459_v29 = vpack.c.bf16 %v1880_v42, %v1864_v51  ;;  %v1882_v12 = vmax.f32 %v1626_v41, 0.0  ;;  %v649_v18 = vmul.f32 %v5323_v13, %v9004_v35  ;;  %v1035_v2 = vmul.f32 %v8947_v48, %v9007_v57 }
 0x12c   : > { %4714 = vmatpush1.bf16.msra.mxu0 %v9010_v63  ;;  %4746 = vmatpush1.bf16.msra.mxu1 %v9011_v59  ;;  %v1305_v3 = vadd.f32 %v1049_v38, %v647_v44  ;;  %v1641_v4 = vadd.f32 %v6234_v61, %v1289_v34  ;;  %v1051_v24 = vmul.f32 %v8947_v48, %v9009_v55 }
 0x12d   : > { %4716 = vmatprep.subr.bf16.mxu0 %v6228_v53  ;;  %4748 = vmatprep.subr.bf16.mxu1 %v6230_v17  ;;  %v630_v7 = vmul.f32 %v5326_v14, %v9003_v16  ;;  %v4757_v44 = vpack.c.bf16 %v1882_v12, %v1866_v25  ;;  %v1291_v51 = vadd.f32 %v1035_v2, %v633_v15  ;;  %v9013_v2 = vld [vmem:[#allocation33_spill] sm:$0xff] }
 0x12e   : > { %2176 = vmatprep.mubr.f32.mxu0 %v9008_v56  ;;  %2337 = vmatprep.mubr.f32.mxu1 %v9008_v56  ;;  %v1657_v40 = vadd.f32 %v9012_v49, %v1305_v3  ;;  %v1897_v17 = vmax.f32 %v1641_v4, 0.0  ;;  %v1307_v53 = vadd.f32 %v1051_v24, %v649_v18  ;;  %v646_v42 = vmul.f32 %v5326_v14, %v9004_v35  ;;  %v6523_v24 = vld [vmem:[%s8595_s3 + $0x20] sm:$0xff] }
 0x12f   : > { %2177 = vmatmul.mubr.f32.gmra.mrb[4].mxu0 %v6468_v11  ;;  %2338 = vmatmul.mubr.f32.gmra.mrb[4].mxu1 %v6468_v11  ;;  %v1032_v47 = vmul.f32 %v8959_v33, %v9007_v57  ;;  %v1643_v38 = vadd.f32 %v6234_v61, %v1291_v51  ;;  %v1048_v25 = vmul.f32 %v8959_v33, %v9009_v55  ;;  %v9014_v51 = vld [vmem:[#allocation34_spill] sm:$0xff] }
 0x130   : > { %4718 = vmatpush1.bf16.msra.mxu0 %v6261_v19  ;;  %4750 = vmatpush1.bf16.msra.mxu1 %v6317_v9  ;;  %v1913_v41 = vmax.f32 %v1657_v40, 0.0  ;;  %v632_v34 = vmul.f32 %v5346_v20, %v9003_v16  ;;  %v1659_v19 = vadd.f32 %v9012_v49, %v1307_v53  ;;  %v648_v15 = vmul.f32 %v5346_v20, %v9004_v35 }
 0x131   : > { %4720 = vmatprep.subr.bf16.mxu0 %v6339_v0  ;;  %4752 = vmatprep.subr.bf16.mxu1 %v6358_v60  ;;  %v1288_v9 = vadd.f32 %v1032_v47, %v630_v7  ;;  %v1899_v59 = vmax.f32 %v1643_v38, 0.0  ;;  %v1304_v12 = vadd.f32 %v1048_v25, %v646_v42  ;;  %v1034_v3 = vmul.f32 %v8966_v45, %v9007_v57  ;;  %v9016_v25 = vld [vmem:[#allocation59_spill] sm:$0xff] }
 0x132   : > { %2182 = vmatprep.mubr.f32.mxu0 %v9008_v56  ;;  %2343 = vmatprep.mubr.f32.mxu1 %v9008_v56  ;;  %v4727_v63 = vpack.c.bf16 %v1913_v41, %v1897_v17  ;;  %v1915_v0 = vmax.f32 %v1659_v19, 0.0  ;;  %v1050_v18 = vmul.f32 %v8966_v45, %v9009_v55  ;;  %v663_v4 = vmul.f32 %v5310_v8, %v9013_v2 }
 0x133   : > { %2183 = vmatmul.mubr.f32.gmra.mrb[6].mxu0 %v6495_v37  ;;  %2344 = vmatmul.mubr.f32.gmra.mrb[6].mxu1 %v6495_v37  ;;  %v1640_v60 = vadd.f32 %v6234_v61, %v1288_v9  ;;  %v1656_v7 = vadd.f32 %v9012_v49, %v1304_v12  ;;  %v1290_v40 = vadd.f32 %v1034_v3, %v632_v34 }
 0x134   : > { %4722 = vmatpush1.bf16.msra.mxu0 %v6382_v30  ;;  %4754 = vmatpush1.bf16.msra.mxu1 %v6398_v28  ;;  %v679_v17 = vmul.f32 %v5310_v8, %v9014_v51  ;;  %v4759_v53 = vpack.c.bf16 %v1915_v0, %v1899_v59  ;;  %v1306_v47 = vadd.f32 %v1050_v18, %v648_v15  ;;  %v9015_v30 = vld [vmem:[#allocation49_spill] sm:$0xff]  ;;  %v6547_v15 = vld [vmem:[%s8595_s3 + $0x28] sm:$0xff] }
 0x135   : > { %4724 = vmatprep.subr.bf16.mxu0 %v6426_v36  ;;  %4756 = vmatprep.subr.bf16.mxu1 %v4755_v46  ;;  %v1896_v42 = vmax.f32 %v1640_v60, 0.0  ;;  %v1065_v28 = vmul.f32 %v8946_v10, %v9015_v30  ;;  %v1912_v41 = vmax.f32 %v1656_v7, 0.0  ;;  %v1642_v38 = vadd.f32 %v6234_v61, %v1290_v40 }
 0x136   : > { %2188 = vmatprep.mubr.f32.mxu0 %v9008_v56  ;;  %2349 = vmatprep.mubr.f32.mxu1 %v9008_v56  ;;  %v1081_v34 = vmul.f32 %v8946_v10, %v9016_v25  ;;  %v665_v36 = vmul.f32 %v5323_v13, %v9013_v2  ;;  %v1658_v46 = vadd.f32 %v9012_v49, %v1306_v47 }
 0x137   : > { %2189 = vmatmul.mubr.f32.gmra.mrb[8].mxu0 %v6523_v24  ;;  %2350 = vmatmul.mubr.f32.gmra.mrb[8].mxu1 %v6523_v24  ;;  %v1321_v19 = vadd.f32 %v1065_v28, %v663_v4  ;;  %v681_v9 = vmul.f32 %v5323_v13, %v9014_v51  ;;  %v4729_v59 = vpack.c.bf16 %v1912_v41, %v1896_v42  ;;  %v1898_v12 = vmax.f32 %v1642_v38, 0.0  ;;  %v6570_v41 = vld [vmem:[%s8595_s3 + $0x30] sm:$0xff] }
 0x138   : > { %4726 = vmatpush1.bf16.msra.mxu0 %v6459_v29  ;;  %4758 = vmatpush1.bf16.msra.mxu1 %v4757_v44  ;;  %v1337_v3 = vadd.f32 %v1081_v34, %v679_v17  ;;  %v1067_v0 = vmul.f32 %v8947_v48, %v9015_v30  ;;  %v1914_v60 = vmax.f32 %v1658_v46, 0.0  ;;  %v1083_v29 = vmul.f32 %v8947_v48, %v9016_v25 }
 0x139   : > { %4728 = vmatprep.subr.bf16.mxu0 %v4727_v63  ;;  %4760 = vmatprep.subr.bf16.mxu1 %v4759_v53  ;;  %v1673_v18 = vadd.f32 %v6341_v58, %v1321_v19  ;;  %v662_v44 = vmul.f32 %v5326_v14, %v9013_v2  ;;  %v678_v63 = vmul.f32 %v5326_v14, %v9014_v51 }
 0x13a   : > { %2194 = vmatprep.mubr.f32.mxu0 %v9008_v56  ;;  %2355 = vmatprep.mubr.f32.mxu1 %v9008_v56  ;;  %v1689_v4 = vadd.f32 %v6226_v6, %v1337_v3  ;;  %v1323_v7 = vadd.f32 %v1067_v0, %v665_v36  ;;  %v4761_v40 = vpack.c.bf16 %v1914_v60, %v1898_v12 }
 0x13b   : > { %2195 = vmatmul.mubr.f32.gmra.mrb[10].mxu0 %v6547_v15  ;;  %2356 = vmatmul.mubr.f32.gmra.mrb[10].mxu1 %v6547_v15  ;;  %v1929_v17 = vmax.f32 %v1673_v18, 0.0  ;;  %v1339_v53 = vadd.f32 %v1083_v29, %v681_v9  ;;  %v1064_v42 = vmul.f32 %v8959_v33, %v9015_v30  ;;  %v1080_v38 = vmul.f32 %v8959_v33, %v9016_v25  ;;  %v9017_v29 = vld [vmem:[#allocation25_spill] sm:$0xff] }
 0x13c   : > { %4730 = vmatpush1.bf16.msra.mxu0 %v4729_v59  ;;  %v1945_v47 = vmax.f32 %v1689_v4, 0.0  ;;  %v1675_v28 = vadd.f32 %v6341_v58, %v1323_v7  ;;  %2200 = vmatprep.mubr.f32.mxu0 %v9008_v56  ;;  %v664_v34 = vmul.f32 %v5346_v20, %v9013_v2  ;;  %v680_v19 = vmul.f32 %v5346_v20, %v9014_v51 }
 0x13d   : > { %4762 = vmatpush1.bf16.msra.mxu1 %v4761_v40  ;;  %v1691_v36 = vadd.f32 %v6226_v6, %v1339_v53  ;;  %2361 = vmatprep.mubr.f32.mxu1 %v9008_v56  ;;  %v1320_v46 = vadd.f32 %v1064_v42, %v662_v44  ;;  %v1336_v12 = vadd.f32 %v1080_v38, %v678_v63  ;;  %v9018_v63 = vld [vmem:[#allocation46_spill] sm:$0xff] }
 0x13e   : > { %v4731_v9 = vpack.c.bf16 %v1945_v47, %v1929_v17  ;;  %v1931_v59 = vmax.f32 %v1675_v28, 0.0  ;;  %v1066_v3 = vmul.f32 %v8966_v45, %v9015_v30  ;;  %v1082_v18 = vmul.f32 %v8966_v45, %v9016_v25  ;;  %v9019_v17 = vld [vmem:[#allocation63_spill] sm:$0xff] }
 0x13f   : > { %v1947_v0 = vmax.f32 %v1691_v36, 0.0  ;;  %2201 = vmatmul.mubr.f32.gmra.mrb[12].mxu0 %v6570_v41  ;;  %2362 = vmatmul.mubr.f32.gmra.mrb[12].mxu1 %v6570_v41  ;;  %v1672_v60 = vadd.f32 %v6341_v58, %v1320_v46  ;;  %v695_v44 = vmul.f32 %v5310_v8, %v9017_v29  ;;  %v1688_v4 = vadd.f32 %v6226_v6, %v1336_v12 }
 0x140   : > { %4732 = vmatprep.subr.bf16.mxu0 %v4731_v9  ;;  %v1322_v7 = vadd.f32 %v1066_v3, %v664_v34  ;;  %v711_v40 = vmul.f32 %v5310_v8, %v9018_v63  ;;  %v1097_v53 = vmul.f32 %v8946_v10, %v9019_v17  ;;  %v1338_v28 = vadd.f32 %v1082_v18, %v680_v19  ;;  %v6601_v34 = vld [vmem:[%s8595_s3 + $0x38] sm:$0xff] }
 0x141   : > { %v4763_v42 = vpack.c.bf16 %v1947_v0, %v1931_v59  ;;  %v1928_v47 = vmax.f32 %v1672_v60, 0.0  ;;  %v1113_v38 = vmul.f32 %v8946_v10, %v6323_v27  ;;  %2206 = vmatprep.mubr.f32.mxu0 %v9008_v56  ;;  %2367 = vmatprep.mubr.f32.mxu1 %v9008_v56  ;;  %v1944_v36 = vmax.f32 %v1688_v4, 0.0 }
 0x142   : > { %v1674_v8 = vadd.f32 %v6341_v58, %v1322_v7  ;;  %v1353_v46 = vadd.f32 %v1097_v53, %v695_v44  ;;  %v697_v9 = vmul.f32 %v5323_v13, %v9017_v29  ;;  %v1690_v19 = vadd.f32 %v6226_v6, %v1338_v28 }
 0x143   : > { %4764 = vmatprep.subr.bf16.mxu1 %v4763_v42  ;;  %v1369_v10 = vadd.f32 %v1113_v38, %v711_v40  ;;  %v713_v59 = vmul.f32 %v5323_v13, %v9018_v63  ;;  %v1099_v12 = vmul.f32 %v8947_v48, %v9019_v17  ;;  %v4733_v3 = vpack.c.bf16 %v1944_v36, %v1928_v47  ;;  %v6624_v40 = vld [vmem:[%s8595_s3 + $0x40] sm:$0xff] }
 0x144   : > { %v1930_v0 = vmax.f32 %v1674_v8, 0.0  ;;  %v1705_v60 = vadd.f32 %v6362_v23, %v1353_v46  ;;  %v1115_v18 = vmul.f32 %v8947_v48, %v6323_v27  ;;  %2207 = vmatmul.mubr.f32.gmra.mrb[14].mxu0 %v6601_v34  ;;  %2368 = vmatmul.mubr.f32.gmra.mrb[14].mxu1 %v6601_v34  ;;  %v1946_v44 = vmax.f32 %v1690_v19, 0.0  ;;  %9020 = vst [vmem:[#allocation48_spill] sm:$0xff] %v6624_v40 }
 0x145   : > { %v1721_v4 = vadd.f32 %v6387_v31, %v1369_v10  ;;  %v1355_v7 = vadd.f32 %v1099_v12, %v697_v9  ;;  %v694_v13 = vmul.f32 %v5326_v14, %v9017_v29  ;;  %2212 = vmatprep.mubr.f32.mxu0 %v9008_v56  ;;  %2373 = vmatprep.mubr.f32.mxu1 %v9008_v56 }
 0x146   : > { %4734 = vmatpush1.bf16.msra.mxu0 %v4733_v3  ;;  %v1961_v48 = vmax.f32 %v1705_v60, 0.0  ;;  %v1371_v53 = vadd.f32 %v1115_v18, %v713_v59  ;;  %v710_v42 = vmul.f32 %v5326_v14, %v9018_v63  ;;  %v1096_v47 = vmul.f32 %v8959_v33, %v9019_v17  ;;  %v9022_v18 = vld [vmem:[#allocation77_spill] sm:$0xff] }
 0x147   : > { %v4765_v28 = vpack.c.bf16 %v1946_v44, %v1930_v0  ;;  %v1977_v38 = vmax.f32 %v1721_v4, 0.0  ;;  %v1707_v36 = vadd.f32 %v6362_v23, %v1355_v7  ;;  %v1112_v8 = vmul.f32 %v8959_v33, %v6323_v27  ;;  %v6645_v33 = vld [vmem:[%s8595_s3 + $0x48] sm:$0xff] }
 0x148   : > { %v1723_v46 = vadd.f32 %v6387_v31, %v1371_v53  ;;  %v1352_v9 = vadd.f32 %v1096_v47, %v694_v13  ;;  %v696_v19 = vmul.f32 %v5346_v20, %v9017_v29  ;;  %v712_v10 = vmul.f32 %v5346_v20, %v9018_v63  ;;  %2213 = vmatmul.mubr.f32.gmra.mrb[16].mxu0 %v6624_v40  ;;  %v9023_v44 = vld [vmem:[#allocation20_spill] sm:$0xff]  ;;  %v9026_v47 = vld [vmem:[#allocation71_spill] sm:$0xff] }
 0x149   : > { %4766 = vmatpush1.bf16.msra.mxu1 %v4765_v28  ;;  %v4735_v14 = vpack.c.bf16 %v1977_v38, %v1961_v48  ;;  %v1963_v59 = vmax.f32 %v1707_v36, 0.0  ;;  %v1368_v12 = vadd.f32 %v1112_v8, %v710_v42  ;;  %v1098_v3 = vmul.f32 %v8966_v45, %v9019_v17  ;;  %2218 = vmatprep.mubr.f32.mxu0 %v9008_v56  ;;  %v9024_v48 = vld [vmem:[#allocation83_spill] sm:$0xff]  ;;  %v9025_v42 = vld [vmem:[#allocation9_spill] sm:$0xff]  ;;  %v9027_v8 = vld [vmem:[#allocation16_spill] sm:$0xff] }
 0x14a   : > { %9021 = vst [vmem:[#allocation29_spill] sm:$0xff] %v6645_v33  ;;  %v1979_v0 = vmax.f32 %v1723_v46, 0.0  ;;  %v1704_v60 = vadd.f32 %v6362_v23, %v1352_v9  ;;  %v1114_v20 = vmul.f32 %v8966_v45, %v6323_v27  ;;  %v475_v4 = vmul.f32 %v9023_v44, %v9022_v18  ;;  %2374 = vmatmul.mubr.f32.gmra.mrb[16].mxu1 %v6624_v40  ;;  %v9036_v17 = vld [vmem:[#allocation6_spill] sm:$0xff] }
 0x14b   : > { %4736 = vmatprep.subr.bf16.mxu0 %v4735_v14  ;;  %v1720_v7 = vadd.f32 %v6387_v31, %v1368_v12  ;;  %v1354_v13 = vadd.f32 %v1098_v3, %v696_v19  ;;  %v491_v53 = vmul.f32 %v9023_v44, %v9024_v48  ;;  %v877_v28 = vmul.f32 %v9026_v47, %v9025_v42  ;;  %v6664_v12 = vld [vmem:[%s5242_s30 + $0x10] ss:$2 sm:$0xff]  ;;  %v9029_v3 = vld [vmem:[#allocation4_spill] sm:$0xff] }
 0x14c   : > { %v4767_v38 = vpack.c.bf16 %v1979_v0, %v1963_v59  ;;  %v1960_v36 = vmax.f32 %v1704_v60, 0.0  ;;  %v1370_v45 = vadd.f32 %v1114_v20, %v712_v10  ;;  %v893_v46 = vmul.f32 %v9026_v47, %v9027_v8  ;;  %2379 = vmatprep.mubr.f32.mxu1 %v9008_v56  ;;  %2219 = vmatmul.mubr.f32.gmra.mrb[18].mxu0 %v6645_v33  ;;  %v6674_v10 = vld [vmem:[%s8595_s3 + $0x50] sm:$0xff] }
 0x14d   : > { %v1976_v9 = vmax.f32 %v1720_v7, 0.0  ;;  %v1706_v19 = vadd.f32 %v6362_v23, %v1354_v13  ;;  %v1133_v14 = vadd.f32 %v877_v28, %v475_v4  ;;  %9028 = vst [vmem:[#allocation57_spill] sm:$0xff] %v6664_v12  ;;  %v6668_v27 = vrot.slane %v6664_v12, %v9029_v3  ;;  %2224 = vmatprep.mubr.f32.mxu0 %v9008_v56  ;;  %v6678_v60 = vld [vmem:[%s5242_s30 + $0x11] ss:$2 sm:$0xff] }
 0x14e   : > { %9030 = vst [vmem:[#allocation14_spill] sm:$0xff] %v6674_v10  ;;  %4768 = vmatprep.subr.bf16.mxu1 %v4767_v38  ;;  %v1722_v59 = vadd.f32 %v6387_v31, %v1370_v45  ;;  %v1149_v0 = vadd.f32 %v893_v46, %v491_v53  ;;  %9031 = vst [vmem:[#allocation15_spill] sm:$0xff] %v6678_v60  ;;  %v6682_v20 = vrot.slane %v6678_v60, %v9029_v3  ;;  %v9032_v13 = vld [vmem:[#allocation45_spill] sm:$0xff]  ;;  %v9033_v45 = vld [vmem:[#allocation88_spill] sm:$0xff] }
 0x14f   : > { %2380 = vmatmul.mubr.f32.gmra.mrb[18].mxu1 %v6645_v33  ;;  %v4737_v4 = vpack.c.bf16 %v1976_v9, %v1960_v36  ;;  %v1962_v7 = vmax.f32 %v1706_v19, 0.0  ;;  %v1485_v28 = vadd.f32 %v9032_v13, %v1133_v14  ;;  %v477_v23 = vmul.f32 %v6668_v27, %v9022_v18  ;;  %v6701_v19 = vld [vmem:[%s8595_s3 + $0x58] sm:$0xff]  ;;  %v9035_v14 = vld [vmem:[#allocation5_spill] sm:$0xff] }
 0x150   : > { %2385 = vmatprep.mubr.f32.mxu1 %v9008_v56  ;;  %v1978_v38 = vmax.f32 %v1722_v59, 0.0  ;;  %v1501_v53 = vadd.f32 %v9033_v45, %v1149_v0  ;;  %v493_v46 = vmul.f32 %v6668_v27, %v9024_v48  ;;  %v879_v3 = vmul.f32 %v6682_v20, %v9025_v42  ;;  %2225 = vmatmul.mubr.f32.gmra.mrb[20].mxu0 %v6674_v10 }
 0x151   : > { %4738 = vmatpush1.bf16.msra.mxu0 %v4737_v4  ;;  %v1741_v36 = vmax.f32 %v1485_v28, 0.0  ;;  %v895_v9 = vmul.f32 %v6682_v20, %v9027_v8  ;;  %2230 = vmatprep.mubr.f32.mxu0 %v9008_v56  ;;  %9034 = vst [vmem:[#allocation66_spill] sm:$0xff] %v6701_v19  ;;  %v6705_v59 = vrot.slane %v6664_v12, %v9035_v14 }
 0x152   : > { %v6709_v0 = vrot.slane %v6678_v60, %v9035_v14  ;;  %v4769_v4 = vpack.c.bf16 %v1978_v38, %v1962_v7  ;;  %v1757_v28 = vmax.f32 %v1501_v53, 0.0  ;;  %v1135_v31 = vadd.f32 %v879_v3, %v477_v23  ;;  %v6732_v3 = vld [vmem:[%s8595_s3 + $0x60] sm:$0xff] }
 0x153   : > { %2386 = vmatmul.mubr.f32.gmra.mrb[20].mxu1 %v6674_v10  ;;  %v6714_v63 = vrot.slane %v6664_v12, %v9036_v17  ;;  %v1151_v29 = vadd.f32 %v895_v9, %v493_v46  ;;  %v474_v6 = vmul.f32 %v6705_v59, %v9022_v18  ;;  %v490_v58 = vmul.f32 %v6705_v59, %v9024_v48 }
 0x154   : > { %2391 = vmatprep.mubr.f32.mxu1 %v9008_v56  ;;  %v876_v7 = vmul.f32 %v6709_v0, %v9025_v42  ;;  %4770 = vmatpush1.bf16.msra.mxu1 %v4769_v4  ;;  %v4771_v23 = vpack.c.bf16 %v1757_v28, %v1741_v36  ;;  %v1487_v38 = vadd.f32 %v9032_v13, %v1135_v31  ;;  %v9038_v28 = vld [vmem:[#allocation86_spill] sm:$0xff] }
 0x155   : > { %2231 = vmatmul.mubr.f32.gmra.mrb[22].mxu0 %v6701_v19  ;;  %v892_v53 = vmul.f32 %v6709_v0, %v9027_v8  ;;  %v1503_v46 = vadd.f32 %v9033_v45, %v1151_v29  ;;  %9037 = vst [vmem:[#allocation68_spill] sm:$0xff] %v6732_v3  ;;  %v476_v36 = vmul.f32 %v6714_v63, %v9022_v18 }
 0x156   : > { %2236 = vmatprep.mubr.f32.mxu0 %v9008_v56  ;;  %v1132_v9 = vadd.f32 %v876_v7, %v474_v6  ;;  %v492_v31 = vmul.f32 %v6714_v63, %v9024_v48  ;;  %4772 = vmatprep.subr.bf16.mxu0 %v4771_v23  ;;  %v1743_v14 = vmax.f32 %v1487_v38, 0.0  ;;  %v6741_v29 = vrot.slane %v6678_v60, %v9036_v17  ;;  %v9039_v7 = vld [vmem:[#allocation27_spill] sm:$0xff]  ;;  %v9040_v23 = vld [vmem:[#allocation10_spill] sm:$0xff]  ;;  %v6763_v60 = vld [vmem:[%s8595_s3 + $0x68] sm:$0xff] }
 0x157   : > { %2392 = vmatmul.mubr.f32.gmra.mrb[22].mxu1 %v6701_v19  ;;  %v1148_v4 = vadd.f32 %v892_v53, %v490_v58  ;;  %v507_v12 = vmul.f32 %v9023_v44, %v9038_v28  ;;  %v1759_v10 = vmax.f32 %v1503_v46, 0.0  ;;  %v523_v48 = vmul.f32 %v9023_v44, %v9039_v7  ;;  %v9041_v46 = vld [vmem:[#allocation39_spill] sm:$0xff]  ;;  %9042 = vst [vmem:[#allocation78_spill] sm:$0xff] %v6763_v60 }
 0x158   : > { %2397 = vmatprep.mubr.f32.mxu1 %v9008_v56  ;;  %v1484_v6 = vadd.f32 %v9032_v13, %v1132_v9  ;;  %v909_v38 = vmul.f32 %v9026_v47, %v9040_v23  ;;  %v878_v17 = vmul.f32 %v6741_v29, %v9025_v42  ;;  %v894_v53 = vmul.f32 %v6741_v29, %v9027_v8 }
 0x159   : > { %2237 = vmatmul.mubr.f32.gmra.mrb[24].mxu0 %v6732_v3  ;;  %v1500_v58 = vadd.f32 %v9033_v45, %v1148_v4  ;;  %v925_v18 = vmul.f32 %v9026_v47, %v9041_v46  ;;  %v4803_v9 = vpack.c.bf16 %v1759_v10, %v1743_v14  ;;  %v509_v4 = vmul.f32 %v6668_v27, %v9038_v28  ;;  %v9043_v10 = vld [vmem:[#allocation87_spill] sm:$0xff] }
 0x15a   : > { %2242 = vmatprep.mubr.f32.mxu0 %v9008_v56  ;;  %v1740_v19 = vmax.f32 %v1484_v6, 0.0  ;;  %v1165_v25 = vadd.f32 %v909_v38, %v507_v12  ;;  %v1134_v8 = vadd.f32 %v878_v17, %v476_v36  ;;  %v1150_v30 = vadd.f32 %v894_v53, %v492_v31 }
 0x15b   : > { %2398 = vmatmul.mubr.f32.gmra.mrb[24].mxu1 %v6732_v3  ;;  %v1756_v42 = vmax.f32 %v1500_v58, 0.0  ;;  %v1181_v51 = vadd.f32 %v925_v18, %v523_v48  ;;  %4804 = vmatprep.subr.bf16.mxu1 %v4803_v9  ;;  %v525_v2 = vmul.f32 %v6668_v27, %v9039_v7  ;;  %v911_v12 = vmul.f32 %v6682_v20, %v9040_v23  ;;  %v9044_v18 = vld [vmem:[#allocation21_spill] sm:$0xff] }
 0x15c   : > { %2403 = vmatprep.mubr.f32.mxu1 %v9008_v56  ;;  %v1517_v14 = vadd.f32 %v9043_v10, %v1165_v25  ;;  %v1486_v38 = vadd.f32 %v9032_v13, %v1134_v8  ;;  %v1502_v36 = vadd.f32 %v9033_v45, %v1150_v30  ;;  %v6784_v25 = vld [vmem:[%s8595_s3 + $0x70] sm:$0xff]  ;;  %v927_v58 = vmul.f32 %v6682_v20, %v9041_v46 }
 0x15d   : > { %2243 = vmatmul.mubr.f32.gmra.mrb[26].mxu0 %v6763_v60  ;;  %v6775_v6 = vpack.c.bf16 %v1756_v42, %v1740_v19  ;;  %v1533_v48 = vadd.f32 %v9044_v18, %v1181_v51  ;;  %9045 = vst [vmem:[#allocation69_spill] sm:$0xff] %v6784_v25  ;;  %v1167_v17 = vadd.f32 %v911_v12, %v509_v4 }
 0x15e   : > { %2248 = vmatprep.mubr.f32.mxu0 %v9008_v56  ;;  %v1773_v31 = vmax.f32 %v1517_v14, 0.0  ;;  %v506_v42 = vmul.f32 %v6705_v59, %v9038_v28  ;;  %v1742_v30 = vmax.f32 %v1486_v38, 0.0  ;;  %v1758_v8 = vmax.f32 %v1502_v36, 0.0 }
 0x15f   : > { %2404 = vmatmul.mubr.f32.gmra.mrb[26].mxu1 %v6763_v60  ;;  %v1789_v51 = vmax.f32 %v1533_v48, 0.0  ;;  %v522_v19 = vmul.f32 %v6705_v59, %v9039_v7  ;;  %v1183_v53 = vadd.f32 %v927_v58, %v525_v2  ;;  %v1519_v9 = vadd.f32 %v9043_v10, %v1167_v17  ;;  %v6808_v2 = vld [vmem:[%s8595_s3 + $0x78] sm:$0xff] }
 0x160   : > { %2409 = vmatprep.mubr.f32.mxu1 %v9008_v56  ;;  %v908_v14 = vmul.f32 %v6709_v0, %v9040_v23  ;;  %v924_v4 = vmul.f32 %v6709_v0, %v9041_v46  ;;  %v4805_v12 = vpack.c.bf16 %v1758_v8, %v1742_v30  ;;  %v508_v36 = vmul.f32 %v6714_v63, %v9038_v28  ;;  %v9046_v8 = vld [vmem:[#allocation58_spill] sm:$0xff] }
 0x161   : > { %2249 = vmatmul.mubr.f32.gmra.mrb[28].mxu0 %v6784_v25  ;;  %v4775_v38 = vpack.c.bf16 %v1789_v51, %v1773_v31  ;;  %v524_v48 = vmul.f32 %v6714_v63, %v9039_v7  ;;  %v1535_v58 = vadd.f32 %v9044_v18, %v1183_v53  ;;  %v1775_v17 = vmax.f32 %v1519_v9, 0.0  ;;  %v9047_v7 = vld [vmem:[#allocation72_spill] sm:$0xff]  ;;  %v9048_v9 = vld [vmem:[#allocation17_spill] sm:$0xff] }
 0x162   : > { %2254 = vmatprep.mubr.f32.mxu0 %v9008_v56  ;;  %v1164_v45 = vadd.f32 %v908_v14, %v506_v42  ;;  %v1180_v13 = vadd.f32 %v924_v4, %v522_v19  ;;  %v910_v31 = vmul.f32 %v6741_v29, %v9040_v23  ;;  %v926_v30 = vmul.f32 %v6741_v29, %v9041_v46  ;;  %v9049_v23 = vld [vmem:[#allocation82_spill] sm:$0xff] }
 0x163   : > { %2410 = vmatmul.mubr.f32.gmra.mrb[28].mxu1 %v6784_v25  ;;  %v539_v51 = vmul.f32 %v9023_v44, %v9046_v8  ;;  %v555_v28 = vmul.f32 %v9023_v44, %v9047_v7  ;;  %v1791_v53 = vmax.f32 %v1535_v58, 0.0  ;;  %v941_v14 = vmul.f32 %v9026_v47, %v9048_v9 }
 0x164   : > { %2415 = vmatprep.mubr.f32.mxu1 %v9008_v56  ;;  %v1516_v42 = vadd.f32 %v9043_v10, %v1164_v45  ;;  %v1532_v19 = vadd.f32 %v9044_v18, %v1180_v13  ;;  %v1166_v4 = vadd.f32 %v910_v31, %v508_v36  ;;  %v1182_v46 = vadd.f32 %v926_v30, %v524_v48  ;;  %v9050_v30 = vld [vmem:[#allocation93_spill] sm:$0xff] }
 0x165   : > { %2255 = vmatmul.mubr.f32.gmra.mrb[30].mxu0 %v6808_v2  ;;  %v957_v25 = vmul.f32 %v9026_v47, %v9049_v23  ;;  %v541_v60 = vmul.f32 %v6668_v27, %v9046_v8  ;;  %v4807_v58 = vpack.c.bf16 %v1791_v53, %v1775_v17  ;;  %v1197_v33 = vadd.f32 %v941_v14, %v539_v51 }
 0x166   : > { %2486 = vmatprep.mubr.f32.mxu0 %v9008_v56  ;;  %v1772_v3 = vmax.f32 %v1516_v42, 0.0  ;;  %v1788_v45 = vmax.f32 %v1532_v19, 0.0  ;;  %v1518_v13 = vadd.f32 %v9043_v10, %v1166_v4  ;;  %v1534_v49 = vadd.f32 %v9044_v18, %v1182_v46  ;;  %v9051_v46 = vld [vmem:[#allocation90_spill] sm:$0xff] }
 0x167   : > { %2416 = vmatmul.mubr.f32.gmra.mrb[30].mxu1 %v6808_v2  ;;  %v1213_v36 = vadd.f32 %v957_v25, %v555_v28  ;;  %v557_v48 = vmul.f32 %v6668_v27, %v9047_v7  ;;  %v1549_v40 = vadd.f32 %v9050_v30, %v1197_v33  ;;  %v943_v17 = vmul.f32 %v6682_v20, %v9048_v9 }
 0x168   : > { %2647 = vmatprep.mubr.f32.mxu1 %v9008_v56  ;;  %v4777_v31 = vpack.c.bf16 %v1788_v45, %v1772_v3  ;;  %v959_v51 = vmul.f32 %v6682_v20, %v9049_v23  ;;  %v1774_v53 = vmax.f32 %v1518_v13, 0.0  ;;  %v1790_v42 = vmax.f32 %v1534_v49, 0.0 }
 0x169   : > { %2487 = vmatmul.mubr.f32.vlgmr.msra.gmra.mrb[32].mxu0 %v6416_v62  ;;  %v1565_v28 = vadd.f32 %v9051_v46, %v1213_v36  ;;  %v538_v25 = vmul.f32 %v6705_v59, %v9046_v8  ;;  %v1805_v33 = vmax.f32 %v1549_v40, 0.0  ;;  %v1199_v3 = vadd.f32 %v943_v17, %v541_v60 }
 0x16a   : > { %4774 = vmatpush1.bf16.msra.mxu0 %v6775_v6  ;;  %2492 = vmatprep.mubr.f32.mxu0 %v9008_v56  ;;  %v1215_v19 = vadd.f32 %v959_v51, %v557_v48  ;;  %v554_v14 = vmul.f32 %v6705_v59, %v9047_v7  ;;  %v4809_v4 = vpack.c.bf16 %v1790_v42, %v1774_v53 }
 0x16b   : > { %2648 = vmatmul.mubr.f32.vlgmr.msra.gmra.mrb[32].mxu1 %v6416_v62  ;;  %4776 = vmatprep.subr.bf16.mxu0 %v4775_v38  ;;  %v1821_v49 = vmax.f32 %v1565_v28, 0.0  ;;  %v940_v45 = vmul.f32 %v6709_v0, %v9048_v9  ;;  %v956_v13 = vmul.f32 %v6709_v0, %v9049_v23  ;;  %v1551_v40 = vadd.f32 %v9050_v30, %v1199_v3 }
 0x16c   : > { %4806 = vmatpush1.bf16.msra.mxu1 %v4805_v12  ;;  %2653 = vmatprep.mubr.f32.mxu1 %v9008_v56  ;;  %v1567_v60 = vadd.f32 %v9051_v46, %v1215_v19  ;;  %v540_v6 = vmul.f32 %v6714_v63, %v9046_v8  ;;  %v556_v12 = vmul.f32 %v6714_v63, %v9047_v7 }
 0x16d   : > { %4808 = vmatprep.subr.bf16.mxu1 %v4807_v58  ;;  %2493 = vmatmul.mubr.f32.gmra.mrb[34].mxu0 %v6441_v1  ;;  %v4779_v62 = vpack.c.bf16 %v1821_v49, %v1805_v33  ;;  %v1196_v38 = vadd.f32 %v940_v45, %v538_v25  ;;  %v1212_v36 = vadd.f32 %v956_v13, %v554_v14  ;;  %v1807_v48 = vmax.f32 %v1551_v40, 0.0  ;;  %v9052_v49 = vld [vmem:[#allocation22_spill] sm:$0xff] }
 0x16e   : > { %4778 = vmatpush1.bf16.msra.mxu0 %v4777_v31  ;;  %v1823_v17 = vmax.f32 %v1567_v60, 0.0  ;;  %2498 = vmatprep.mubr.f32.mxu0 %v9008_v56  ;;  %v942_v51 = vmul.f32 %v6741_v29, %v9048_v9  ;;  %v958_v31 = vmul.f32 %v6741_v29, %v9049_v23  ;;  %v571_v25 = vmul.f32 %v9023_v44, %v5807_v5 }
 0x16f   : > { %2654 = vmatmul.mubr.f32.gmra.mrb[34].mxu1 %v6441_v1  ;;  %4780 = vmatprep.subr.bf16.mxu0 %v4779_v62  ;;  %v1548_v58 = vadd.f32 %v9050_v30, %v1196_v38  ;;  %v1564_v53 = vadd.f32 %v9051_v46, %v1212_v36  ;;  %v587_v19 = vmul.f32 %v9023_v44, %v8972_v50 }
 0x170   : > { %4810 = vmatpush1.bf16.msra.mxu1 %v4809_v4  ;;  %v4811_v42 = vpack.c.bf16 %v1823_v17, %v1807_v48  ;;  %2659 = vmatprep.mubr.f32.mxu1 %v9008_v56  ;;  %v1198_v28 = vadd.f32 %v942_v51, %v540_v6  ;;  %v1214_v3 = vadd.f32 %v958_v31, %v556_v12 }
 0x171   : > { %2499 = vmatmul.mubr.f32.gmra.mrb[36].mxu0 %v6468_v11  ;;  %v1804_v33 = vmax.f32 %v1548_v58, 0.0  ;;  %v1820_v1 = vmax.f32 %v1564_v53, 0.0  ;;  %v973_v4 = vmul.f32 %v9026_v47, %v9052_v49  ;;  %v989_v45 = vmul.f32 %v9026_v47, %v8973_v52 }
 0x172   : > { %4812 = vmatprep.subr.bf16.mxu1 %v4811_v42  ;;  %v1550_v14 = vadd.f32 %v9050_v30, %v1198_v28  ;;  %v573_v13 = vmul.f32 %v6668_v27, %v5807_v5  ;;  %v1566_v60 = vadd.f32 %v9051_v46, %v1214_v3  ;;  %v589_v6 = vmul.f32 %v6668_v27, %v8972_v50 }
 0x173   : > { %2660 = vmatmul.mubr.f32.gmra.mrb[36].mxu1 %v6468_v11  ;;  %v4781_v40 = vpack.c.bf16 %v1820_v1, %v1804_v33  ;;  %v975_v62 = vmul.f32 %v6682_v20, %v9052_v49  ;;  %v1229_v36 = vadd.f32 %v973_v4, %v571_v25  ;;  %v1245_v48 = vadd.f32 %v989_v45, %v587_v19 }
 0x174   : > { %v1806_v38 = vmax.f32 %v1550_v14, 0.0  ;;  %v991_v17 = vmul.f32 %v6682_v20, %v8973_v52  ;;  %2504 = vmatprep.mubr.f32.mxu0 %v9008_v56  ;;  %2665 = vmatprep.mubr.f32.mxu1 %v9008_v56  ;;  %v1822_v11 = vmax.f32 %v1566_v60, 0.0  ;;  %v570_v51 = vmul.f32 %v6705_v59, %v5807_v5 }
 0x175   : > { %4782 = vmatpush1.bf16.msra.mxu0 %v4781_v40  ;;  %v1231_v12 = vadd.f32 %v975_v62, %v573_v13  ;;  %v586_v58 = vmul.f32 %v6705_v59, %v8972_v50  ;;  %v1581_v53 = vadd.f32 %v6009_v22, %v1229_v36  ;;  %v1597_v31 = vadd.f32 %v8980_v43, %v1245_v48 }
 0x176   : > { %v1247_v42 = vadd.f32 %v991_v17, %v589_v6  ;;  %2505 = vmatmul.mubr.f32.gmra.mrb[38].mxu0 %v6495_v37  ;;  %v972_v28 = vmul.f32 %v6709_v0, %v9052_v49  ;;  %v4813_v25 = vpack.c.bf16 %v1822_v11, %v1806_v38  ;;  %v988_v1 = vmul.f32 %v6709_v0, %v8973_v52 }
 0x177   : > { %v1583_v33 = vadd.f32 %v6009_v22, %v1231_v12  ;;  %2666 = vmatmul.mubr.f32.gmra.mrb[38].mxu1 %v6495_v37  ;;  %v572_v3 = vmul.f32 %v6714_v63, %v5807_v5  ;;  %v1837_v19 = vmax.f32 %v1581_v53, 0.0  ;;  %v1853_v14 = vmax.f32 %v1597_v31, 0.0  ;;  %2510 = vmatprep.mubr.f32.mxu0 %v9008_v56  ;;  %v9053_v31 = vld [vmem:[#allocation32_spill] sm:$0xff] }
 0x178   : > { %v1599_v4 = vadd.f32 %v8980_v43, %v1247_v42  ;;  %v1228_v45 = vadd.f32 %v972_v28, %v570_v51  ;;  %2671 = vmatprep.mubr.f32.mxu1 %v9008_v56  ;;  %4814 = vmatpush1.bf16.msra.mxu1 %v4813_v25  ;;  %v1244_v40 = vadd.f32 %v988_v1, %v586_v58 }
 0x179   : > { %v1839_v13 = vmax.f32 %v1583_v33, 0.0  ;;  %v588_v37 = vmul.f32 %v6714_v63, %v8972_v50  ;;  %v974_v60 = vmul.f32 %v6741_v29, %v9052_v49  ;;  %v4783_v6 = vpack.c.bf16 %v1853_v14, %v1837_v19 }
 0x17a   : > { %v1855_v62 = vmax.f32 %v1599_v4, 0.0  ;;  %v1580_v38 = vadd.f32 %v6009_v22, %v1228_v45  ;;  %v990_v36 = vmul.f32 %v6741_v29, %v8973_v52  ;;  %2511 = vmatmul.mubr.f32.gmra.mrb[40].mxu0 %v6523_v24  ;;  %v1596_v48 = vadd.f32 %v8980_v43, %v1244_v40 }
 0x17b   : > { %v1230_v17 = vadd.f32 %v974_v60, %v572_v3  ;;  %v603_v11 = vmul.f32 %v9023_v44, %v8987_v21  ;;  %v619_v12 = vmul.f32 %v9023_v44, %v8992_v54  ;;  %2672 = vmatmul.mubr.f32.gmra.mrb[40].mxu1 %v6523_v24  ;;  %4784 = vmatprep.subr.bf16.mxu0 %v4783_v6 }
 0x17c   : > { %v4815_v51 = vpack.c.bf16 %v1855_v62, %v1839_v13  ;;  %v1836_v58 = vmax.f32 %v1580_v38, 0.0  ;;  %v1246_v53 = vadd.f32 %v990_v36, %v588_v37  ;;  %v1005_v42 = vmul.f32 %v9026_v47, %v9053_v31  ;;  %2516 = vmatprep.mubr.f32.mxu0 %v9008_v56  ;;  %2677 = vmatprep.mubr.f32.mxu1 %v9008_v56 }
 0x17d   : > { %v1852_v28 = vmax.f32 %v1596_v48, 0.0  ;;  %v1582_v25 = vadd.f32 %v6009_v22, %v1230_v17  ;;  %v1021_v33 = vmul.f32 %v9026_v47, %v5980_v26  ;;  %v605_v1 = vmul.f32 %v6668_v27, %v8987_v21 }
 0x17e   : > { %4816 = vmatprep.subr.bf16.mxu1 %v4815_v51  ;;  %v1598_v24 = vadd.f32 %v8980_v43, %v1246_v53  ;;  %v1261_v3 = vadd.f32 %v1005_v42, %v603_v11  ;;  %v621_v19 = vmul.f32 %v6668_v27, %v8992_v54  ;;  %v1007_v14 = vmul.f32 %v6682_v20, %v9053_v31 }
 0x17f   : > { %v4785_v4 = vpack.c.bf16 %v1852_v28, %v1836_v58  ;;  %v1838_v45 = vmax.f32 %v1582_v25, 0.0  ;;  %v1277_v13 = vadd.f32 %v1021_v33, %v619_v12  ;;  %v1023_v40 = vmul.f32 %v6682_v20, %v5980_v26  ;;  %2517 = vmatmul.mubr.f32.gmra.mrb[42].mxu0 %v6547_v15  ;;  %2678 = vmatmul.mubr.f32.gmra.mrb[42].mxu1 %v6547_v15 }
 0x180   : > { %v1854_v37 = vmax.f32 %v1598_v24, 0.0  ;;  %v1613_v60 = vadd.f32 %v6117_v39, %v1261_v3  ;;  %v1263_v6 = vadd.f32 %v1007_v14, %v605_v1  ;;  %v602_v62 = vmul.f32 %v6705_v59, %v8987_v21  ;;  %2522 = vmatprep.mubr.f32.mxu0 %v9008_v56  ;;  %2683 = vmatprep.mubr.f32.mxu1 %v9008_v56 }
 0x181   : > { %4786 = vmatpush1.bf16.msra.mxu0 %v4785_v4  ;;  %v1629_v38 = vadd.f32 %v8995_v32, %v1277_v13  ;;  %v1279_v36 = vadd.f32 %v1023_v40, %v621_v19  ;;  %v618_v48 = vmul.f32 %v6705_v59, %v8992_v54  ;;  %v1004_v15 = vmul.f32 %v6709_v0, %v9053_v31 }
 0x182   : > { %v4817_v17 = vpack.c.bf16 %v1854_v37, %v1838_v45  ;;  %v1869_v11 = vmax.f32 %v1613_v60, 0.0  ;;  %v1615_v12 = vadd.f32 %v6117_v39, %v1263_v6  ;;  %v1020_v51 = vmul.f32 %v6709_v0, %v5980_v26 }
 0x183   : > { %v1885_v58 = vmax.f32 %v1629_v38, 0.0  ;;  %v1631_v53 = vadd.f32 %v8995_v32, %v1279_v36  ;;  %v1260_v42 = vadd.f32 %v1004_v15, %v602_v62  ;;  %v604_v28 = vmul.f32 %v6714_v63, %v8987_v21  ;;  %2523 = vmatmul.mubr.f32.gmra.mrb[44].mxu0 %v6570_v41  ;;  %2684 = vmatmul.mubr.f32.gmra.mrb[44].mxu1 %v6570_v41 }
 0x184   : > { %4818 = vmatpush1.bf16.msra.mxu1 %v4817_v17  ;;  %v1871_v25 = vmax.f32 %v1615_v12, 0.0  ;;  %v1276_v33 = vadd.f32 %v1020_v51, %v618_v48  ;;  %v620_v1 = vmul.f32 %v6714_v63, %v8992_v54  ;;  %v1006_v24 = vmul.f32 %v6741_v29, %v9053_v31  ;;  %2528 = vmatprep.mubr.f32.mxu0 %v9008_v56 }
 0x185   : > { %v4787_v3 = vpack.c.bf16 %v1885_v58, %v1869_v11  ;;  %v1887_v19 = vmax.f32 %v1631_v53, 0.0  ;;  %v1612_v14 = vadd.f32 %v6117_v39, %v1260_v42  ;;  %v1022_v4 = vmul.f32 %v6741_v29, %v5980_v26  ;;  %2689 = vmatprep.mubr.f32.mxu1 %v9008_v56 }
 0x186   : > { %v1628_v41 = vadd.f32 %v8995_v32, %v1276_v33  ;;  %v1262_v45 = vadd.f32 %v1006_v24, %v604_v28  ;;  %v635_v13 = vmul.f32 %v9023_v44, %v9003_v16  ;;  %v651_v40 = vmul.f32 %v9023_v44, %v9004_v35  ;;  %v9054_v24 = vld [vmem:[#allocation48_spill] sm:$0xff] }
 0x187   : > { %4788 = vmatprep.subr.bf16.mxu0 %v4787_v3  ;;  %v4819_v37 = vpack.c.bf16 %v1887_v19, %v1871_v25  ;;  %v1868_v60 = vmax.f32 %v1612_v14, 0.0  ;;  %v1278_v6 = vadd.f32 %v1022_v4, %v620_v1  ;;  %v1037_v62 = vmul.f32 %v9026_v47, %v9007_v57  ;;  %2529 = vmatmul.mubr.f32.gmra.mrb[46].mxu0 %v6601_v34  ;;  %v9055_v3 = vld [vmem:[#allocation54_spill] sm:$0xff] }
 0x188   : > { %v1884_v38 = vmax.f32 %v1628_v41, 0.0  ;;  %v1614_v36 = vadd.f32 %v6117_v39, %v1262_v45  ;;  %v1053_v48 = vmul.f32 %v9026_v47, %v9009_v55  ;;  %v637_v15 = vmul.f32 %v6668_v27, %v9003_v16  ;;  %2690 = vmatmul.mubr.f32.gmra.mrb[46].mxu1 %v6601_v34  ;;  %2534 = vmatprep.mubr.f32.mxu0 %v9008_v56 }
 0x189   : > { %4820 = vmatprep.subr.bf16.mxu1 %v4819_v37  ;;  %v1630_v17 = vadd.f32 %v8995_v32, %v1278_v6  ;;  %v1293_v11 = vadd.f32 %v1037_v62, %v635_v13  ;;  %v653_v12 = vmul.f32 %v6668_v27, %v9004_v35  ;;  %v1039_v51 = vmul.f32 %v6682_v20, %v9007_v57 }
 0x18a   : > { %v4789_v58 = vpack.c.bf16 %v1884_v38, %v1868_v60  ;;  %v1870_v53 = vmax.f32 %v1614_v36, 0.0  ;;  %v1309_v42 = vadd.f32 %v1053_v48, %v651_v40  ;;  %v1055_v28 = vmul.f32 %v6682_v20, %v9009_v55  ;;  %2695 = vmatprep.mubr.f32.mxu1 %v9008_v56 }
 0x18b   : > { %v1886_v34 = vmax.f32 %v1630_v17, 0.0  ;;  %v1645_v25 = vadd.f32 %v6234_v61, %v1293_v11  ;;  %v1295_v33 = vadd.f32 %v1039_v51, %v637_v15  ;;  %v634_v1 = vmul.f32 %v6705_v59, %v9003_v16  ;;  %2535 = vmatmul.mubr.f32.gmra.mrb[48].mxu0 %v9054_v24  ;;  %v9056_v11 = vld [vmem:[#allocation29_spill] sm:$0xff] }
 0x18c   : > { %4790 = vmatpush1.bf16.msra.mxu0 %v4789_v58  ;;  %v1661_v19 = vadd.f32 %v9055_v3, %v1309_v42  ;;  %v1311_v14 = vadd.f32 %v1055_v28, %v653_v12  ;;  %v650_v4 = vmul.f32 %v6705_v59, %v9004_v35  ;;  %v1036_v41 = vmul.f32 %v6709_v0, %v9007_v57 }
 0x18d   : > { %v4821_v45 = vpack.c.bf16 %v1886_v34, %v1870_v53  ;;  %v1901_v13 = vmax.f32 %v1645_v25, 0.0  ;;  %v1647_v40 = vadd.f32 %v6234_v61, %v1295_v33  ;;  %v1052_v37 = vmul.f32 %v6709_v0, %v9009_v55  ;;  %2696 = vmatmul.mubr.f32.gmra.mrb[48].mxu1 %v9054_v24  ;;  %2540 = vmatprep.mubr.f32.mxu0 %v9008_v56  ;;  %v9057_v34 = vld [vmem:[#allocation33_spill] sm:$0xff]  ;;  %v9058_v33 = vld [vmem:[#allocation34_spill] sm:$0xff] }
 0x18e   : > { %v1917_v60 = vmax.f32 %v1661_v19, 0.0  ;;  %v1663_v6 = vadd.f32 %v9055_v3, %v1311_v14  ;;  %v1292_v62 = vadd.f32 %v1036_v41, %v634_v1  ;;  %v636_v38 = vmul.f32 %v6714_v63, %v9003_v16  ;;  %2701 = vmatprep.mubr.f32.mxu1 %v9008_v56 }
 0x18f   : > { %4822 = vmatpush1.bf16.msra.mxu1 %v4821_v45  ;;  %v1903_v36 = vmax.f32 %v1647_v40, 0.0  ;;  %v1308_v48 = vadd.f32 %v1052_v37, %v650_v4  ;;  %v652_v15 = vmul.f32 %v6714_v63, %v9004_v35  ;;  %v1038_v17 = vmul.f32 %v6741_v29, %v9007_v57  ;;  %2541 = vmatmul.mubr.f32.gmra.mrb[50].mxu0 %v9056_v11  ;;  %v9059_v4 = vld [vmem:[#allocation49_spill] sm:$0xff]  ;;  %v9060_v40 = vld [vmem:[#allocation59_spill] sm:$0xff] }
 0x190   : > { %v4791_v12 = vpack.c.bf16 %v1917_v60, %v1901_v13  ;;  %v1919_v51 = vmax.f32 %v1663_v6, 0.0  ;;  %v1644_v58 = vadd.f32 %v6234_v61, %v1292_v62  ;;  %v1054_v53 = vmul.f32 %v6741_v29, %v9009_v55  ;;  %2546 = vmatprep.mubr.f32.mxu0 %v9008_v56  ;;  %v9061_v6 = vld [vmem:[#allocation14_spill] sm:$0xff] }
 0x191   : > { %v1660_v42 = vadd.f32 %v9055_v3, %v1308_v48  ;;  %v1294_v28 = vadd.f32 %v1038_v17, %v636_v38  ;;  %v667_v25 = vmul.f32 %v9023_v44, %v9057_v34  ;;  %v683_v1 = vmul.f32 %v9023_v44, %v9058_v33  ;;  %2702 = vmatmul.mubr.f32.gmra.mrb[50].mxu1 %v9056_v11 }
 0x192   : > { %4792 = vmatprep.subr.bf16.mxu0 %v4791_v12  ;;  %v4823_v24 = vpack.c.bf16 %v1919_v51, %v1903_v36  ;;  %v1900_v19 = vmax.f32 %v1644_v58, 0.0  ;;  %v1310_v14 = vadd.f32 %v1054_v53, %v652_v15  ;;  %v1069_v41 = vmul.f32 %v9026_v47, %v9059_v4  ;;  %2707 = vmatprep.mubr.f32.mxu1 %v9008_v56  ;;  %v9062_v58 = vld [vmem:[#allocation47_spill] sm:$0xff] }
 0x193   : > { %v1916_v45 = vmax.f32 %v1660_v42, 0.0  ;;  %v1646_v13 = vadd.f32 %v6234_v61, %v1294_v28  ;;  %v1085_v37 = vmul.f32 %v9026_v47, %v9060_v40  ;;  %v669_v60 = vmul.f32 %v6668_v27, %v9057_v34  ;;  %2547 = vmatmul.mubr.f32.gmra.mrb[52].mxu0 %v9061_v6 }
 0x194   : > { %4824 = vmatprep.subr.bf16.mxu1 %v4823_v24  ;;  %v1662_v62 = vadd.f32 %v9055_v3, %v1310_v14  ;;  %v1325_v38 = vadd.f32 %v1069_v41, %v667_v25  ;;  %v685_v36 = vmul.f32 %v6668_v27, %v9058_v33  ;;  %v1071_v48 = vmul.f32 %v6682_v20, %v9059_v4  ;;  %v9063_v25 = vld [vmem:[#allocation60_spill] sm:$0xff] }
 0x195   : > { %v4793_v15 = vpack.c.bf16 %v1916_v45, %v1900_v19  ;;  %v1902_v17 = vmax.f32 %v1646_v13, 0.0  ;;  %v1341_v11 = vadd.f32 %v1085_v37, %v683_v1  ;;  %v1087_v12 = vmul.f32 %v6682_v20, %v9060_v40  ;;  %2708 = vmatmul.mubr.f32.gmra.mrb[52].mxu1 %v9061_v6  ;;  %2552 = vmatprep.mubr.f32.mxu0 %v9008_v56 }
 0x196   : > { %v1918_v51 = vmax.f32 %v1662_v62, 0.0  ;;  %v1677_v53 = vadd.f32 %v9062_v58, %v1325_v38  ;;  %v1327_v42 = vadd.f32 %v1071_v48, %v669_v60  ;;  %v666_v28 = vmul.f32 %v6705_v59, %v9057_v34  ;;  %2713 = vmatprep.mubr.f32.mxu1 %v9008_v56  ;;  %v9064_v60 = vld [vmem:[#allocation66_spill] sm:$0xff] }
 0x197   : > { %4794 = vmatpush1.bf16.msra.mxu0 %v4793_v15  ;;  %v1693_v24 = vadd.f32 %v9063_v25, %v1341_v11  ;;  %v1343_v1 = vadd.f32 %v1087_v12, %v685_v36  ;;  %v682_v19 = vmul.f32 %v6705_v59, %v9058_v33  ;;  %v1068_v14 = vmul.f32 %v6709_v0, %v9059_v4 }
 0x198   : > { %v4825_v41 = vpack.c.bf16 %v1918_v51, %v1902_v17  ;;  %v1933_v45 = vmax.f32 %v1677_v53, 0.0  ;;  %v1679_v13 = vadd.f32 %v9062_v58, %v1327_v42  ;;  %v1084_v37 = vmul.f32 %v6709_v0, %v9060_v40  ;;  %2553 = vmatmul.mubr.f32.gmra.mrb[54].mxu0 %v9064_v60 }
 0x199   : > { %v1949_v6 = vmax.f32 %v1693_v24, 0.0  ;;  %v1695_v62 = vadd.f32 %v9063_v25, %v1343_v1  ;;  %v1324_v38 = vadd.f32 %v1068_v14, %v666_v28  ;;  %v668_v36 = vmul.f32 %v6714_v63, %v9057_v34  ;;  %2714 = vmatmul.mubr.f32.gmra.mrb[54].mxu1 %v9064_v60  ;;  %2558 = vmatprep.mubr.f32.mxu0 %v9008_v56  ;;  %v9065_v1 = vld [vmem:[#allocation25_spill] sm:$0xff]  ;;  %v9066_v14 = vld [vmem:[#allocation46_spill] sm:$0xff] }
 0x19a   : > { %4826 = vmatpush1.bf16.msra.mxu1 %v4825_v41  ;;  %v1935_v48 = vmax.f32 %v1679_v13, 0.0  ;;  %v1340_v15 = vadd.f32 %v1084_v37, %v682_v19  ;;  %v684_v17 = vmul.f32 %v6714_v63, %v9058_v33  ;;  %v1070_v11 = vmul.f32 %v6741_v29, %v9059_v4  ;;  %2719 = vmatprep.mubr.f32.mxu1 %v9008_v56  ;;  %v9067_v13 = vld [vmem:[#allocation68_spill] sm:$0xff] }
 0x19b   : > { %v4795_v12 = vpack.c.bf16 %v1949_v6, %v1933_v45  ;;  %v1951_v51 = vmax.f32 %v1695_v62, 0.0  ;;  %v1676_v53 = vadd.f32 %v9062_v58, %v1324_v38  ;;  %v1086_v42 = vmul.f32 %v6741_v29, %v9060_v40  ;;  %v9068_v6 = vld [vmem:[#allocation63_spill] sm:$0xff] }
 0x19c   : > { %v1692_v28 = vadd.f32 %v9063_v25, %v1340_v15  ;;  %v1326_v24 = vadd.f32 %v1070_v11, %v668_v36  ;;  %v699_v19 = vmul.f32 %v9023_v44, %v9065_v1  ;;  %v715_v41 = vmul.f32 %v9023_v44, %v9066_v14  ;;  %2559 = vmatmul.mubr.f32.gmra.mrb[56].mxu0 %v9067_v13  ;;  %v9069_v15 = vld [vmem:[#allocation61_spill] sm:$0xff] }
 0x19d   : > { %4796 = vmatprep.subr.bf16.mxu0 %v4795_v12  ;;  %v4827_v37 = vpack.c.bf16 %v1951_v51, %v1935_v48  ;;  %v1932_v45 = vmax.f32 %v1676_v53, 0.0  ;;  %v1342_v60 = vadd.f32 %v1086_v42, %v684_v17  ;;  %v1101_v62 = vmul.f32 %v9026_v47, %v9068_v6  ;;  %2720 = vmatmul.mubr.f32.gmra.mrb[56].mxu1 %v9067_v13 }
 0x19e   : > { %v1948_v38 = vmax.f32 %v1692_v28, 0.0  ;;  %v1678_v36 = vadd.f32 %v9062_v58, %v1326_v24  ;;  %v1117_v11 = vmul.f32 %v9026_v47, %v9069_v15  ;;  %v701_v44 = vmul.f32 %v6668_v27, %v9065_v1  ;;  %2564 = vmatprep.mubr.f32.mxu0 %v9008_v56  ;;  %2725 = vmatprep.mubr.f32.mxu1 %v9008_v56  ;;  %v9070_v24 = vld [vmem:[#allocation78_spill] sm:$0xff] }
 0x19f   : > { %4828 = vmatprep.subr.bf16.mxu1 %v4827_v37  ;;  %v1694_v48 = vadd.f32 %v9063_v25, %v1342_v60  ;;  %v1357_v17 = vadd.f32 %v1101_v62, %v699_v19  ;;  %v717_v12 = vmul.f32 %v6668_v27, %v9066_v14  ;;  %v1103_v51 = vmul.f32 %v6682_v20, %v9068_v6  ;;  %v9071_v58 = vld [vmem:[#allocation26_spill] sm:$0xff]  ;;  %v9072_v27 = vld [vmem:[#allocation28_spill] sm:$0xff] }
 0x1a0   : > { %v4797_v53 = vpack.c.bf16 %v1948_v38, %v1932_v45  ;;  %v1934_v42 = vmax.f32 %v1678_v36, 0.0  ;;  %v1373_v47 = vadd.f32 %v1117_v11, %v715_v41  ;;  %v1119_v28 = vmul.f32 %v6682_v20, %v9069_v15  ;;  %2565 = vmatmul.mubr.f32.gmra.mrb[58].mxu0 %v9070_v24 }
 0x1a1   : > { %v1950_v13 = vmax.f32 %v1694_v48, 0.0  ;;  %v1709_v37 = vadd.f32 %v9071_v58, %v1357_v17  ;;  %v1359_v40 = vadd.f32 %v1103_v51, %v701_v44  ;;  %v698_v19 = vmul.f32 %v6705_v59, %v9065_v1  ;;  %2726 = vmatmul.mubr.f32.gmra.mrb[58].mxu1 %v9070_v24  ;;  %2570 = vmatprep.mubr.f32.mxu0 %v9008_v56 }
 0x1a2   : > { %4798 = vmatpush1.bf16.msra.mxu0 %v4797_v53  ;;  %v1725_v45 = vadd.f32 %v9072_v27, %v1373_v47  ;;  %v1375_v41 = vadd.f32 %v1119_v28, %v717_v12  ;;  %v714_v20 = vmul.f32 %v6705_v59, %v9066_v14  ;;  %v1100_v60 = vmul.f32 %v6709_v0, %v9068_v6  ;;  %v9073_v59 = vld [vmem:[#allocation69_spill] sm:$0xff] }
 0x1a3   : > { %v4829_v62 = vpack.c.bf16 %v1950_v13, %v1934_v42  ;;  %v1965_v38 = vmax.f32 %v1709_v37, 0.0  ;;  %v1711_v36 = vadd.f32 %v9071_v58, %v1359_v40  ;;  %v1116_v11 = vmul.f32 %v6709_v0, %v9069_v15  ;;  %2731 = vmatprep.mubr.f32.mxu1 %v9008_v56 }
 0x1a4   : > { %v1981_v44 = vmax.f32 %v1725_v45, 0.0  ;;  %v1727_v48 = vadd.f32 %v9072_v27, %v1375_v41  ;;  %v1356_v17 = vadd.f32 %v1100_v60, %v698_v19  ;;  %v700_v12 = vmul.f32 %v6714_v63, %v9065_v1  ;;  %2571 = vmatmul.mubr.f32.gmra.mrb[60].mxu0 %v9073_v59  ;;  %v9074_v19 = vld [vmem:[#allocation7_spill] sm:$0xff]  ;;  %v9075_v45 = vld [vmem:[#allocation57_spill] sm:$0xff]  ;;  %v9087_v1 = vld [vmem:[#allocation86_spill] sm:$0xff] }
 0x1a5   : > { %4830 = vmatpush1.bf16.msra.mxu1 %v4829_v62  ;;  %v1967_v51 = vmax.f32 %v1711_v36, 0.0  ;;  %v1372_v53 = vadd.f32 %v1116_v11, %v714_v20  ;;  %v716_v40 = vmul.f32 %v6714_v63, %v9066_v14  ;;  %v1102_v0 = vmul.f32 %v6741_v29, %v9068_v6  ;;  %2576 = vmatprep.mubr.f32.mxu0 %v9008_v56  ;;  %v9076_v41 = vld [vmem:[#allocation15_spill] sm:$0xff] }
 0x1a6   : > { %v4799_v42 = vpack.c.bf16 %v1981_v44, %v1965_v38  ;;  %v1983_v47 = vmax.f32 %v1727_v48, 0.0  ;;  %v1708_v28 = vadd.f32 %v9071_v58, %v1356_v17  ;;  %v1118_v24 = vmul.f32 %v6741_v29, %v9069_v15  ;;  %2732 = vmatmul.mubr.f32.gmra.mrb[60].mxu1 %v9073_v59  ;;  %v9077_v29 = vld [vmem:[#allocation8_spill] sm:$0xff]  ;;  %v9078_v48 = vld [vmem:[#allocation77_spill] sm:$0xff] }
 0x1a7   : > { %v1724_v13 = vadd.f32 %v9072_v27, %v1372_v53  ;;  %v1358_v37 = vadd.f32 %v1102_v0, %v700_v12  ;;  %v7125_v63 = vrot.slane %v9075_v45, %v9074_v19  ;;  %v7129_v20 = vrot.slane %v9076_v41, %v9074_v19  ;;  %2737 = vmatprep.mubr.f32.mxu1 %v9008_v56  ;;  %v9079_v12 = vld [vmem:[#allocation83_spill] sm:$0xff]  ;;  %v9080_v53 = vld [vmem:[#allocation9_spill] sm:$0xff]  ;;  %v9081_v0 = vld [vmem:[#allocation16_spill] sm:$0xff] }
 0x1a8   : > { %4800 = vmatprep.subr.bf16.mxu0 %v4799_v42  ;;  %v4831_v60 = vpack.c.bf16 %v1983_v47, %v1967_v51  ;;  %v1964_v62 = vmax.f32 %v1708_v28, 0.0  ;;  %v1374_v38 = vadd.f32 %v1118_v24, %v716_v40  ;;  %v7134_v36 = vrot.slane %v9075_v45, %v9077_v29  ;;  %2577 = vmatmul.mubr.f32.gmra.mrb[62].mxu0 %v6808_v2 }
 0x1a9   : > { %v1980_v11 = vmax.f32 %v1724_v13, 0.0  ;;  %v1710_v44 = vadd.f32 %v9071_v58, %v1358_v37  ;;  %v479_v17 = vmul.f32 %v7125_v63, %v9078_v48  ;;  %v495_v59 = vmul.f32 %v7125_v63, %v9079_v12  ;;  %2808 = vmatprep.mubr.f32.mxu0 %v9008_v56 }
 0x1aa   : > { %4832 = vmatprep.subr.bf16.mxu1 %v4831_v60  ;;  %v1726_v51 = vadd.f32 %v9072_v27, %v1374_v38  ;;  %v881_v40 = vmul.f32 %v7129_v20, %v9080_v53  ;;  %v897_v42 = vmul.f32 %v7129_v20, %v9081_v0  ;;  %v481_v47 = vmul.f32 %v7134_v36, %v9078_v48  ;;  %v9082_v27 = vld [vmem:[#allocation11_spill] sm:$0xff] }
 0x1ab   : > { %v4801_v28 = vpack.c.bf16 %v1980_v11, %v1964_v62  ;;  %v1966_v24 = vmax.f32 %v1710_v44, 0.0  ;;  %v497_v13 = vmul.f32 %v7134_v36, %v9079_v12  ;;  %v7154_v37 = vrot.slane %v9076_v41, %v9077_v29  ;;  %2738 = vmatmul.mubr.f32.gmra.mrb[62].mxu1 %v6808_v2  ;;  %v9083_v2 = vld [vmem:[#allocation12_spill] sm:$0xff] }
 0x1ac   : > { %v1982_v19 = vmax.f32 %v1726_v51, 0.0  ;;  %v1137_v60 = vadd.f32 %v881_v40, %v479_v17  ;;  %v1153_v38 = vadd.f32 %v897_v42, %v495_v59  ;;  %2969 = vmatprep.mubr.f32.mxu1 %v9008_v56  ;;  %v7160_v58 = vrot.slane %v9075_v45, %v9082_v27  ;;  %v9084_v59 = vld [vmem:[#allocation45_spill] sm:$0xff]  ;;  %v9085_v40 = vld [vmem:[#allocation88_spill] sm:$0xff] }
 0x1ad   : > { %4802 = vmatpush1.bf16.msra.mxu0 %v4801_v28  ;;  %v883_v62 = vmul.f32 %v7154_v37, %v9080_v53  ;;  %v899_v11 = vmul.f32 %v7154_v37, %v9081_v0  ;;  %v7168_v29 = vrot.slane %v9076_v41, %v9082_v27  ;;  %v7172_v44 = vrot.slane %v9075_v45, %v9083_v2 }
 0x1ae   : > { %v4833_v17 = vpack.c.bf16 %v1982_v19, %v1966_v24  ;;  %v1489_v51 = vadd.f32 %v9084_v59, %v1137_v60  ;;  %v1505_v42 = vadd.f32 %v9085_v40, %v1153_v38  ;;  %v478_v28 = vmul.f32 %v7160_v58, %v9078_v48  ;;  %v7185_v24 = vld [vmem:[%s8595_s3] sm:$0xff] }
 0x1af   : > { %v1139_v15 = vadd.f32 %v883_v62, %v481_v47  ;;  %v1155_v6 = vadd.f32 %v899_v11, %v497_v13  ;;  %v494_v14 = vmul.f32 %v7160_v58, %v9079_v12  ;;  %v880_v27 = vmul.f32 %v7168_v29, %v9080_v53  ;;  %9086 = vst [vmem:[#allocation70_spill] sm:$0xff] %v7185_v24 }
 0x1b0   : > { %4834 = vmatpush1.bf16.msra.mxu1 %v4833_v17  ;;  %v1745_v45 = vmax.f32 %v1489_v51, 0.0  ;;  %v1761_v41 = vmax.f32 %v1505_v42, 0.0  ;;  %2809 = vmatmul.mubr.f32.vlgmr.msra.gmra.mrb[64].mxu0 %v7185_v24  ;;  %v896_v47 = vmul.f32 %v7168_v29, %v9081_v0  ;;  %v480_v13 = vmul.f32 %v7172_v44, %v9078_v48  ;;  %v4996_v51 = vld [vmem:[%s5242_s30 + $0x11] ss:$2 sm:$0xff] }
 0x1b1   : > { %v1491_v19 = vadd.f32 %v9084_v59, %v1139_v15  ;;  %v1507_v60 = vadd.f32 %v9085_v40, %v1155_v6  ;;  %v1136_v38 = vadd.f32 %v880_v27, %v478_v28  ;;  %v496_v62 = vmul.f32 %v7172_v44, %v9079_v12  ;;  %2814 = vmatprep.mubr.f32.mxu0 %v9008_v56  ;;  %v9088_v15 = vld [vmem:[#allocation27_spill] sm:$0xff]  ;;  %v9089_v27 = vld [vmem:[#allocation10_spill] sm:$0xff] }
 0x1b2   : > { %v4835_v11 = vpack.c.bf16 %v1761_v41, %v1745_v45  ;;  %v1152_v17 = vadd.f32 %v896_v47, %v494_v14  ;;  %v7199_v42 = vrot.slane %v4996_v51, %v9083_v2  ;;  %v511_v25 = vmul.f32 %v7125_v63, %v9087_v1 }
 0x1b3   : > { %v1747_v48 = vmax.f32 %v1491_v19, 0.0  ;;  %v1763_v4 = vmax.f32 %v1507_v60, 0.0  ;;  %2970 = vmatmul.mubr.f32.vlgmr.msra.gmra.mrb[64].mxu1 %v7185_v24  ;;  %v1488_v6 = vadd.f32 %v9084_v59, %v1136_v38  ;;  %v527_v12 = vmul.f32 %v7125_v63, %v9088_v15  ;;  %v9090_v19 = vld [vmem:[#allocation39_spill] sm:$0xff] }
 0x1b4   : > { %4836 = vmatprep.subr.bf16.mxu0 %v4835_v11  ;;  %v1504_v28 = vadd.f32 %v9085_v40, %v1152_v17  ;;  %v882_v14 = vmul.f32 %v7199_v42, %v9080_v53  ;;  %v898_v2 = vmul.f32 %v7199_v42, %v9081_v0  ;;  %v913_v45 = vmul.f32 %v7129_v20, %v9089_v27  ;;  %v7222_v53 = vld [vmem:[%s8595_s3 + $0x8] sm:$0xff] }
 0x1b5   : > { %v4867_v41 = vpack.c.bf16 %v1763_v4, %v1747_v48  ;;  %v1744_v47 = vmax.f32 %v1488_v6, 0.0  ;;  %v929_v60 = vmul.f32 %v7129_v20, %v9090_v19  ;;  %v513_v38 = vmul.f32 %v7134_v36, %v9087_v1  ;;  %2975 = vmatprep.mubr.f32.mxu1 %v9008_v56  ;;  %2815 = vmatmul.mubr.f32.gmra.mrb[66].mxu0 %v7222_v53 }
 0x1b6   : > { %v1760_v0 = vmax.f32 %v1504_v28, 0.0  ;;  %v1138_v11 = vadd.f32 %v882_v14, %v480_v13  ;;  %v1154_v17 = vadd.f32 %v898_v2, %v496_v62  ;;  %v1169_v4 = vadd.f32 %v913_v45, %v511_v25  ;;  %2820 = vmatprep.mubr.f32.mxu0 %v9008_v56 }
 0x1b7   : > { %4868 = vmatprep.subr.bf16.mxu1 %v4867_v41  ;;  %v1185_v51 = vadd.f32 %v929_v60, %v527_v12  ;;  %v529_v48 = vmul.f32 %v7134_v36, %v9088_v15  ;;  %v915_v6 = vmul.f32 %v7154_v37, %v9089_v27  ;;  %v931_v24 = vmul.f32 %v7154_v37, %v9090_v19 }
 0x1b8   : > { %v4837_v33 = vpack.c.bf16 %v1760_v0, %v1744_v47  ;;  %v1490_v34 = vadd.f32 %v9084_v59, %v1138_v11  ;;  %v1506_v13 = vadd.f32 %v9085_v40, %v1154_v17  ;;  %v1521_v25 = vadd.f32 %v9043_v10, %v1169_v4  ;;  %2976 = vmatmul.mubr.f32.gmra.mrb[66].mxu1 %v7222_v53 }
 0x1b9   : > { %v1537_v62 = vadd.f32 %v9044_v18, %v1185_v51  ;;  %v1171_v12 = vadd.f32 %v915_v6, %v513_v38  ;;  %v1187_v28 = vadd.f32 %v931_v24, %v529_v48  ;;  %v510_v14 = vmul.f32 %v7160_v58, %v9087_v1  ;;  %2981 = vmatprep.mubr.f32.mxu1 %v9008_v56  ;;  %v7249_v38 = vld [vmem:[%s8595_s3 + $0x10] sm:$0xff] }
 0x1ba   : > { %4838 = vmatpush1.bf16.msra.mxu0 %v4837_v33  ;;  %v1746_v2 = vmax.f32 %v1490_v34, 0.0  ;;  %v1762_v45 = vmax.f32 %v1506_v13, 0.0  ;;  %v1777_v41 = vmax.f32 %v1521_v25, 0.0  ;;  %v526_v59 = vmul.f32 %v7160_v58, %v9088_v15 }
 0x1bb   : > { %v1793_v40 = vmax.f32 %v1537_v62, 0.0  ;;  %v1523_v47 = vadd.f32 %v9043_v10, %v1171_v12  ;;  %v1539_v60 = vadd.f32 %v9044_v18, %v1187_v28  ;;  %v912_v24 = vmul.f32 %v7168_v29, %v9089_v27  ;;  %2821 = vmatmul.mubr.f32.gmra.mrb[68].mxu0 %v7249_v38 }
 0x1bc   : > { %v4869_v34 = vpack.c.bf16 %v1762_v45, %v1746_v2  ;;  %v928_v33 = vmul.f32 %v7168_v29, %v9090_v19  ;;  %v512_v0 = vmul.f32 %v7172_v44, %v9087_v1  ;;  %v528_v11 = vmul.f32 %v7172_v44, %v9088_v15  ;;  %2982 = vmatmul.mubr.f32.gmra.mrb[68].mxu1 %v7249_v38  ;;  %v7278_v45 = vld [vmem:[%s8595_s3 + $0x18] sm:$0xff] }
 0x1bd   : > { %v4839_v17 = vpack.c.bf16 %v1793_v40, %v1777_v41  ;;  %v1779_v4 = vmax.f32 %v1523_v47, 0.0  ;;  %v1795_v51 = vmax.f32 %v1539_v60, 0.0  ;;  %v1168_v48 = vadd.f32 %v912_v24, %v510_v14  ;;  %2826 = vmatprep.mubr.f32.mxu0 %v9008_v56  ;;  %2987 = vmatprep.mubr.f32.mxu1 %v9008_v56 }
 0x1be   : > { %4870 = vmatpush1.bf16.msra.mxu1 %v4869_v34  ;;  %v1184_v6 = vadd.f32 %v928_v33, %v526_v59  ;;  %v914_v13 = vmul.f32 %v7199_v42, %v9089_v27  ;;  %v930_v1 = vmul.f32 %v7199_v42, %v9090_v19  ;;  %v543_v15 = vmul.f32 %v7125_v63, %v9046_v8 }
 0x1bf   : > { %4840 = vmatprep.subr.bf16.mxu0 %v4839_v17  ;;  %v4871_v25 = vpack.c.bf16 %v1795_v51, %v1779_v4  ;;  %v1520_v62 = vadd.f32 %v9043_v10, %v1168_v48  ;;  %v559_v12 = vmul.f32 %v7125_v63, %v9047_v7  ;;  %v945_v28 = vmul.f32 %v7129_v20, %v9048_v9 }
 0x1c0   : > { %v1536_v14 = vadd.f32 %v9044_v18, %v1184_v6  ;;  %v1170_v2 = vadd.f32 %v914_v13, %v512_v0  ;;  %v1186_v27 = vadd.f32 %v930_v1, %v528_v11  ;;  %v961_v19 = vmul.f32 %v7129_v20, %v9049_v23  ;;  %2827 = vmatmul.mubr.f32.gmra.mrb[70].mxu0 %v7278_v45  ;;  %v7301_v6 = vld [vmem:[%s8595_s3 + $0x20] sm:$0xff] }
 0x1c1   : > { %4872 = vmatprep.subr.bf16.mxu1 %v4871_v25  ;;  %v1776_v41 = vmax.f32 %v1520_v62, 0.0  ;;  %v1201_v59 = vadd.f32 %v945_v28, %v543_v15  ;;  %v545_v40 = vmul.f32 %v7134_v36, %v9046_v8  ;;  %v561_v47 = vmul.f32 %v7134_v36, %v9047_v7  ;;  %2988 = vmatmul.mubr.f32.gmra.mrb[70].mxu1 %v7278_v45 }
 0x1c2   : > { %v1792_v60 = vmax.f32 %v1536_v14, 0.0  ;;  %v1522_v24 = vadd.f32 %v9043_v10, %v1170_v2  ;;  %v1538_v34 = vadd.f32 %v9044_v18, %v1186_v27  ;;  %v1217_v33 = vadd.f32 %v961_v19, %v559_v12  ;;  %2832 = vmatprep.mubr.f32.mxu0 %v9008_v56  ;;  %2993 = vmatprep.mubr.f32.mxu1 %v9008_v56 }
 0x1c3   : > { %v1553_v0 = vadd.f32 %v9050_v30, %v1201_v59  ;;  %v947_v11 = vmul.f32 %v7154_v37, %v9048_v9  ;;  %v963_v17 = vmul.f32 %v7154_v37, %v9049_v23  ;;  %v542_v4 = vmul.f32 %v7160_v58, %v9046_v8 }
 0x1c4   : > { %v4841_v51 = vpack.c.bf16 %v1792_v60, %v1776_v41  ;;  %v1778_v10 = vmax.f32 %v1522_v24, 0.0  ;;  %v1794_v48 = vmax.f32 %v1538_v34, 0.0  ;;  %v1569_v18 = vadd.f32 %v9051_v46, %v1217_v33  ;;  %2833 = vmatmul.mubr.f32.gmra.mrb[72].mxu0 %v7301_v6 }
 0x1c5   : > { %v1809_v13 = vmax.f32 %v1553_v0, 0.0  ;;  %v1203_v1 = vadd.f32 %v947_v11, %v545_v40  ;;  %v1219_v15 = vadd.f32 %v963_v17, %v561_v47  ;;  %v558_v25 = vmul.f32 %v7160_v58, %v9047_v7  ;;  %2994 = vmatmul.mubr.f32.gmra.mrb[72].mxu1 %v7301_v6  ;;  %2838 = vmatprep.mubr.f32.mxu0 %v9008_v56 }
 0x1c6   : > { %4842 = vmatpush1.bf16.msra.mxu0 %v4841_v51  ;;  %v4873_v62 = vpack.c.bf16 %v1794_v48, %v1778_v10  ;;  %v1825_v12 = vmax.f32 %v1569_v18, 0.0  ;;  %v944_v28 = vmul.f32 %v7168_v29, %v9048_v9  ;;  %v960_v14 = vmul.f32 %v7168_v29, %v9049_v23  ;;  %2999 = vmatprep.mubr.f32.mxu1 %v9008_v56 }
 0x1c7   : > { %v1555_v2 = vadd.f32 %v9050_v30, %v1203_v1  ;;  %v1571_v27 = vadd.f32 %v9051_v46, %v1219_v15  ;;  %v544_v19 = vmul.f32 %v7172_v44, %v9046_v8  ;;  %v560_v41 = vmul.f32 %v7172_v44, %v9047_v7  ;;  %v7328_v8 = vld [vmem:[%s8595_s3 + $0x28] sm:$0xff] }
 0x1c8   : > { %4874 = vmatpush1.bf16.msra.mxu1 %v4873_v62  ;;  %v4843_v59 = vpack.c.bf16 %v1825_v12, %v1809_v13  ;;  %v1200_v40 = vadd.f32 %v944_v28, %v542_v4  ;;  %v1216_v47 = vadd.f32 %v960_v14, %v558_v25  ;;  %v946_v60 = vmul.f32 %v7199_v42, %v9048_v9 }
 0x1c9   : > { %v1811_v24 = vmax.f32 %v1555_v2, 0.0  ;;  %v1827_v34 = vmax.f32 %v1571_v27, 0.0  ;;  %v962_v33 = vmul.f32 %v7199_v42, %v9049_v23  ;;  %v575_v0 = vmul.f32 %v7125_v63, %v5807_v5  ;;  %2839 = vmatmul.mubr.f32.gmra.mrb[74].mxu0 %v7328_v8  ;;  %3000 = vmatmul.mubr.f32.gmra.mrb[74].mxu1 %v7328_v8  ;;  %v7355_v27 = vld [vmem:[%s8595_s3 + $0x30] sm:$0xff] }
 0x1ca   : > { %4844 = vmatprep.subr.bf16.mxu0 %v4843_v59  ;;  %v1552_v7 = vadd.f32 %v9050_v30, %v1200_v40  ;;  %v1568_v9 = vadd.f32 %v9051_v46, %v1216_v47  ;;  %v1202_v11 = vadd.f32 %v946_v60, %v544_v19  ;;  %v591_v23 = vmul.f32 %v7125_v63, %v8972_v50 }
 0x1cb   : > { %v4875_v17 = vpack.c.bf16 %v1827_v34, %v1811_v24  ;;  %v1218_v4 = vadd.f32 %v962_v33, %v560_v41  ;;  %v977_v51 = vmul.f32 %v7129_v20, %v9052_v49  ;;  %v993_v10 = vmul.f32 %v7129_v20, %v8973_v52  ;;  %2844 = vmatprep.mubr.f32.mxu0 %v9008_v56 }
 0x1cc   : > { %v1808_v48 = vmax.f32 %v1552_v7, 0.0  ;;  %v1824_v18 = vmax.f32 %v1568_v9, 0.0  ;;  %v1554_v13 = vadd.f32 %v9050_v30, %v1202_v11  ;;  %v577_v1 = vmul.f32 %v7134_v36, %v5807_v5  ;;  %3005 = vmatprep.mubr.f32.mxu1 %v9008_v56 }
 0x1cd   : > { %4876 = vmatprep.subr.bf16.mxu1 %v4875_v17  ;;  %v1570_v15 = vadd.f32 %v9051_v46, %v1218_v4  ;;  %v1233_v25 = vadd.f32 %v977_v51, %v575_v0  ;;  %v1249_v62 = vadd.f32 %v993_v10, %v591_v23  ;;  %v593_v12 = vmul.f32 %v7134_v36, %v8972_v50  ;;  %v7378_v4 = vld [vmem:[%s8595_s3 + $0x38] sm:$0xff] }
 0x1ce   : > { %v4845_v28 = vpack.c.bf16 %v1824_v18, %v1808_v48  ;;  %v1810_v14 = vmax.f32 %v1554_v13, 0.0  ;;  %v979_v2 = vmul.f32 %v7154_v37, %v9052_v49  ;;  %v995_v30 = vmul.f32 %v7154_v37, %v8973_v52  ;;  %2845 = vmatmul.mubr.f32.gmra.mrb[76].mxu0 %v7355_v27  ;;  %3006 = vmatmul.mubr.f32.gmra.mrb[76].mxu1 %v7355_v27 }
 0x1cf   : > { %v1826_v46 = vmax.f32 %v1570_v15, 0.0  ;;  %v1585_v19 = vadd.f32 %v6009_v22, %v1233_v25  ;;  %v1601_v41 = vadd.f32 %v8980_v43, %v1249_v62  ;;  %v574_v59 = vmul.f32 %v7160_v58, %v5807_v5  ;;  %2850 = vmatprep.mubr.f32.mxu0 %v9008_v56  ;;  %3011 = vmatprep.mubr.f32.mxu1 %v9008_v56 }
 0x1d0   : > { %4846 = vmatpush1.bf16.msra.mxu0 %v4845_v28  ;;  %v1235_v40 = vadd.f32 %v979_v2, %v577_v1  ;;  %v1251_v47 = vadd.f32 %v995_v30, %v593_v12  ;;  %v590_v60 = vmul.f32 %v7160_v58, %v8972_v50  ;;  %v976_v24 = vmul.f32 %v7168_v29, %v9052_v49  ;;  %v7401_v2 = vld [vmem:[%s8595_s3 + $0x40] sm:$0xff] }
 0x1d1   : > { %v4877_v34 = vpack.c.bf16 %v1826_v46, %v1810_v14  ;;  %v1841_v33 = vmax.f32 %v1585_v19, 0.0  ;;  %v1857_v0 = vmax.f32 %v1601_v41, 0.0  ;;  %v992_v7 = vmul.f32 %v7168_v29, %v8973_v52 }
 0x1d2   : > { %v1587_v9 = vadd.f32 %v6009_v22, %v1235_v40  ;;  %v1603_v11 = vadd.f32 %v8980_v43, %v1251_v47  ;;  %v1232_v23 = vadd.f32 %v976_v24, %v574_v59  ;;  %v576_v17 = vmul.f32 %v7172_v44, %v5807_v5  ;;  %2851 = vmatmul.mubr.f32.gmra.mrb[78].mxu0 %v7378_v4 }
 0x1d3   : > { %4878 = vmatpush1.bf16.msra.mxu1 %v4877_v34  ;;  %v4847_v51 = vpack.c.bf16 %v1857_v0, %v1841_v33  ;;  %v1248_v10 = vadd.f32 %v992_v7, %v590_v60  ;;  %v592_v48 = vmul.f32 %v7172_v44, %v8972_v50  ;;  %v978_v18 = vmul.f32 %v7199_v42, %v9052_v49 }
 0x1d4   : > { %v1843_v13 = vmax.f32 %v1587_v9, 0.0  ;;  %v1859_v1 = vmax.f32 %v1603_v11, 0.0  ;;  %v1584_v5 = vadd.f32 %v6009_v22, %v1232_v23  ;;  %v994_v15 = vmul.f32 %v7199_v42, %v8973_v52  ;;  %3012 = vmatmul.mubr.f32.gmra.mrb[78].mxu1 %v7378_v4  ;;  %2856 = vmatprep.mubr.f32.mxu0 %v9008_v56  ;;  %v7425_v11 = vld [vmem:[%s8595_s3 + $0x48] sm:$0xff] }
 0x1d5   : > { %4848 = vmatprep.subr.bf16.mxu0 %v4847_v51  ;;  %v1600_v25 = vadd.f32 %v8980_v43, %v1248_v10  ;;  %v1234_v62 = vadd.f32 %v978_v18, %v576_v17  ;;  %v607_v50 = vmul.f32 %v7125_v63, %v8987_v21  ;;  %v623_v49 = vmul.f32 %v7125_v63, %v8992_v54  ;;  %v7435_v18 = vpop.permute.xlu1 %2027 }
 0x1d6   : > { %v4879_v12 = vpack.c.bf16 %v1859_v1, %v1843_v13  ;;  %v1840_v28 = vmax.f32 %v1584_v5, 0.0  ;;  %v1250_v14 = vadd.f32 %v994_v15, %v592_v48  ;;  %v1009_v52 = vmul.f32 %v7129_v20, %v9053_v31  ;;  %3017 = vmatprep.mubr.f32.mxu1 %v9008_v56  ;;  %2857 = vmatmul.mubr.f32.gmra.mrb[80].mxu0 %v7401_v2  ;;  %v7433_v48 = vpop.permute.xlu0 %2022 }
 0x1d7   : > { %v1856_v30 = vmax.f32 %v1600_v25, 0.0  ;;  %v1586_v46 = vadd.f32 %v6009_v22, %v1234_v62  ;;  %v1025_v19 = vmul.f32 %v7129_v20, %v5980_v26  ;;  %v609_v41 = vmul.f32 %v7134_v36, %v8987_v21  ;;  %2862 = vmatprep.mubr.f32.mxu0 %v9008_v56  ;;  %9091 = vst [vmem:[#allocation84_spill] sm:$0xff] %v7433_v48 }
 0x1d8   : > { %4880 = vmatprep.subr.bf16.mxu1 %v4879_v12  ;;  %v1602_v59 = vadd.f32 %v8980_v43, %v1250_v14  ;;  %v1265_v40 = vadd.f32 %v1009_v52, %v607_v50  ;;  %v625_v47 = vmul.f32 %v7134_v36, %v8992_v54  ;;  %v1011_v60 = vmul.f32 %v7154_v37, %v9053_v31 }
 0x1d9   : > { %v4849_v24 = vpack.c.bf16 %v1856_v30, %v1840_v28  ;;  %v1842_v22 = vmax.f32 %v1586_v46, 0.0  ;;  %v1281_v34 = vadd.f32 %v1025_v19, %v623_v49  ;;  %v1027_v33 = vmul.f32 %v7154_v37, %v5980_v26  ;;  %3018 = vmatmul.mubr.f32.gmra.mrb[80].mxu1 %v7401_v2  ;;  %9092 = vst [vmem:[#allocation85_spill] sm:$0xff] %v7435_v18 }
 0x1da   : > { %v1858_v0 = vmax.f32 %v1602_v59, 0.0  ;;  %v1617_v7 = vadd.f32 %v6117_v39, %v1265_v40  ;;  %v1267_v9 = vadd.f32 %v1011_v60, %v609_v41  ;;  %v606_v43 = vmul.f32 %v7160_v58, %v8987_v21  ;;  %3023 = vmatprep.mubr.f32.mxu1 %v9008_v56  ;;  %2863 = vmatmul.mubr.f32.gmra.mrb[82].mxu0 %v7425_v11  ;;  %v7456_v41 = vld [vmem:[%s8595_s3 + $0x50] sm:$0xff] }
 0x1db   : > { %4850 = vmatpush1.bf16.msra.mxu0 %v4849_v24  ;;  %v1633_v23 = vadd.f32 %v8995_v32, %v1281_v34  ;;  %v1283_v17 = vadd.f32 %v1027_v33, %v625_v47  ;;  %v622_v51 = vmul.f32 %v7160_v58, %v8992_v54  ;;  %v1008_v10 = vmul.f32 %v7168_v29, %v9053_v31  ;;  %v7470_v34 = vpop.permute.xlu1 %2037 }
 0x1dc   : > { %v4881_v13 = vpack.c.bf16 %v1858_v0, %v1842_v22  ;;  %v1873_v1 = vmax.f32 %v1617_v7, 0.0  ;;  %v1619_v5 = vadd.f32 %v6117_v39, %v1267_v9  ;;  %v1024_v15 = vmul.f32 %v7168_v29, %v5980_v26  ;;  %2868 = vmatprep.mubr.f32.mxu0 %v9008_v56  ;;  %v7468_v22 = vpop.permute.xlu0 %2032 }
 0x1dd   : > { %v1889_v25 = vmax.f32 %v1633_v23, 0.0  ;;  %v1635_v62 = vadd.f32 %v8995_v32, %v1283_v17  ;;  %v1264_v50 = vadd.f32 %v1008_v10, %v606_v43  ;;  %v608_v49 = vmul.f32 %v7172_v44, %v8987_v21  ;;  %3024 = vmatmul.mubr.f32.gmra.mrb[82].mxu1 %v7425_v11 }
 0x1de   : > { %4882 = vmatpush1.bf16.msra.mxu1 %v4881_v13  ;;  %v1875_v12 = vmax.f32 %v1619_v5, 0.0  ;;  %v1280_v28 = vadd.f32 %v1024_v15, %v622_v51  ;;  %v624_v14 = vmul.f32 %v7172_v44, %v8992_v54  ;;  %v1010_v52 = vmul.f32 %v7199_v42, %v9053_v31  ;;  %3029 = vmatprep.mubr.f32.mxu1 %v9008_v56  ;;  %v7488_v5 = vld [vmem:[%s8595_s3 + $0x58] sm:$0xff] }
 0x1df   : > { %v4851_v30 = vpack.c.bf16 %v1889_v25, %v1873_v1  ;;  %v1891_v46 = vmax.f32 %v1635_v62, 0.0  ;;  %v1616_v19 = vadd.f32 %v6117_v39, %v1264_v50  ;;  %v1026_v21 = vmul.f32 %v7199_v42, %v5980_v26  ;;  %2869 = vmatmul.mubr.f32.gmra.mrb[84].mxu0 %v7456_v41 }
 0x1e0   : > { %v1632_v54 = vadd.f32 %v8995_v32, %v1280_v28  ;;  %v1266_v59 = vadd.f32 %v1010_v52, %v608_v49  ;;  %v639_v31 = vmul.f32 %v7125_v63, %v9003_v16  ;;  %v655_v40 = vmul.f32 %v7125_v63, %v9004_v35  ;;  %2874 = vmatprep.mubr.f32.mxu0 %v9008_v56 }
 0x1e1   : > { %4852 = vmatprep.subr.bf16.mxu0 %v4851_v30  ;;  %v4883_v26 = vpack.c.bf16 %v1891_v46, %v1875_v12  ;;  %v1872_v47 = vmax.f32 %v1616_v19, 0.0  ;;  %v1282_v60 = vadd.f32 %v1026_v21, %v624_v14  ;;  %v1041_v24 = vmul.f32 %v7129_v20, %v9007_v57  ;;  %3030 = vmatmul.mubr.f32.gmra.mrb[84].mxu1 %v7456_v41  ;;  %v7505_v19 = vpop.permute.xlu0 %3662  ;;  %v7507_v21 = vpop.permute.xlu1 %3667 }
 0x1e2   : > { %v1888_v33 = vmax.f32 %v1632_v54, 0.0  ;;  %v1618_v0 = vadd.f32 %v6117_v39, %v1266_v59  ;;  %v1057_v7 = vmul.f32 %v7129_v20, %v9009_v55  ;;  %v641_v9 = vmul.f32 %v7134_v36, %v9003_v16  ;;  %3035 = vmatprep.mubr.f32.mxu1 %v9008_v56  ;;  %9093 = vst [vmem:[#allocation79_spill] sm:$0xff] %v7505_v19 }
 0x1e3   : > { %4884 = vmatprep.subr.bf16.mxu1 %v4883_v26  ;;  %v1634_v43 = vadd.f32 %v8995_v32, %v1282_v60  ;;  %v1297_v23 = vadd.f32 %v1041_v24, %v639_v31  ;;  %v657_v17 = vmul.f32 %v7134_v36, %v9004_v35  ;;  %v1043_v51 = vmul.f32 %v7154_v37, %v9007_v57  ;;  %v7515_v26 = vld [vmem:[%s8595_s3 + $0x60] sm:$0xff] }
 0x1e4   : > { %v4853_v10 = vpack.c.bf16 %v1888_v33, %v1872_v47  ;;  %v1874_v39 = vmax.f32 %v1618_v0, 0.0  ;;  %v1313_v13 = vadd.f32 %v1057_v7, %v655_v40  ;;  %v1059_v1 = vmul.f32 %v7154_v37, %v9009_v55  ;;  %2875 = vmatmul.mubr.f32.gmra.mrb[86].mxu0 %v7488_v5 }
 0x1e5   : > { %v1890_v32 = vmax.f32 %v1634_v43, 0.0  ;;  %v1649_v15 = vadd.f32 %v6234_v61, %v1297_v23  ;;  %v1299_v25 = vadd.f32 %v1043_v51, %v641_v9  ;;  %v638_v62 = vmul.f32 %v7160_v58, %v9003_v16  ;;  %3036 = vmatmul.mubr.f32.gmra.mrb[86].mxu1 %v7488_v5  ;;  %2880 = vmatprep.mubr.f32.mxu0 %v9008_v56  ;;  %v9095_v51 = vld [vmem:[#allocation34_spill] sm:$0xff] }
 0x1e6   : > { %4854 = vmatpush1.bf16.msra.mxu0 %v4853_v10  ;;  %v1665_v50 = vadd.f32 %v9055_v3, %v1313_v13  ;;  %v1315_v49 = vadd.f32 %v1059_v1, %v657_v17  ;;  %v654_v12 = vmul.f32 %v7160_v58, %v9004_v35  ;;  %v1040_v28 = vmul.f32 %v7168_v29, %v9007_v57  ;;  %v9094_v17 = vld [vmem:[#allocation33_spill] sm:$0xff] }
 0x1e7   : > { %v4885_v14 = vpack.c.bf16 %v1890_v32, %v1874_v39  ;;  %v1905_v52 = vmax.f32 %v1649_v15, 0.0  ;;  %v1651_v30 = vadd.f32 %v6234_v61, %v1299_v25  ;;  %v1056_v46 = vmul.f32 %v7168_v29, %v9009_v55  ;;  %3041 = vmatprep.mubr.f32.mxu1 %v9008_v56  ;;  %v9096_v1 = vld [vmem:[#allocation49_spill] sm:$0xff]  ;;  %v7538_v32 = vld [vmem:[%s8595_s3 + $0x68] sm:$0xff] }
 0x1e8   : > { %v1921_v54 = vmax.f32 %v1665_v50, 0.0  ;;  %v1667_v59 = vadd.f32 %v9055_v3, %v1315_v49  ;;  %v1296_v31 = vadd.f32 %v1040_v28, %v638_v62  ;;  %v640_v40 = vmul.f32 %v7172_v44, %v9003_v16  ;;  %2881 = vmatmul.mubr.f32.gmra.mrb[88].mxu0 %v7515_v26  ;;  %v9097_v62 = vld [vmem:[#allocation59_spill] sm:$0xff]  ;;  %v7549_v28 = vpop.permute.xlu1 %3672 }
 0x1e9   : > { %4886 = vmatpush1.bf16.msra.mxu1 %v4885_v14  ;;  %v1907_v47 = vmax.f32 %v1651_v30, 0.0  ;;  %v1312_v60 = vadd.f32 %v1056_v46, %v654_v12  ;;  %v656_v24 = vmul.f32 %v7172_v44, %v9004_v35  ;;  %v1042_v33 = vmul.f32 %v7199_v42, %v9007_v57  ;;  %2886 = vmatprep.mubr.f32.mxu0 %v9008_v56  ;;  %v7547_v12 = vpop.permute.xlu0 %2042 }
 0x1ea   : > { %v4855_v0 = vpack.c.bf16 %v1921_v54, %v1905_v52  ;;  %v1923_v16 = vmax.f32 %v1667_v59, 0.0  ;;  %v1648_v7 = vadd.f32 %v6234_v61, %v1296_v31  ;;  %v1058_v9 = vmul.f32 %v7199_v42, %v9009_v55  ;;  %3042 = vmatmul.mubr.f32.gmra.mrb[88].mxu1 %v7515_v26 }
 0x1eb   : > { %v1664_v43 = vadd.f32 %v9055_v3, %v1312_v60  ;;  %v1298_v23 = vadd.f32 %v1042_v33, %v640_v40  ;;  %v671_v35 = vmul.f32 %v7125_v63, %v9094_v17  ;;  %v687_v57 = vmul.f32 %v7125_v63, %v9095_v51  ;;  %3047 = vmatprep.mubr.f32.mxu1 %v9008_v56  ;;  %v7566_v33 = vld [vmem:[%s8595_s3 + $0x70] sm:$0xff] }
 0x1ec   : > { %4856 = vmatprep.subr.bf16.mxu0 %v4855_v0  ;;  %v4887_v10 = vpack.c.bf16 %v1923_v16, %v1907_v47  ;;  %v1904_v39 = vmax.f32 %v1648_v7, 0.0  ;;  %v1314_v13 = vadd.f32 %v1058_v9, %v656_v24  ;;  %v1073_v55 = vmul.f32 %v7129_v20, %v9096_v1  ;;  %2887 = vmatmul.mubr.f32.gmra.mrb[90].mxu0 %v7538_v32  ;;  %v9098_v47 = vld [vmem:[#allocation47_spill] sm:$0xff]  ;;  %v9099_v0 = vld [vmem:[#allocation60_spill] sm:$0xff] }
 0x1ed   : > { %v1920_v15 = vmax.f32 %v1664_v43, 0.0  ;;  %v1650_v25 = vadd.f32 %v6234_v61, %v1298_v23  ;;  %v1089_v50 = vmul.f32 %v7129_v20, %v9097_v62  ;;  %v673_v49 = vmul.f32 %v7134_v36, %v9094_v17  ;;  %2892 = vmatprep.mubr.f32.mxu0 %v9008_v56 }
 0x1ee   : > { %4888 = vmatprep.subr.bf16.mxu1 %v4887_v10  ;;  %v1666_v14 = vadd.f32 %v9055_v3, %v1314_v13  ;;  %v1329_v52 = vadd.f32 %v1073_v55, %v671_v35  ;;  %v689_v30 = vmul.f32 %v7134_v36, %v9095_v51  ;;  %v1075_v61 = vmul.f32 %v7154_v37, %v9096_v1 }
 0x1ef   : > { %v4857_v46 = vpack.c.bf16 %v1920_v15, %v1904_v39  ;;  %v1906_v54 = vmax.f32 %v1650_v25, 0.0  ;;  %v1345_v59 = vadd.f32 %v1089_v50, %v687_v57  ;;  %v1091_v31 = vmul.f32 %v7154_v37, %v9097_v62  ;;  %3048 = vmatmul.mubr.f32.gmra.mrb[90].mxu1 %v7538_v32  ;;  %v7582_v25 = vpop.permute.xlu0 %2047  ;;  %v7584_v50 = vpop.permute.xlu1 %3677 }
 0x1f0   : > { %v1922_v40 = vmax.f32 %v1666_v14, 0.0  ;;  %v1681_v60 = vadd.f32 %v9098_v47, %v1329_v52  ;;  %v1331_v24 = vadd.f32 %v1075_v61, %v673_v49  ;;  %v670_v3 = vmul.f32 %v7160_v58, %v9094_v17  ;;  %3053 = vmatprep.mubr.f32.mxu1 %v9008_v56  ;;  %2893 = vmatmul.mubr.f32.gmra.mrb[92].mxu0 %v7566_v33 }
 0x1f1   : > { %4858 = vmatpush1.bf16.msra.mxu0 %v4857_v46  ;;  %v1697_v16 = vadd.f32 %v9099_v0, %v1345_v59  ;;  %v1347_v7 = vadd.f32 %v1091_v31, %v689_v30  ;;  %v686_v9 = vmul.f32 %v7160_v58, %v9095_v51  ;;  %v1072_v43 = vmul.f32 %v7168_v29, %v9096_v1  ;;  %v7597_v59 = vld [vmem:[%s8595_s3 + $0x78] sm:$0xff] }
 0x1f2   : > { %v4889_v23 = vpack.c.bf16 %v1922_v40, %v1906_v54  ;;  %v1937_v35 = vmax.f32 %v1681_v60, 0.0  ;;  %v1683_v57 = vadd.f32 %v9098_v47, %v1331_v24  ;;  %v1088_v10 = vmul.f32 %v7168_v29, %v9097_v62  ;;  %2898 = vmatprep.mubr.f32.mxu0 %v9008_v56  ;;  %v9101_v60 = vld [vmem:[#allocation46_spill] sm:$0xff] }
 0x1f3   : > { %v1953_v39 = vmax.f32 %v1697_v16, 0.0  ;;  %v1699_v13 = vadd.f32 %v9099_v0, %v1347_v7  ;;  %v1328_v55 = vadd.f32 %v1072_v43, %v670_v3  ;;  %v672_v15 = vmul.f32 %v7172_v44, %v9094_v17  ;;  %3054 = vmatmul.mubr.f32.gmra.mrb[92].mxu1 %v7566_v33  ;;  %v9102_v7 = vld [vmem:[#allocation63_spill] sm:$0xff] }
 0x1f4   : > { %4890 = vmatpush1.bf16.msra.mxu1 %v4889_v23  ;;  %v1939_v49 = vmax.f32 %v1683_v57, 0.0  ;;  %v1344_v14 = vadd.f32 %v1088_v10, %v686_v9  ;;  %v688_v52 = vmul.f32 %v7172_v44, %v9095_v51  ;;  %v1074_v30 = vmul.f32 %v7199_v42, %v9096_v1  ;;  %3059 = vmatprep.mubr.f32.mxu1 %v9008_v56  ;;  %v9100_v1 = vld [vmem:[#allocation25_spill] sm:$0xff] }
 0x1f5   : > { %v4859_v61 = vpack.c.bf16 %v1953_v39, %v1937_v35  ;;  %v1955_v46 = vmax.f32 %v1699_v13, 0.0  ;;  %v1680_v17 = vadd.f32 %v9098_v47, %v1328_v55  ;;  %v1090_v54 = vmul.f32 %v7199_v42, %v9097_v62  ;;  %2899 = vmatmul.mubr.f32.gmra.mrb[94].mxu0 %v7597_v59  ;;  %v9103_v35 = vld [vmem:[#allocation61_spill] sm:$0xff] }
 0x1f6   : > { %v1696_v51 = vadd.f32 %v9099_v0, %v1344_v14  ;;  %v1330_v31 = vadd.f32 %v1074_v30, %v672_v15  ;;  %v703_v40 = vmul.f32 %v7125_v63, %v9100_v1  ;;  %v719_v24 = vmul.f32 %v7125_v63, %v9101_v60  ;;  %3130 = vmatprep.mubr.f32.mxu0 %v9008_v56  ;;  %v7620_v15 = vpop.permute.xlu0 %2052 }
 0x1f7   : > { %4860 = vmatprep.subr.bf16.mxu0 %v4859_v61  ;;  %v4891_v62 = vpack.c.bf16 %v1955_v46, %v1939_v49  ;;  %v1936_v3 = vmax.f32 %v1680_v17, 0.0  ;;  %v1346_v16 = vadd.f32 %v1090_v54, %v688_v52  ;;  %v1105_v9 = vmul.f32 %v7129_v20, %v9102_v7  ;;  %3060 = vmatmul.mubr.f32.gmra.mrb[94].mxu1 %v7597_v59  ;;  %v9104_v61 = vld [vmem:[#allocation26_spill] sm:$0xff] }
 0x1f8   : > { %v1952_v43 = vmax.f32 %v1696_v51, 0.0  ;;  %v1682_v23 = vadd.f32 %v9098_v47, %v1330_v31  ;;  %v1121_v57 = vmul.f32 %v7129_v20, %v9103_v35  ;;  %v705_v63 = vmul.f32 %v7134_v36, %v9100_v1  ;;  %3291 = vmatprep.mubr.f32.mxu1 %v9008_v56  ;;  %v7622_v47 = vpop.permute.xlu1 %3682  ;;  %v9105_v51 = vld [vmem:[#allocation28_spill] sm:$0xff] }
 0x1f9   : > { %4892 = vmatprep.subr.bf16.mxu1 %v4891_v62  ;;  %v1698_v10 = vadd.f32 %v9099_v0, %v1346_v16  ;;  %v1361_v39 = vadd.f32 %v1105_v9, %v703_v40  ;;  %v721_v13 = vmul.f32 %v7134_v36, %v9101_v60  ;;  %v1107_v55 = vmul.f32 %v7154_v37, %v9102_v7  ;;  %v2166_v17 = vpop.f32.mrb[0].mxu0 }
 0x1fa   : > { %v4861_v20 = vpack.c.bf16 %v1952_v43, %v1936_v3  ;;  %v1938_v49 = vmax.f32 %v1682_v23, 0.0  ;;  %v1377_v14 = vadd.f32 %v1121_v57, %v719_v24  ;;  %v1123_v52 = vmul.f32 %v7154_v37, %v9103_v35  ;;  %v2327_v54 = vpop.f32.mrb[0].mxu1  ;;  %v2168_v37 = vpop.f32.mrb[1].mxu0 }
 0x1fb   : > { %v1954_v30 = vmax.f32 %v1698_v10, 0.0  ;;  %v1713_v0 = vadd.f32 %v9104_v61, %v1361_v39  ;;  %v1363_v46 = vadd.f32 %v1107_v55, %v705_v63  ;;  %v702_v36 = vmul.f32 %v7160_v58, %v9100_v1  ;;  %v2329_v3 = vpop.f32.mrb[1].mxu1 }
 0x1fc   : > { %4862 = vmatpush1.bf16.msra.mxu0 %v4861_v20  ;;  %v1729_v31 = vadd.f32 %v9105_v51, %v1377_v14  ;;  %v1379_v40 = vadd.f32 %v1123_v52, %v721_v13  ;;  %v718_v62 = vmul.f32 %v7160_v58, %v9101_v60  ;;  %v1104_v24 = vmul.f32 %v7168_v29, %v9102_v7 }
 0x1fd   : > { %v4893_v16 = vpack.c.bf16 %v1954_v30, %v1938_v49  ;;  %v1969_v9 = vmax.f32 %v1713_v0, 0.0  ;;  %v1715_v43 = vadd.f32 %v9104_v61, %v1363_v46  ;;  %v1120_v23 = vmul.f32 %v7168_v29, %v9103_v35 }
 0x1fe   : > { %v1985_v57 = vmax.f32 %v1729_v31, 0.0  ;;  %v1731_v63 = vadd.f32 %v9105_v51, %v1379_v40  ;;  %v1360_v10 = vadd.f32 %v1104_v24, %v702_v36  ;;  %v704_v39 = vmul.f32 %v7172_v44, %v9100_v1  ;;  %v2172_v49 = vpop.f32.mrb[2].mxu0  ;;  %v2333_v14 = vpop.f32.mrb[2].mxu1 }
 0x1ff   : > { %4894 = vmatpush1.bf16.msra.mxu1 %v4893_v16  ;;  %v1971_v58 = vmax.f32 %v1715_v43, 0.0  ;;  %v1376_v13 = vadd.f32 %v1120_v23, %v718_v62  ;;  %v720_v55 = vmul.f32 %v7172_v44, %v9101_v60  ;;  %v1106_v20 = vmul.f32 %v7199_v42, %v9102_v7  ;;  %v2174_v46 = vpop.f32.mrb[3].mxu0  ;;  %v2335_v1 = vpop.f32.mrb[3].mxu1 }
 0x200   : > { %v4863_v52 = vpack.c.bf16 %v1985_v57, %v1969_v9  ;;  %v1987_v29 = vmax.f32 %v1731_v63, 0.0  ;;  %v1712_v30 = vadd.f32 %v9104_v61, %v1360_v10  ;;  %v1122_v0 = vmul.f32 %v7199_v42, %v9103_v35  ;;  %v7650_v60 = vpop.permute.xlu0 %2057  ;;  %v7652_v7 = vpop.permute.xlu1 %3687 }
 0x201   : > { %v1728_v36 = vadd.f32 %v9105_v51, %v1376_v13  ;;  %v1362_v31 = vadd.f32 %v1106_v20, %v704_v39  ;;  %v2167_v40 = vadd.f32 %v2166_v17, %v7433_v48  ;;  %v2328_v44 = vadd.f32 %v2327_v54, %v7433_v48 }
 0x202   : > { %4864 = vmatprep.subr.bf16.mxu0 %v4863_v52  ;;  %v4895_v62 = vpack.c.bf16 %v1987_v29, %v1971_v58  ;;  %v1968_v24 = vmax.f32 %v1712_v30, 0.0  ;;  %v1378_v16 = vadd.f32 %v1122_v0, %v720_v55  ;;  %v2169_v9 = vadd.f32 %v2168_v37, %v7433_v48  ;;  %v2178_v57 = vpop.f32.mrb[4].mxu0  ;;  %v2339_v63 = vpop.f32.mrb[4].mxu1 }
 0x203   : > { %v1984_v42 = vmax.f32 %v1728_v36, 0.0  ;;  %v1714_v35 = vadd.f32 %v9104_v61, %v1362_v31  ;;  %v3388_v43 = vmax.f32 %v2167_v40, 0.0  ;;  %v3390_v23 = vmax.f32 %v2328_v44, 0.0  ;;  %v2180_v58 = vpop.f32.mrb[5].mxu0  ;;  %v2341_v13 = vpop.f32.mrb[5].mxu1 }
 0x204   : > { %4896 = vmatprep.subr.bf16.mxu1 %v4895_v62  ;;  %v1730_v17 = vadd.f32 %v9105_v51, %v1378_v16  ;;  %v3389_v54 = vmax.f32 %v2169_v9, 0.0  ;;  %v2330_v10 = vadd.f32 %v2329_v3, %v7433_v48  ;;  %v2173_v39 = vadd.f32 %v2172_v49, %v7435_v18 }
 0x205   : > { %v4865_v55 = vpack.c.bf16 %v1984_v42, %v1968_v24  ;;  %v1970_v20 = vmax.f32 %v1714_v35, 0.0  ;;  %v3740_v37 = vmul.f32 %v7505_v19, %v3388_v43  ;;  %v3742_v61 = vmul.f32 %v7505_v19, %v3390_v23 }
 0x206   : > { %v1986_v52 = vmax.f32 %v1730_v17, 0.0  ;;  %v3741_v29 = vmul.f32 %v7505_v19, %v3389_v54  ;;  %v3391_v30 = vmax.f32 %v2330_v10, 0.0  ;;  %v3404_v0 = vmax.f32 %v2173_v39, 0.0  ;;  %v2184_v31 = vpop.f32.mrb[6].mxu0  ;;  %v2345_v40 = vpop.f32.mrb[6].mxu1 }
 0x207   : > { %4866 = vmatpush1.bf16.msra.mxu0 %v4865_v55  ;;  %v2334_v51 = vadd.f32 %v2333_v14, %v7435_v18  ;;  %v2175_v3 = vadd.f32 %v2174_v46, %v7435_v18  ;;  %v2336_v49 = vadd.f32 %v2335_v1, %v7435_v18  ;;  %v2179_v36 = vadd.f32 %v2178_v57, %v7468_v22  ;;  %v2186_v9 = vpop.f32.mrb[7].mxu0  ;;  %v2347_v42 = vpop.f32.mrb[7].mxu1  ;;  %v9106_v57 = vld [vmem:[#allocation70_spill] sm:$0xff] }
 0x208   : > { %v4897_v44 = vpack.c.bf16 %v1986_v52, %v1970_v20  ;;  %v3743_v62 = vmul.f32 %v7505_v19, %v3391_v30  ;;  %v3756_v24 = vmul.f32 %v7507_v21, %v3404_v0  ;;  %v2340_v16 = vadd.f32 %v2339_v63, %v7468_v22  ;;  %v7669_v46 = vpop.permute.xlu0 %2062  ;;  %v7671_v1 = vpop.permute.xlu1 %3692 }
 0x209   : > { %v3406_v35 = vmax.f32 %v2334_v51, 0.0  ;;  %v3405_v43 = vmax.f32 %v2175_v3, 0.0  ;;  %v3407_v14 = vmax.f32 %v2336_v49, 0.0  ;;  %v3420_v23 = vmax.f32 %v2179_v36, 0.0 }
 0x20a   : > { %4898 = vmatpush1.bf16.msra.mxu1 %v4897_v44  ;;  %3131 = vmatmul.mubr.f32.vlgmr.msra.gmra.mrb[96].mxu0 %v9106_v57  ;;  %v3996_v17 = vadd.f32 %v3756_v24, %v3740_v37  ;;  %v3422_v54 = vmax.f32 %v2340_v16, 0.0  ;;  %v2181_v10 = vadd.f32 %v2180_v58, %v7468_v22  ;;  %v2342_v39 = vadd.f32 %v2341_v13, %v7468_v22  ;;  %v2190_v30 = vpop.f32.mrb[8].mxu0  ;;  %v2351_v0 = vpop.f32.mrb[8].mxu1 }
 0x20b   : > { %3136 = vmatprep.mubr.f32.mxu0 %v9008_v56  ;;  %v3758_v63 = vmul.f32 %v7507_v21, %v3406_v35  ;;  %v3757_v55 = vmul.f32 %v7507_v21, %v3405_v43  ;;  %v3759_v20 = vmul.f32 %v7507_v21, %v3407_v14  ;;  %v3772_v52 = vmul.f32 %v7549_v28, %v3420_v23  ;;  %v2192_v49 = vpop.f32.mrb[9].mxu0  ;;  %v2353_v13 = vpop.f32.mrb[9].mxu1 }
 0x20c   : > { %v3774_v51 = vmul.f32 %v7549_v28, %v3422_v54  ;;  %v3421_v37 = vmax.f32 %v2181_v10, 0.0  ;;  %v3423_v3 = vmax.f32 %v2342_v39, 0.0  ;;  %v2185_v58 = vadd.f32 %v2184_v31, %v7470_v34 }
 0x20d   : > { %3292 = vmatmul.mubr.f32.vlgmr.msra.gmra.mrb[96].mxu1 %v9106_v57  ;;  %v4038_v36 = vadd.f32 %v3758_v63, %v3742_v61  ;;  %v4017_v44 = vadd.f32 %v3757_v55, %v3741_v29  ;;  %v4059_v24 = vadd.f32 %v3759_v20, %v3743_v62  ;;  %v3997_v16 = vadd.f32 %v3996_v17, %v3772_v52  ;;  %v7694_v52 = vpop.permute.xlu0 %2067 }
 0x20e   : > { %3297 = vmatprep.mubr.f32.mxu1 %v9008_v56  ;;  %3137 = vmatmul.mubr.f32.gmra.mrb[98].mxu0 %v7222_v53  ;;  %v3773_v35 = vmul.f32 %v7549_v28, %v3421_v37  ;;  %v3775_v43 = vmul.f32 %v7549_v28, %v3423_v3  ;;  %v3436_v14 = vmax.f32 %v2185_v58, 0.0  ;;  %v2346_v23 = vadd.f32 %v2345_v40, %v7470_v34  ;;  %v2196_v62 = vpop.f32.mrb[10].mxu0  ;;  %v2357_v17 = vpop.f32.mrb[10].mxu1 }
 0x20f   : > { %3142 = vmatprep.mubr.f32.mxu0 %v9008_v56  ;;  %v4039_v31 = vadd.f32 %v4038_v36, %v3774_v51  ;;  %v2187_v57 = vadd.f32 %v2186_v9, %v7470_v34  ;;  %v2348_v61 = vadd.f32 %v2347_v42, %v7470_v34  ;;  %v2191_v29 = vadd.f32 %v2190_v30, %v7547_v12  ;;  %v2198_v55 = vpop.f32.mrb[11].mxu0  ;;  %v2359_v20 = vpop.f32.mrb[11].mxu1 }
 0x210   : > { %v4018_v54 = vadd.f32 %v4017_v44, %v3773_v35  ;;  %v4060_v10 = vadd.f32 %v4059_v24, %v3775_v43  ;;  %v3788_v39 = vmul.f32 %v7584_v50, %v3436_v14  ;;  %v3438_v63 = vmax.f32 %v2346_v23, 0.0  ;;  %v7698_v37 = vpop.permute.xlu1 %3697 }
 0x211   : > { %3298 = vmatmul.mubr.f32.gmra.mrb[98].mxu1 %v7222_v53  ;;  %v3437_v40 = vmax.f32 %v2187_v57, 0.0  ;;  %v3439_v51 = vmax.f32 %v2348_v61, 0.0  ;;  %v3452_v9 = vmax.f32 %v2191_v29, 0.0  ;;  %v2352_v42 = vadd.f32 %v2351_v0, %v7547_v12 }
 0x212   : > { %3303 = vmatprep.mubr.f32.mxu1 %v9008_v56  ;;  %3143 = vmatmul.mubr.f32.gmra.mrb[100].mxu0 %v7249_v38  ;;  %v3998_v30 = vadd.f32 %v3997_v16, %v3788_v39  ;;  %v3790_v3 = vmul.f32 %v7584_v50, %v3438_v63  ;;  %v2193_v58 = vadd.f32 %v2192_v49, %v7547_v12  ;;  %v2202_v24 = vpop.f32.mrb[12].mxu0  ;;  %v2363_v35 = vpop.f32.mrb[12].mxu1 }
 0x213   : > { %3148 = vmatprep.mubr.f32.mxu0 %v9008_v56  ;;  %v3789_v53 = vmul.f32 %v7584_v50, %v3437_v40  ;;  %v3791_v36 = vmul.f32 %v7584_v50, %v3439_v51  ;;  %v3804_v0 = vmul.f32 %v7622_v47, %v3452_v9  ;;  %v3454_v44 = vmax.f32 %v2352_v42, 0.0  ;;  %v2204_v49 = vpop.f32.mrb[13].mxu0  ;;  %v2365_v57 = vpop.f32.mrb[13].mxu1 }
 0x214   : > { %v4040_v43 = vadd.f32 %v4039_v31, %v3790_v3  ;;  %v3453_v14 = vmax.f32 %v2193_v58, 0.0  ;;  %v2354_v16 = vadd.f32 %v2353_v13, %v7547_v12  ;;  %v2197_v23 = vadd.f32 %v2196_v62, %v7582_v25  ;;  %v7718_v62 = vpop.permute.xlu0 %2072 }
 0x215   : > { %3304 = vmatmul.mubr.f32.gmra.mrb[100].mxu1 %v7249_v38  ;;  %v4019_v61 = vadd.f32 %v4018_v54, %v3789_v53  ;;  %v4061_v29 = vadd.f32 %v4060_v10, %v3791_v36  ;;  %v3999_v39 = vadd.f32 %v3998_v30, %v3804_v0  ;;  %v3806_v63 = vmul.f32 %v7622_v47, %v3454_v44 }
 0x216   : > { %3309 = vmatprep.mubr.f32.mxu1 %v9008_v56  ;;  %3149 = vmatmul.mubr.f32.gmra.mrb[102].mxu0 %v7278_v45  ;;  %v3805_v31 = vmul.f32 %v7622_v47, %v3453_v14  ;;  %v3455_v40 = vmax.f32 %v2354_v16, 0.0  ;;  %v3468_v51 = vmax.f32 %v2197_v23, 0.0  ;;  %v2358_v13 = vadd.f32 %v2357_v17, %v7582_v25  ;;  %v7728_v14 = vpop.permute.xlu1 %3702 }
 0x217   : > { %3154 = vmatprep.mubr.f32.mxu0 %v9008_v56  ;;  %v4041_v38 = vadd.f32 %v4040_v43, %v3806_v63  ;;  %v2199_v54 = vadd.f32 %v2198_v55, %v7582_v25  ;;  %v2360_v10 = vadd.f32 %v2359_v20, %v7582_v25  ;;  %v2203_v9 = vadd.f32 %v2202_v24, %v7620_v15  ;;  %v2208_v53 = vpop.f32.mrb[14].mxu0  ;;  %v2369_v17 = vpop.f32.mrb[14].mxu1 }
 0x218   : > { %v4020_v42 = vadd.f32 %v4019_v61, %v3805_v31  ;;  %v3807_v30 = vmul.f32 %v7622_v47, %v3455_v40  ;;  %v3820_v3 = vmul.f32 %v7652_v7, %v3468_v51  ;;  %v3470_v58 = vmax.f32 %v2358_v13, 0.0  ;;  %v2210_v43 = vpop.f32.mrb[15].mxu0  ;;  %v2371_v20 = vpop.f32.mrb[15].mxu1 }
 0x219   : > { %3310 = vmatmul.mubr.f32.gmra.mrb[102].mxu1 %v7278_v45  ;;  %v3469_v36 = vmax.f32 %v2199_v54, 0.0  ;;  %v3471_v0 = vmax.f32 %v2360_v10, 0.0  ;;  %v3484_v44 = vmax.f32 %v2203_v9, 0.0  ;;  %v2364_v55 = vadd.f32 %v2363_v35, %v7620_v15  ;;  %v7743_v54 = vpop.permute.xlu0 %2077 }
 0x21a   : > { %3315 = vmatprep.mubr.f32.mxu1 %v9008_v56  ;;  %3155 = vmatmul.mubr.f32.gmra.mrb[104].mxu0 %v7301_v6  ;;  %v4062_v24 = vadd.f32 %v4061_v29, %v3807_v30  ;;  %v4000_v16 = vadd.f32 %v3999_v39, %v3820_v3  ;;  %v3822_v23 = vmul.f32 %v7652_v7, %v3470_v58  ;;  %v7734_v61 = vstv %s7704_s28 }
 0x21b   : > { %3160 = vmatprep.mubr.f32.mxu0 %v9008_v56  ;;  %v3821_v45 = vmul.f32 %v7652_v7, %v3469_v36  ;;  %v3823_v35 = vmul.f32 %v7652_v7, %v3471_v0  ;;  %v3836_v63 = vmul.f32 %v7671_v1, %v3484_v44  ;;  %v3486_v31 = vmax.f32 %v2364_v55, 0.0  ;;  %v2214_v39 = vpop.f32.mrb[16].mxu0  ;;  %9107 = vst [vmem:[#allocation18_spill] sm:$0xff] %v7743_v54 }
 0x21c   : > { %v4042_v40 = vadd.f32 %v4041_v38, %v3822_v23  ;;  %v2205_v51 = vadd.f32 %v2204_v49, %v7620_v15  ;;  %v2366_v13 = vadd.f32 %v2365_v57, %v7620_v15  ;;  %v2209_v29 = vadd.f32 %v2208_v53, %v7650_v60  ;;  %v2216_v58 = vpop.f32.mrb[17].mxu0 }
 0x21d   : > { %3316 = vmatmul.mubr.f32.gmra.mrb[104].mxu1 %v7301_v6  ;;  %v4021_v10 = vadd.f32 %v4020_v42, %v3821_v45  ;;  %v4063_v9 = vadd.f32 %v4062_v24, %v3823_v35  ;;  %v4001_v30 = vadd.f32 %v4000_v16, %v3836_v63  ;;  %v3838_v3 = vmul.f32 %v7671_v1, %v3486_v31  ;;  %v2375_v36 = vpop.f32.mrb[16].mxu1  ;;  %v7754_v24 = vpop.permute.xlu1 %3707 }
 0x21e   : > { %3321 = vmatprep.mubr.f32.mxu1 %v9008_v56  ;;  %3161 = vmatmul.mubr.f32.gmra.mrb[106].mxu0 %v7328_v8  ;;  %v3485_v49 = vmax.f32 %v2205_v51, 0.0  ;;  %v3487_v38 = vmax.f32 %v2366_v13, 0.0  ;;  %v3500_v57 = vmax.f32 %v2209_v29, 0.0  ;;  %v2370_v53 = vadd.f32 %v2369_v17, %v7650_v60  ;;  %v2377_v55 = vpop.f32.mrb[17].mxu1  ;;  %9108 = vst [vmem:[#allocation80_spill] sm:$0xff] %v7754_v24 }
 0x21f   : > { %3166 = vmatprep.mubr.f32.mxu0 %v9008_v56  ;;  %v4043_v0 = vadd.f32 %v4042_v40, %v3838_v3  ;;  %v2211_v6 = vadd.f32 %v2210_v43, %v7650_v60  ;;  %v2372_v42 = vadd.f32 %v2371_v20, %v7650_v60  ;;  %v2215_v44 = vadd.f32 %v2214_v39, %v7669_v46  ;;  %v2220_v35 = vpop.f32.mrb[18].mxu0  ;;  %v7763_v3 = vpop.permute.xlu0 %2082 }
 0x220   : > { %v3837_v16 = vmul.f32 %v7671_v1, %v3485_v49  ;;  %v3839_v23 = vmul.f32 %v7671_v1, %v3487_v38  ;;  %v3852_v45 = vmul.f32 %v7698_v37, %v3500_v57  ;;  %v3502_v17 = vmax.f32 %v2370_v53, 0.0  ;;  %v2222_v40 = vpop.f32.mrb[19].mxu0  ;;  %9109 = vst [vmem:[#allocation37_spill] sm:$0xff] %v7763_v3 }
 0x221   : > { %3322 = vmatmul.mubr.f32.gmra.mrb[106].mxu1 %v7328_v8  ;;  %v3501_v63 = vmax.f32 %v2211_v6, 0.0  ;;  %v3503_v31 = vmax.f32 %v2372_v42, 0.0  ;;  %v3516_v43 = vmax.f32 %v2215_v44, 0.0  ;;  %v2376_v20 = vadd.f32 %v2375_v36, %v7669_v46 }
 0x222   : > { %3327 = vmatprep.mubr.f32.mxu1 %v9008_v56  ;;  %3167 = vmatmul.mubr.f32.gmra.mrb[108].mxu0 %v7355_v27  ;;  %v4022_v51 = vadd.f32 %v4021_v10, %v3837_v16  ;;  %v4064_v13 = vadd.f32 %v4063_v9, %v3839_v23  ;;  %v4002_v29 = vadd.f32 %v4001_v30, %v3852_v45  ;;  %v2381_v39 = vpop.f32.mrb[18].mxu1 }
 0x223   : > { %3172 = vmatprep.mubr.f32.mxu0 %v9008_v56  ;;  %v3854_v8 = vmul.f32 %v7698_v37, %v3502_v17  ;;  %v3853_v49 = vmul.f32 %v7698_v37, %v3501_v63  ;;  %v3855_v38 = vmul.f32 %v7698_v37, %v3503_v31  ;;  %v3868_v57 = vmul.f32 %v7728_v14, %v3516_v43  ;;  %v2383_v53 = vpop.f32.mrb[19].mxu1  ;;  %v2226_v30 = vpop.f32.mrb[20].mxu0 }
 0x224   : > { %v3518_v36 = vmax.f32 %v2376_v20, 0.0  ;;  %v2217_v6 = vadd.f32 %v2216_v58, %v7669_v46  ;;  %v2378_v10 = vadd.f32 %v2377_v55, %v7669_v46  ;;  %v2221_v9 = vadd.f32 %v2220_v35, %v7694_v52  ;;  %v2228_v45 = vpop.f32.mrb[21].mxu0  ;;  %v7774_v17 = vpop.permute.xlu1 %3712 }
 0x225   : > { %3328 = vmatmul.mubr.f32.gmra.mrb[108].mxu1 %v7355_v27  ;;  %v4044_v42 = vadd.f32 %v4043_v0, %v3854_v8  ;;  %v4023_v44 = vadd.f32 %v4022_v51, %v3853_v49  ;;  %v4065_v16 = vadd.f32 %v4064_v13, %v3855_v38  ;;  %v4003_v23 = vadd.f32 %v4002_v29, %v3868_v57  ;;  %v7787_v57 = vpop.permute.xlu0 %2087 }
 0x226   : > { %3333 = vmatprep.mubr.f32.mxu1 %v9008_v56  ;;  %3173 = vmatmul.mubr.f32.gmra.mrb[110].mxu0 %v7378_v4  ;;  %v3870_v58 = vmul.f32 %v7728_v14, %v3518_v36  ;;  %v3517_v63 = vmax.f32 %v2217_v6, 0.0  ;;  %v3519_v55 = vmax.f32 %v2378_v10, 0.0  ;;  %v3532_v31 = vmax.f32 %v2221_v9, 0.0  ;;  %v2387_v35 = vpop.f32.mrb[20].mxu1  ;;  %9110 = vst [vmem:[#allocation81_spill] sm:$0xff] %v7787_v57 }
 0x227   : > { %3178 = vmatprep.mubr.f32.mxu0 %v9008_v56  ;;  %v2382_v27 = vadd.f32 %v2381_v39, %v7694_v52  ;;  %v2223_v0 = vadd.f32 %v2222_v40, %v7694_v52  ;;  %v2384_v43 = vadd.f32 %v2383_v53, %v7694_v52  ;;  %v2227_v20 = vadd.f32 %v2226_v30, %v7718_v62  ;;  %v2389_v51 = vpop.f32.mrb[21].mxu1 }
 0x228   : > { %v4045_v13 = vadd.f32 %v4044_v42, %v3870_v58  ;;  %v3869_v29 = vmul.f32 %v7728_v14, %v3517_v63  ;;  %v3871_v8 = vmul.f32 %v7728_v14, %v3519_v55  ;;  %v3884_v49 = vmul.f32 %v7754_v24, %v3532_v31  ;;  %v2232_v38 = vpop.f32.mrb[22].mxu0 }
 0x229   : > { %3334 = vmatmul.mubr.f32.gmra.mrb[110].mxu1 %v7378_v4  ;;  %v3534_v39 = vmax.f32 %v2382_v27, 0.0  ;;  %v3533_v36 = vmax.f32 %v2223_v0, 0.0  ;;  %v3535_v40 = vmax.f32 %v2384_v43, 0.0  ;;  %v3548_v6 = vmax.f32 %v2227_v20, 0.0  ;;  %v2234_v53 = vpop.f32.mrb[23].mxu0  ;;  %v7799_v43 = vpop.permute.xlu1 %3717 }
 0x22a   : > { %3339 = vmatprep.mubr.f32.mxu1 %v9008_v56  ;;  %3179 = vmatmul.mubr.f32.gmra.mrb[112].mxu0 %v7401_v2  ;;  %v4024_v10 = vadd.f32 %v4023_v44, %v3869_v29  ;;  %v4066_v9 = vadd.f32 %v4065_v16, %v3871_v8  ;;  %v4004_v30 = vadd.f32 %v4003_v23, %v3884_v49  ;;  %v2393_v42 = vpop.f32.mrb[22].mxu1  ;;  %v5023_v58 = vmov 1966171168  }
 0x22b   : > { %v7792_v63 = vunpack.c.l.s4 %v5023_v58  ;;  %3184 = vmatprep.mubr.f32.mxu0 %v9008_v56  ;;  %v3886_v4 = vmul.f32 %v7754_v24, %v3534_v39  ;;  %v3885_v55 = vmul.f32 %v7754_v24, %v3533_v36  ;;  %v3887_v31 = vmul.f32 %v7754_v24, %v3535_v40  ;;  %v2395_v0 = vpop.f32.mrb[23].mxu1 }
 0x22c   : > { %v3900_v27 = vmul.f32 %v7774_v17, %v3548_v6  ;;  %v2388_v44 = vadd.f32 %v2387_v35, %v7718_v62  ;;  %v2229_v16 = vadd.f32 %v2228_v45, %v7718_v62  ;;  %v2390_v23 = vadd.f32 %v2389_v51, %v7718_v62  ;;  %v2238_v29 = vpop.f32.mrb[24].mxu0  ;;  %v7808_v51 = vpop.permute.xlu0 %2092 }
 0x22d   : > { %v2233_v20 = vadd.f32 %v2232_v38, %v7743_v54  ;;  %3340 = vmatmul.mubr.f32.gmra.mrb[112].mxu1 %v7401_v2  ;;  %v4046_v8 = vadd.f32 %v4045_v13, %v3886_v4  ;;  %v4025_v49 = vadd.f32 %v4024_v10, %v3885_v55  ;;  %v4067_v39 = vadd.f32 %v4066_v9, %v3887_v31  ;;  %v2240_v40 = vpop.f32.mrb[25].mxu0 }
 0x22e   : > { %v4005_v36 = vadd.f32 %v4004_v30, %v3900_v27  ;;  %3345 = vmatprep.mubr.f32.mxu1 %v9008_v56  ;;  %3185 = vmatmul.mubr.f32.gmra.mrb[114].mxu0 %v7425_v11  ;;  %v3550_v6 = vmax.f32 %v2388_v44, 0.0  ;;  %v3549_v35 = vmax.f32 %v2229_v16, 0.0  ;;  %v3551_v58 = vmax.f32 %v2390_v23, 0.0  ;;  %v2399_v24 = vpop.f32.mrb[24].mxu1  ;;  %9111 = vst [vmem:[#allocation38_spill] sm:$0xff] %v7808_v51 }
 0x22f   : > { %v3564_v45 = vmax.f32 %v2233_v20, 0.0  ;;  %3190 = vmatprep.mubr.f32.mxu0 %v9008_v56  ;;  %v2394_v2 = vadd.f32 %v2393_v42, %v7743_v54  ;;  %v2235_v13 = vadd.f32 %v2234_v53, %v7743_v54  ;;  %v2396_v38 = vadd.f32 %v2395_v0, %v7743_v54  ;;  %v2401_v9 = vpop.f32.mrb[25].mxu1  ;;  %v7820_v0 = vpop.permute.xlu1 %3722 }
 0x230   : > { %v2239_v10 = vadd.f32 %v2238_v29, %v7763_v3  ;;  %v3902_v30 = vmul.f32 %v7774_v17, %v3550_v6  ;;  %v3901_v4 = vmul.f32 %v7774_v17, %v3549_v35  ;;  %v3903_v55 = vmul.f32 %v7774_v17, %v3551_v58  ;;  %v2244_v27 = vpop.f32.mrb[26].mxu0  ;;  %9112 = vst [vmem:[#allocation19_spill] sm:$0xff] %v7820_v0 }
 0x231   : > { %v3916_v31 = vmul.f32 %v7799_v43, %v3564_v45  ;;  %3346 = vmatmul.mubr.f32.gmra.mrb[114].mxu1 %v7425_v11  ;;  %v3566_v44 = vmax.f32 %v2394_v2, 0.0  ;;  %v3565_v42 = vmax.f32 %v2235_v13, 0.0  ;;  %v3567_v16 = vmax.f32 %v2396_v38, 0.0  ;;  %v2246_v23 = vpop.f32.mrb[27].mxu0 }
 0x232   : > { %v3580_v53 = vmax.f32 %v2239_v10, 0.0  ;;  %3351 = vmatprep.mubr.f32.mxu1 %v9008_v56  ;;  %3191 = vmatmul.mubr.f32.gmra.mrb[116].mxu0 %v7456_v41  ;;  %v4047_v20 = vadd.f32 %v4046_v8, %v3902_v30  ;;  %v4026_v29 = vadd.f32 %v4025_v49, %v3901_v4  ;;  %v4068_v6 = vadd.f32 %v4067_v39, %v3903_v55  ;;  %v2405_v35 = vpop.f32.mrb[26].mxu1  ;;  %v7833_v30 = vpop.permute.xlu0 %2097 }
 0x233   : > { %3196 = vmatprep.mubr.f32.mxu0 %v9008_v56  ;;  %v4006_v11 = vadd.f32 %v4005_v36, %v3916_v31  ;;  %v3918_v45 = vmul.f32 %v7799_v43, %v3566_v44  ;;  %v3917_v2 = vmul.f32 %v7799_v43, %v3565_v42  ;;  %v3919_v13 = vmul.f32 %v7799_v43, %v3567_v16  ;;  %v2407_v38 = vpop.f32.mrb[27].mxu1 }
 0x234   : > { %v3932_v10 = vmul.f32 %v7820_v0, %v3580_v53  ;;  %v2400_v54 = vadd.f32 %v2399_v24, %v7763_v3  ;;  %v2241_v8 = vadd.f32 %v2240_v40, %v7763_v3  ;;  %v2402_v49 = vadd.f32 %v2401_v9, %v7763_v3  ;;  %v2250_v39 = vpop.f32.mrb[28].mxu0  ;;  %9113 = vst [vmem:[#allocation89_spill] sm:$0xff] %v7833_v30 }
 0x235   : > { %3352 = vmatmul.mubr.f32.gmra.mrb[116].mxu1 %v7456_v41  ;;  %v4048_v36 = vadd.f32 %v4047_v20, %v3918_v45  ;;  %v4027_v4 = vadd.f32 %v4026_v29, %v3917_v2  ;;  %v4069_v55 = vadd.f32 %v4068_v6, %v3919_v13  ;;  %v2245_v31 = vadd.f32 %v2244_v27, %v7787_v57  ;;  %v2252_v44 = vpop.f32.mrb[29].mxu0  ;;  %v7843_v6 = vpop.permute.xlu1 %3727 }
 0x236   : > { %3357 = vmatprep.mubr.f32.mxu1 %v9008_v56  ;;  %3197 = vmatmul.mubr.f32.gmra.mrb[118].mxu0 %v7488_v5  ;;  %v4007_v24 = vadd.f32 %v4006_v11, %v3932_v10  ;;  %v3582_v42 = vmax.f32 %v2400_v54, 0.0  ;;  %v3581_v40 = vmax.f32 %v2241_v8, 0.0  ;;  %v3583_v16 = vmax.f32 %v2402_v49, 0.0  ;;  %v2411_v9 = vpop.f32.mrb[28].mxu1  ;;  %9114 = vst [vmem:[#allocation91_spill] sm:$0xff] %v7843_v6  ;;  %v7853_v58 = vpop.permute.xlu0 %3732 }
 0x237   : > { %3202 = vmatprep.mubr.f32.mxu0 %v9008_v56  ;;  %v3596_v53 = vmax.f32 %v2245_v31, 0.0  ;;  %v2406_v41 = vadd.f32 %v2405_v35, %v7787_v57  ;;  %v2247_v20 = vadd.f32 %v2246_v23, %v7787_v57  ;;  %v2408_v29 = vadd.f32 %v2407_v38, %v7787_v57  ;;  %v2413_v27 = vpop.f32.mrb[29].mxu1  ;;  %9115 = vst [vmem:[#allocation73_spill] sm:$0xff] %v7853_v58 }
 0x238   : > { %v3934_v45 = vmul.f32 %v7820_v0, %v3582_v42  ;;  %v3933_v11 = vmul.f32 %v7820_v0, %v3581_v40  ;;  %v3935_v54 = vmul.f32 %v7820_v0, %v3583_v16  ;;  %v2251_v2 = vadd.f32 %v2250_v39, %v7808_v51  ;;  %v2256_v13 = vpop.f32.mrb[30].mxu0 }
 0x239   : > { %3358 = vmatmul.mubr.f32.gmra.mrb[118].mxu1 %v7488_v5  ;;  %v3948_v35 = vmul.f32 %v7843_v6, %v3596_v53  ;;  %v3598_v10 = vmax.f32 %v2406_v41, 0.0  ;;  %v3597_v23 = vmax.f32 %v2247_v20, 0.0  ;;  %v3599_v8 = vmax.f32 %v2408_v29, 0.0  ;;  %v2258_v38 = vpop.f32.mrb[31].mxu0 }
 0x23a   : > { %3363 = vmatprep.mubr.f32.mxu1 %v9008_v56  ;;  %3203 = vmatmul.mubr.f32.gmra.mrb[120].mxu0 %v7515_v26  ;;  %v4049_v49 = vadd.f32 %v4048_v36, %v3934_v45  ;;  %v4028_v31 = vadd.f32 %v4027_v4, %v3933_v11  ;;  %v4070_v42 = vadd.f32 %v4069_v55, %v3935_v54  ;;  %v3612_v40 = vmax.f32 %v2251_v2, 0.0  ;;  %v2417_v16 = vpop.f32.mrb[30].mxu1 }
 0x23b   : > { %3208 = vmatprep.mubr.f32.mxu0 %v9008_v56  ;;  %v4008_v5 = vadd.f32 %v4007_v24, %v3948_v35  ;;  %v3950_v39 = vmul.f32 %v7843_v6, %v3598_v10  ;;  %v3949_v53 = vmul.f32 %v7843_v6, %v3597_v23  ;;  %v3951_v41 = vmul.f32 %v7843_v6, %v3599_v8  ;;  %v2419_v20 = vpop.f32.mrb[31].mxu1 }
 0x23c   : > { %v3964_v29 = vmul.f32 %v7853_v58, %v3612_v40  ;;  %v2412_v36 = vadd.f32 %v2411_v9, %v7808_v51  ;;  %v2253_v4 = vadd.f32 %v2252_v44, %v7808_v51  ;;  %v2414_v55 = vadd.f32 %v2413_v27, %v7808_v51  ;;  %v2488_v45 = vpop.f32.mrb[32].mxu0 }
 0x23d   : > { %3364 = vmatmul.mubr.f32.gmra.mrb[120].mxu1 %v7515_v26  ;;  %v4050_v11 = vadd.f32 %v4049_v49, %v3950_v39  ;;  %v4029_v24 = vadd.f32 %v4028_v31, %v3949_v53  ;;  %v4071_v54 = vadd.f32 %v4070_v42, %v3951_v41  ;;  %v2257_v2 = vadd.f32 %v2256_v13, %v7833_v30  ;;  %v2490_v35 = vpop.f32.mrb[33].mxu0  ;;  %v9116_v31 = vld [vmem:[#allocation3_spill] sm:$0xff]  ;;  %v7875_v39 = vpop.permute.xlu1 %3737 }
 0x23e   : > { %3369 = vmatprep.mubr.f32.mxu1 %v9008_v56  ;;  %3209 = vmatmul.mubr.f32.gmra.mrb[122].mxu0 %v7538_v32  ;;  %v4009_v10 = vadd.f32 %v4008_v5, %v3964_v29  ;;  %v3614_v23 = vmax.f32 %v2412_v36, 0.0  ;;  %v3613_v9 = vmax.f32 %v2253_v4, 0.0  ;;  %v3615_v8 = vmax.f32 %v2414_v55, 0.0  ;;  %v2649_v44 = vpop.f32.mrb[32].mxu1  ;;  %9118 = vst [vmem:[#allocation74_spill] sm:$0xff] %v7875_v39 }
 0x23f   : > { %3214 = vmatprep.mubr.f32.mxu0 %v9008_v56  ;;  %v3628_v27 = vmax.f32 %v2257_v2, 0.0  ;;  %v2418_v26 = vadd.f32 %v2417_v16, %v7833_v30  ;;  %v2259_v49 = vadd.f32 %v2258_v38, %v7833_v30  ;;  %v9117_v13 = vunpack.c.0.s8 %v7792_v63  ;;  %v2651_v40 = vpop.f32.mrb[33].mxu1 }
 0x240   : > { %v3966_v5 = vmul.f32 %v7853_v58, %v3614_v23  ;;  %v3965_v53 = vmul.f32 %v7853_v58, %v3613_v9  ;;  %v3967_v41 = vmul.f32 %v7853_v58, %v3615_v8  ;;  %v2420_v29 = vadd.f32 %v2419_v20, %v7833_v30  ;;  %v2494_v36 = vpop.f32.mrb[34].mxu0 }
 0x241   : > { %v7873_v42 = vsub.s32 %v9117_v13, %v9116_v31  ;;  %3370 = vmatmul.mubr.f32.gmra.mrb[122].mxu1 %v7538_v32  ;;  %v3980_v38 = vmul.f32 %v7875_v39, %v3628_v27  ;;  %v3630_v16 = vmax.f32 %v2418_v26, 0.0  ;;  %v3629_v63 = vmax.f32 %v2259_v49, 0.0  ;;  %v2496_v55 = vpop.f32.mrb[35].mxu0 }
 0x242   : > { %v2489_v4 = vadd.f32 %v2488_v45, %v7433_v48  ;;  %3375 = vmatprep.mubr.f32.mxu1 %v9008_v56  ;;  %3215 = vmatmul.mubr.f32.gmra.mrb[124].mxu0 %v7566_v33  ;;  %v4051_v2 = vadd.f32 %v4050_v11, %v3966_v5  ;;  %v4030_v23 = vadd.f32 %v4029_v24, %v3965_v53  ;;  %v3631_v8 = vmax.f32 %v2420_v29, 0.0  ;;  %v2655_v31 = vpop.f32.mrb[34].mxu1 }
 0x243   : > { %v4072_v9 = vadd.f32 %v4071_v54, %v3967_v41  ;;  %3220 = vmatprep.mubr.f32.mxu0 %v9008_v56  ;;  %v4010_v20 = vadd.f32 %v4009_v10, %v3980_v38  ;;  %v3982_v32 = vmul.f32 %v7875_v39, %v3630_v16  ;;  %v3981_v27 = vmul.f32 %v7875_v39, %v3629_v63  ;;  %v2657_v49 = vpop.f32.mrb[35].mxu1 }
 0x244   : > { %v3392_v26 = vmax.f32 %v2489_v4, 0.0  ;;  %v3983_v45 = vmul.f32 %v7875_v39, %v3631_v8  ;;  %v2650_v13 = vadd.f32 %v2649_v44, %v7433_v48  ;;  %v2491_v30 = vadd.f32 %v2490_v35, %v7433_v48  ;;  %v2500_v24 = vpop.f32.mrb[36].mxu0 }
 0x245   : > { %v2652_v11 = vadd.f32 %v2651_v40, %v7433_v48  ;;  %3376 = vmatmul.mubr.f32.gmra.mrb[124].mxu1 %v7566_v33  ;;  %v4011_v54 = vrot.slane %v4010_v20, 4  ;;  %v4052_v5 = vadd.f32 %v4051_v2, %v3982_v32  ;;  %v4031_v10 = vadd.f32 %v4030_v23, %v3981_v27  ;;  %v7895_v41 = vpop.f32.mrb[37].mxu0 }
 0x246   : > { %v3744_v53 = vmul.f32 %v7505_v19, %v3392_v26  ;;  %3381 = vmatprep.mubr.f32.mxu1 %v9008_v56  ;;  %3221 = vmatmul.mubr.f32.gmra.mrb[126].mxu0 %v7597_v59  ;;  %v4073_v29 = vadd.f32 %v4072_v9, %v3983_v45  ;;  %v3394_v44 = vmax.f32 %v2650_v13, 0.0  ;;  %v3393_v38 = vmax.f32 %v2491_v30, 0.0  ;;  %v2661_v16 = vpop.f32.mrb[36].mxu1 }
 0x247   : > { %v3395_v35 = vmax.f32 %v2652_v11, 0.0  ;;  %v4012_v40 = vadd.f32 %v4011_v54, %v4010_v20  ;;  %v4053_v63 = vrot.slane %v4052_v5, 4  ;;  %v4032_v4 = vrot.slane %v4031_v10, 4  ;;  %v2663_v2 = vpop.f32.mrb[37].mxu1 }
 0x248   : > { %v2495_v33 = vadd.f32 %v2494_v36, %v7435_v18  ;;  %v4074_v23 = vrot.slane %v4073_v29, 4  ;;  %v3746_v8 = vmul.f32 %v7505_v19, %v3394_v44  ;;  %v3745_v32 = vmul.f32 %v7505_v19, %v3393_v38 }
 0x249   : > { %v3747_v56 = vmul.f32 %v7505_v19, %v3395_v35  ;;  %3382 = vmatmul.mubr.f32.gmra.mrb[126].mxu1 %v7597_v59  ;;  %v4013_v9 = vrot.slane %v4012_v40, 2  ;;  %v4054_v27 = vadd.f32 %v4053_v63, %v4052_v5  ;;  %v4033_v30 = vadd.f32 %v4032_v4, %v4031_v10  ;;  %v7904_v45 = vpop.f32.mrb[38].mxu0 }
 0x24a   : > { %v3408_v26 = vmax.f32 %v2495_v33, 0.0  ;;  %v4075_v20 = vadd.f32 %v4074_v23, %v4073_v29  ;;  %v2656_v13 = vadd.f32 %v2655_v31, %v7435_v18  ;;  %v2497_v36 = vadd.f32 %v2496_v55, %v7435_v18  ;;  %v7909_v54 = vpop.f32.mrb[38].mxu1  ;;  %v7911_v44 = vpop.f32.mrb[39].mxu0 }
 0x24b   : > { %v2658_v11 = vadd.f32 %v2657_v49, %v7435_v18  ;;  %v4014_v38 = vadd.f32 %v4013_v9, %v4012_v40  ;;  %v4055_v35 = vrot.slane %v4054_v27, 2  ;;  %v4034_v59 = vrot.slane %v4033_v30, 2  ;;  %v7914_v10 = vpop.f32.mrb[39].mxu1 }
 0x24c   : > { %v3760_v5 = vmul.f32 %v7507_v21, %v3408_v26  ;;  %v4076_v63 = vrot.slane %v4075_v20, 2  ;;  %v3410_v4 = vmax.f32 %v2656_v13, 0.0  ;;  %v3409_v29 = vmax.f32 %v2497_v36, 0.0 }
 0x24d   : > { %v3411_v33 = vmax.f32 %v2658_v11, 0.0  ;;  %v4015_v31 = vrot.slane %v4014_v38, 1  ;;  %v4056_v23 = vadd.f32 %v4055_v35, %v4054_v27  ;;  %v4035_v55 = vadd.f32 %v4034_v59, %v4033_v30  ;;  %v2512_v49 = vpop.f32.mrb[40].mxu0 }
 0x24e   : > { %v4080_v19 = vadd.f32 %v3760_v5, %v3744_v53  ;;  %v4077_v18 = vadd.f32 %v4076_v63, %v4075_v20  ;;  %v3762_v48 = vmul.f32 %v7507_v21, %v3410_v4  ;;  %v3761_v40 = vmul.f32 %v7507_v21, %v3409_v29  ;;  %v2673_v39 = vpop.f32.mrb[40].mxu1  ;;  %v2514_v26 = vpop.f32.mrb[41].mxu0 }
 0x24f   : > { %v3763_v9 = vmul.f32 %v7507_v21, %v3411_v33  ;;  %v4016_v58 = vadd.f32 %v4015_v31, %v4014_v38  ;;  %v4057_v51 = vrot.slane %v4056_v23, 1  ;;  %v4036_v6 = vrot.slane %v4035_v55, 1  ;;  %v2675_v36 = vpop.f32.mrb[41].mxu1 }
 0x250   : > { %v2501_v13 = vadd.f32 %v2500_v24, %v7468_v22  ;;  %v4078_v11 = vrot.slane %v4077_v18, 1  ;;  %v4122_v27 = vadd.f32 %v3762_v48, %v3746_v8  ;;  %v4101_v30 = vadd.f32 %v3761_v40, %v3745_v32 }
 0x251   : > { %v4143_v53 = vadd.f32 %v3763_v9, %v3747_v56  ;;  %v4334_v20 = vadd.f32 %v7734_v61, %v4016_v58  ;;  %v4058_v35 = vadd.f32 %v4057_v51, %v4056_v23  ;;  %v4037_v59 = vadd.f32 %v4036_v6, %v4035_v55 }
 0x252   : > { %v3424_v5 = vmax.f32 %v2501_v13, 0.0  ;;  %v4079_v63 = vadd.f32 %v4078_v11, %v4077_v18  ;;  %v2662_v4 = vadd.f32 %v2661_v16, %v7468_v22  ;;  %v2503_v38 = vadd.f32 %v7895_v41, %v7468_v22  ;;  %v7925_v33 = vpop.f32.mrb[42].mxu0  ;;  %v7927_v24 = vpop.f32.mrb[42].mxu1 }
 0x253   : > { %v2664_v29 = vadd.f32 %v2663_v2, %v7468_v22  ;;  %v4625_v48 = vmul.f32 -1.442695, %v4334_v20  ;;  %v4336_v8 = vadd.f32 %v7734_v61, %v4058_v35  ;;  %v4335_v58 = vadd.f32 %v7734_v61, %v4037_v59  ;;  %v2520_v6 = vpop.f32.mrb[43].mxu0  ;;  %v7932_v18 = vpop.f32.mrb[43].mxu1 }
 0x254   : > { %v3776_v51 = vmul.f32 %v7549_v28, %v3424_v5  ;;  %v4337_v16 = vadd.f32 %v7734_v61, %v4079_v63  ;;  %v3426_v32 = vmax.f32 %v2662_v4, 0.0  ;;  %v3425_v41 = vmax.f32 %v2503_v38, 0.0 }
 0x255   : > { %v3427_v56 = vmax.f32 %v2664_v29, 0.0  ;;  %4929 = vpow2.f32 %v4625_v48  ;;  %v4627_v2 = vmul.f32 -1.442695, %v4336_v8  ;;  %v4626_v31 = vmul.f32 -1.442695, %v4335_v58 }
 0x256   : > { %v4081_v23 = vadd.f32 %v4080_v19, %v3776_v51  ;;  %v4628_v55 = vmul.f32 -1.442695, %v4337_v16  ;;  %v3778_v40 = vmul.f32 %v7549_v28, %v3426_v32  ;;  %v3777_v9 = vmul.f32 %v7549_v28, %v3425_v41  ;;  %v7938_v11 = vpop.f32.mrb[44].mxu0  ;;  %v7940_v20 = vpop.f32.mrb[44].mxu1 }
 0x257   : > { %v3779_v13 = vmul.f32 %v7549_v28, %v3427_v56  ;;  %4931 = vpow2.f32 %v4627_v2  ;;  %v2507_v35 = vadd.f32 %v7904_v45, %v7470_v34  ;;  %v2668_v59 = vadd.f32 %v7909_v54, %v7470_v34  ;;  %v7948_v5 = vpop.f32.mrb[45].mxu0  ;;  %v7950_v63 = vpop.f32.mrb[45].mxu1 }
 0x258   : > { %v2509_v19 = vadd.f32 %v7911_v44, %v7470_v34  ;;  %4933 = vpow2.f32 %v4626_v31  ;;  %v4123_v4 = vadd.f32 %v4122_v27, %v3778_v40  ;;  %v4102_v38 = vadd.f32 %v4101_v30, %v3777_v9 }
 0x259   : > { %v4144_v29 = vadd.f32 %v4143_v53, %v3779_v13  ;;  %4935 = vpow2.f32 %v4628_v55  ;;  %v3440_v48 = vmax.f32 %v2507_v35, 0.0  ;;  %v3442_v8 = vmax.f32 %v2668_v59, 0.0 }
 0x25a   : > { %v3441_v58 = vmax.f32 %v2509_v19, 0.0  ;;  %v2670_v45 = vadd.f32 %v7914_v10, %v7470_v34  ;;  %v2513_v54 = vadd.f32 %v2512_v49, %v7547_v12  ;;  %v2674_v51 = vadd.f32 %v2673_v39, %v7547_v12  ;;  %v7957_v16 = vpop.f32.mrb[46].mxu0 }
 0x25b   : > { %v2515_v44 = vadd.f32 %v2514_v26, %v7547_v12  ;;  %v3792_v32 = vmul.f32 %v7584_v50, %v3440_v48  ;;  %v3794_v27 = vmul.f32 %v7584_v50, %v3442_v8  ;;  %v2676_v53 = vadd.f32 %v2675_v36, %v7547_v12  ;;  %v7963_v41 = vpop.f32.mrb[46].mxu1  ;;  %v7965_v56 = vpop.f32.mrb[47].mxu0 }
 0x25c   : > { %v3793_v30 = vmul.f32 %v7584_v50, %v3441_v58  ;;  %v3443_v10 = vmax.f32 %v2670_v45, 0.0  ;;  %v3456_v49 = vmax.f32 %v2513_v54, 0.0  ;;  %v3458_v2 = vmax.f32 %v2674_v51, 0.0  ;;  %v7967_v31 = vpop.f32.mrb[47].mxu1 }
 0x25d   : > { %v3457_v39 = vmax.f32 %v2515_v44, 0.0  ;;  %v4082_v26 = vadd.f32 %v4081_v23, %v3792_v32  ;;  %v4124_v55 = vadd.f32 %v4123_v4, %v3794_v27  ;;  %v3459_v9 = vmax.f32 %v2676_v53, 0.0 }
 0x25e   : > { %v4103_v40 = vadd.f32 %v4102_v38, %v3793_v30  ;;  %v3795_v13 = vmul.f32 %v7584_v50, %v3443_v10  ;;  %v3808_v35 = vmul.f32 %v7622_v47, %v3456_v49  ;;  %v3810_v36 = vmul.f32 %v7622_v47, %v3458_v2  ;;  %v7973_v19 = vpop.f32.mrb[48].mxu0 }
 0x25f   : > { %v3809_v59 = vmul.f32 %v7622_v47, %v3457_v39  ;;  %v4930_v48 = vpop.eup %4929  ;;  %v3811_v8 = vmul.f32 %v7622_v47, %v3459_v9  ;;  %v2519_v58 = vadd.f32 %v7925_v33, %v7582_v25  ;;  %v2680_v23 = vadd.f32 %v7927_v24, %v7582_v25  ;;  %v7981_v38 = vpop.f32.mrb[49].mxu0 }
 0x260   : > { %v2521_v4 = vadd.f32 %v2520_v6, %v7582_v25  ;;  %v4398_v45 = vadd.f32 1.0, %v4930_v48  ;;  %v4145_v54 = vadd.f32 %v4144_v29, %v3795_v13  ;;  %v4083_v51 = vadd.f32 %v4082_v26, %v3808_v35  ;;  %v7983_v32 = vpop.f32.mrb[48].mxu1 }
 0x261   : > { %v4125_v44 = vadd.f32 %v4124_v55, %v3810_v36  ;;  %v4932_v27 = vpop.eup %4931  ;;  %v4104_v30 = vadd.f32 %v4103_v40, %v3809_v59  ;;  %v3472_v53 = vmax.f32 %v2519_v58, 0.0  ;;  %v3474_v10 = vmax.f32 %v2680_v23, 0.0  ;;  %v7985_v2 = vpop.f32.mrb[49].mxu1 }
 0x262   : > { %v3473_v49 = vmax.f32 %v2521_v4, 0.0  ;;  %v4934_v33 = vpop.eup %4933  ;;  %4937 = vrcp.f32 %v4398_v45  ;;  %v4400_v24 = vadd.f32 1.0, %v4932_v27  ;;  %v4146_v39 = vadd.f32 %v4145_v54, %v3811_v8  ;;  %v7989_v9 = vpop.f32.mrb[50].mxu0 }
 0x263   : > { %v2682_v6 = vadd.f32 %v7932_v18, %v7582_v25  ;;  %v4936_v29 = vpop.eup %4935  ;;  %v4399_v26 = vadd.f32 1.0, %v4934_v33  ;;  %v3824_v55 = vmul.f32 %v7652_v7, %v3472_v53  ;;  %v3826_v40 = vmul.f32 %v7652_v7, %v3474_v10  ;;  %v7994_v35 = vpop.f32.mrb[51].mxu0 }
 0x264   : > { %v3825_v13 = vmul.f32 %v7652_v7, %v3473_v49  ;;  %4939 = vrcp.f32 %v4400_v24  ;;  %v4401_v36 = vadd.f32 1.0, %v4936_v29  ;;  %v2525_v48 = vadd.f32 %v7938_v11, %v7620_v15  ;;  %v7998_v8 = vpop.f32.mrb[50].mxu1 }
 0x265   : > { %v3475_v59 = vmax.f32 %v2682_v6, 0.0  ;;  %4941 = vrcp.f32 %v4399_v26  ;;  %v4084_v18 = vadd.f32 %v4083_v51, %v3824_v55  ;;  %v4126_v58 = vadd.f32 %v4125_v44, %v3826_v40  ;;  %v8000_v4 = vpop.f32.mrb[51].mxu1 }
 0x266   : > { %v4105_v23 = vadd.f32 %v4104_v30, %v3825_v13  ;;  %4943 = vrcp.f32 %v4401_v36  ;;  %v3488_v54 = vmax.f32 %v2525_v48, 0.0  ;;  %v2686_v27 = vadd.f32 %v7940_v20, %v7620_v15  ;;  %v8005_v53 = vpop.f32.mrb[52].mxu0 }
 0x267   : > { %v3827_v45 = vmul.f32 %v7652_v7, %v3475_v59  ;;  %v2527_v11 = vadd.f32 %v7948_v5, %v7620_v15  ;;  %v2688_v10 = vadd.f32 %v7950_v63, %v7620_v15  ;;  %v2531_v51 = vadd.f32 %v7957_v16, %v7650_v60  ;;  %v8015_v30 = vpop.f32.mrb[53].mxu0 }
 0x268   : > { %v2692_v44 = vadd.f32 %v7963_v41, %v7650_v60  ;;  %v3840_v33 = vmul.f32 %v7671_v1, %v3488_v54  ;;  %v3490_v20 = vmax.f32 %v2686_v27, 0.0  ;;  %v2533_v24 = vadd.f32 %v7965_v56, %v7650_v60  ;;  %v8020_v6 = vpop.f32.mrb[52].mxu1 }
 0x269   : > { %v4147_v49 = vadd.f32 %v4146_v39, %v3827_v45  ;;  %v3489_v5 = vmax.f32 %v2527_v11, 0.0  ;;  %v3491_v29 = vmax.f32 %v2688_v10, 0.0  ;;  %v3504_v63 = vmax.f32 %v2531_v51, 0.0  ;;  %v8022_v55 = vpop.f32.mrb[53].mxu1 }
 0x26a   : > { %v3506_v26 = vmax.f32 %v2692_v44, 0.0  ;;  %v4085_v16 = vadd.f32 %v4084_v18, %v3840_v33  ;;  %v3842_v41 = vmul.f32 %v7671_v1, %v3490_v20  ;;  %v3505_v40 = vmax.f32 %v2533_v24, 0.0 }
 0x26b   : > { %v2694_v39 = vadd.f32 %v7967_v31, %v7650_v60  ;;  %v3841_v13 = vmul.f32 %v7671_v1, %v3489_v5  ;;  %v3843_v36 = vmul.f32 %v7671_v1, %v3491_v29  ;;  %v3856_v56 = vmul.f32 %v7698_v37, %v3504_v63  ;;  %v8031_v48 = vpop.f32.mrb[54].mxu0 }
 0x26c   : > { %v3858_v59 = vmul.f32 %v7698_v37, %v3506_v26  ;;  %v4938_v45 = vpop.eup %4937  ;;  %v4127_v54 = vadd.f32 %v4126_v58, %v3842_v41  ;;  %v3857_v18 = vmul.f32 %v7698_v37, %v3505_v40  ;;  %v2537_v11 = vadd.f32 %v7973_v19, %v7669_v46  ;;  %v8036_v10 = vpop.f32.mrb[54].mxu1 }
 0x26d   : > { %v3507_v27 = vmax.f32 %v2694_v39, 0.0  ;;  %v8038_v31 = vpop.f32.mrb[55].mxu0  ;;  %v4106_v51 = vadd.f32 %v4105_v23, %v3841_v13  ;;  %v4148_v44 = vadd.f32 %v4147_v49, %v3843_v36  ;;  %v4086_v33 = vadd.f32 %v4085_v16, %v3856_v56  ;;  %v8042_v24 = vpop.f32.mrb[55].mxu1 }
 0x26e   : > { %v2698_v20 = vadd.f32 %v7983_v32, %v7669_v46  ;;  %v4940_v5 = vpop.eup %4939  ;;  %v4128_v58 = vadd.f32 %v4127_v54, %v3858_v59  ;;  %v3520_v63 = vmax.f32 %v2537_v11, 0.0  ;;  %v2539_v19 = vadd.f32 %v7981_v38, %v7669_v46 }
 0x26f   : > { %v3859_v29 = vmul.f32 %v7698_v37, %v3507_v27  ;;  %v4942_v26 = vpop.eup %4941  ;;  %v4107_v41 = vadd.f32 %v4106_v51, %v3857_v18  ;;  %v2700_v23 = vadd.f32 %v7985_v2, %v7669_v46  ;;  %v2543_v49 = vadd.f32 %v7989_v9, %v7694_v52  ;;  %v8051_v32 = vpop.f32.mrb[56].mxu0 }
 0x270   : > { %v3522_v40 = vmax.f32 %v2698_v20, 0.0  ;;  %v4944_v16 = vpop.eup %4943  ;;  %v4462_v39 = vcombine.low %v4938_v45, %v4942_v26  ;;  %v3872_v36 = vmul.f32 %v7728_v14, %v3520_v63  ;;  %v3521_v56 = vmax.f32 %v2539_v19, 0.0  ;;  %v8054_v59 = vpop.f32.mrb[56].mxu1 }
 0x271   : > { %v4149_v13 = vadd.f32 %v4148_v44, %v3859_v29  ;;  %v8056_v38 = vpop.f32.mrb[57].mxu0  ;;  %v4463_v54 = vcombine.low %v4940_v5, %v4944_v16  ;;  %v3523_v27 = vmax.f32 %v2700_v23, 0.0  ;;  %v3536_v2 = vmax.f32 %v2543_v49, 0.0  ;;  %v8059_v11 = vpop.f32.mrb[57].mxu1  ;;  %v9119_v5 = vld [vmem:[#allocation80_spill] sm:$0xff] }
 0x272   : > { %v3874_v18 = vmul.f32 %v7728_v14, %v3522_v40  ;;  %v4472_v9 = vrot.slane %v4462_v39, %v7873_v42  ;;  %v4087_v51 = vadd.f32 %v4086_v33, %v3872_v36  ;;  %v3873_v45 = vmul.f32 %v7728_v14, %v3521_v56 }
 0x273   : > { %v2704_v44 = vadd.f32 %v7998_v8, %v7694_v52  ;;  %v4479_v20 = vrot.slane %v4463_v54, %v7873_v42  ;;  %v3875_v63 = vmul.f32 %v7728_v14, %v3523_v27  ;;  %v3888_v19 = vmul.f32 %v9119_v5, %v3536_v2  ;;  %v8068_v26 = vpop.f32.mrb[58].mxu0 }
 0x274   : > { %v4129_v29 = vadd.f32 %v4128_v58, %v3874_v18  ;;  %v4108_v40 = vadd.f32 %v4107_v41, %v3873_v45  ;;  %v2545_v49 = vadd.f32 %v7994_v35, %v7694_v52  ;;  %v2706_v33 = vadd.f32 %v8000_v4, %v7694_v52  ;;  %v8074_v16 = vpop.f32.mrb[58].mxu1  ;;  %v8076_v8 = vpop.f32.mrb[59].mxu0 }
 0x275   : > { %v3538_v23 = vmax.f32 %v2704_v44, 0.0  ;;  %v4494_v39 = vcombine.low %v4472_v9, %v4479_v20  ;;  %v4150_v58 = vadd.f32 %v4149_v13, %v3875_v63  ;;  %v4088_v36 = vadd.f32 %v4087_v51, %v3888_v19  ;;  %v8080_v54 = vpop.f32.mrb[59].mxu1 }
 0x276   : > { %v2549_v56 = vadd.f32 %v8005_v53, %v7718_v62  ;;  %v3537_v18 = vmax.f32 %v2545_v49, 0.0  ;;  %v3539_v27 = vmax.f32 %v2706_v33, 0.0  ;;  %v2710_v35 = vadd.f32 %v8020_v6, %v7718_v62  ;;  %v9121_v49 = vld [vmem:[#allocation18_spill] sm:$0xff] }
 0x277   : > { %v3890_v41 = vmul.f32 %v9119_v5, %v3538_v23  ;;  %v8086_v4 = vrot.slane %v4494_v39, %v7873_v42  ;;  %v2551_v13 = vadd.f32 %v8015_v30, %v7718_v62  ;;  %v2712_v9 = vadd.f32 %v8022_v55, %v7718_v62  ;;  %v8092_v53 = vpop.f32.mrb[60].mxu0 }
 0x278   : > { %v3552_v2 = vmax.f32 %v2549_v56, 0.0  ;;  %v3889_v45 = vmul.f32 %v9119_v5, %v3537_v18  ;;  %v3891_v44 = vmul.f32 %v9119_v5, %v3539_v27  ;;  %v3554_v20 = vmax.f32 %v2710_v35, 0.0  ;;  %v8096_v63 = vpop.f32.mrb[61].mxu0 }
 0x279   : > { %9120 = vst [vmem:[#allocation75_spill] sm:$0xff] %v8086_v4  ;;  %v4130_v51 = vadd.f32 %v4129_v29, %v3890_v41  ;;  %v3553_v19 = vmax.f32 %v2551_v13, 0.0  ;;  %v3555_v23 = vmax.f32 %v2712_v9, 0.0  ;;  %v2555_v30 = vadd.f32 %v8031_v48, %v9121_v49  ;;  %v2733_v33 = vpop.f32.mrb[60].mxu1 }
 0x27a   : > { %v3904_v6 = vmul.f32 %v7774_v17, %v3552_v2  ;;  %v4109_v39 = vadd.f32 %v4108_v40, %v3889_v45  ;;  %v4151_v55 = vadd.f32 %v4150_v58, %v3891_v44  ;;  %v3906_v56 = vmul.f32 %v7774_v17, %v3554_v20  ;;  %v2735_v41 = vpop.f32.mrb[61].mxu1 }
 0x27b   : > { %v2716_v29 = vadd.f32 %v8036_v10, %v9121_v49  ;;  %v3905_v27 = vmul.f32 %v7774_v17, %v3553_v19  ;;  %v3907_v35 = vmul.f32 %v7774_v17, %v3555_v23  ;;  %v3568_v2 = vmax.f32 %v2555_v30, 0.0  ;;  %v8106_v13 = vpop.f32.mrb[62].mxu0 }
 0x27c   : > { %v4089_v18 = vadd.f32 %v4088_v36, %v3904_v6  ;;  %v4131_v9 = vadd.f32 %v4130_v51, %v3906_v56  ;;  %v2557_v48 = vadd.f32 %v8038_v31, %v9121_v49  ;;  %v2718_v40 = vadd.f32 %v8042_v24, %v9121_v49  ;;  %v8112_v58 = vpop.f32.mrb[63].mxu0 }
 0x27d   : > { %v3570_v4 = vmax.f32 %v2716_v29, 0.0  ;;  %v4110_v10 = vadd.f32 %v4109_v39, %v3905_v27  ;;  %v4152_v45 = vadd.f32 %v4151_v55, %v3907_v35  ;;  %v3920_v36 = vmul.f32 %v7799_v43, %v3568_v2 }
 0x27e   : > { %v2561_v44 = vadd.f32 %v8051_v32, %v7763_v3  ;;  %v3569_v6 = vmax.f32 %v2557_v48, 0.0  ;;  %v3571_v51 = vmax.f32 %v2718_v40, 0.0  ;;  %v2722_v19 = vadd.f32 %v8054_v59, %v7763_v3  ;;  %v2739_v31 = vpop.f32.mrb[62].mxu1 }
 0x27f   : > { %v3922_v20 = vmul.f32 %v7799_v43, %v3570_v4  ;;  %v4090_v23 = vadd.f32 %v4089_v18, %v3920_v36  ;;  %v2563_v24 = vadd.f32 %v8056_v38, %v7763_v3  ;;  %v2724_v39 = vadd.f32 %v8059_v11, %v7763_v3  ;;  %v2741_v55 = vpop.f32.mrb[63].mxu1 }
 0x280   : > { %v3584_v30 = vmax.f32 %v2561_v44, 0.0  ;;  %v3921_v32 = vmul.f32 %v7799_v43, %v3569_v6  ;;  %v3923_v4 = vmul.f32 %v7799_v43, %v3571_v51  ;;  %v3586_v29 = vmax.f32 %v2722_v19, 0.0 }
 0x281   : > { %v4132_v56 = vadd.f32 %v4131_v9, %v3922_v20  ;;  %v3585_v35 = vmax.f32 %v2563_v24, 0.0  ;;  %v3587_v59 = vmax.f32 %v2724_v39, 0.0  ;;  %v2567_v18 = vadd.f32 %v8068_v26, %v7787_v57  ;;  %v9122_v24 = vld [vmem:[#allocation91_spill] sm:$0xff] }
 0x282   : > { %v3936_v27 = vmul.f32 %v7820_v0, %v3584_v30  ;;  %v4111_v2 = vadd.f32 %v4110_v10, %v3921_v32  ;;  %v4153_v48 = vadd.f32 %v4152_v45, %v3923_v4  ;;  %v3938_v38 = vmul.f32 %v7820_v0, %v3586_v29 }
 0x283   : > { %v2728_v11 = vadd.f32 %v8074_v16, %v7787_v57  ;;  %v3937_v40 = vmul.f32 %v7820_v0, %v3585_v35  ;;  %v3939_v36 = vmul.f32 %v7820_v0, %v3587_v59  ;;  %v3600_v44 = vmax.f32 %v2567_v18, 0.0  ;;  %v2810_v20 = vpop.f32.mrb[64].mxu0 }
 0x284   : > { %v4091_v9 = vadd.f32 %v4090_v23, %v3936_v27  ;;  %v4133_v6 = vadd.f32 %v4132_v56, %v3938_v38  ;;  %v2569_v19 = vadd.f32 %v8076_v8, %v7787_v57  ;;  %v2730_v26 = vadd.f32 %v8080_v54, %v7787_v57  ;;  %v2812_v10 = vpop.f32.mrb[65].mxu0  ;;  %v9123_v23 = vld [vmem:[#allocation38_spill] sm:$0xff] }
 0x285   : > { %v3602_v51 = vmax.f32 %v2728_v11, 0.0  ;;  %v4112_v45 = vadd.f32 %v4111_v2, %v3937_v40  ;;  %v4154_v30 = vadd.f32 %v4153_v48, %v3939_v36  ;;  %v3952_v16 = vmul.f32 %v9122_v24, %v3600_v44  ;;  %v9124_v40 = vld [vmem:[#allocation73_spill] sm:$0xff] }
 0x286   : > { %v2573_v39 = vadd.f32 %v8092_v53, %v9123_v23  ;;  %v3601_v4 = vmax.f32 %v2569_v19, 0.0  ;;  %v3603_v29 = vmax.f32 %v2730_v26, 0.0  ;;  %v2734_v56 = vadd.f32 %v2733_v33, %v9123_v23  ;;  %v2971_v27 = vpop.f32.mrb[64].mxu1 }
 0x287   : > { %v3954_v32 = vmul.f32 %v9122_v24, %v3602_v51  ;;  %v4092_v35 = vadd.f32 %v4091_v9, %v3952_v16  ;;  %v2575_v54 = vadd.f32 %v8096_v63, %v9123_v23  ;;  %v2736_v59 = vadd.f32 %v2735_v41, %v9123_v23  ;;  %v2973_v18 = vpop.f32.mrb[65].mxu1  ;;  %v9125_v51 = vld [vmem:[#allocation89_spill] sm:$0xff] }
 0x288   : > { %v3616_v8 = vmax.f32 %v2573_v39, 0.0  ;;  %v3953_v48 = vmul.f32 %v9122_v24, %v3601_v4  ;;  %v3955_v53 = vmul.f32 %v9122_v24, %v3603_v29  ;;  %v3618_v38 = vmax.f32 %v2734_v56, 0.0  ;;  %v2816_v11 = vpop.f32.mrb[66].mxu0 }
 0x289   : > { %v4134_v2 = vadd.f32 %v4133_v6, %v3954_v32  ;;  %v3617_v44 = vmax.f32 %v2575_v54, 0.0  ;;  %v3619_v33 = vmax.f32 %v2736_v59, 0.0  ;;  %v2579_v9 = vadd.f32 %v8106_v13, %v9125_v51  ;;  %v2818_v19 = vpop.f32.mrb[67].mxu0 }
 0x28a   : > { %v3968_v36 = vmul.f32 %v9124_v40, %v3616_v8  ;;  %v4113_v26 = vadd.f32 %v4112_v45, %v3953_v48  ;;  %v4155_v63 = vadd.f32 %v4154_v30, %v3955_v53  ;;  %v3970_v41 = vmul.f32 %v9124_v40, %v3618_v38  ;;  %v9126_v48 = vld [vmem:[#allocation74_spill] sm:$0xff] }
 0x28b   : > { %v2740_v6 = vadd.f32 %v2739_v31, %v9125_v51  ;;  %v3969_v39 = vmul.f32 %v9124_v40, %v3617_v44  ;;  %v3971_v32 = vmul.f32 %v9124_v40, %v3619_v33  ;;  %v3632_v4 = vmax.f32 %v2579_v9, 0.0  ;;  %v2977_v29 = vpop.f32.mrb[66].mxu1  ;;  %v9127_v31 = vld [vmem:[#allocation84_spill] sm:$0xff] }
 0x28c   : > { %v4093_v16 = vadd.f32 %v4092_v35, %v3968_v36  ;;  %v4135_v56 = vadd.f32 %v4134_v2, %v3970_v41  ;;  %v2581_v54 = vadd.f32 %v8112_v58, %v9125_v51  ;;  %v2742_v13 = vadd.f32 %v2741_v55, %v9125_v51  ;;  %v2979_v45 = vpop.f32.mrb[67].mxu1 }
 0x28d   : > { %v3634_v8 = vmax.f32 %v2740_v6, 0.0  ;;  %v4114_v30 = vadd.f32 %v4113_v26, %v3969_v39  ;;  %v4156_v59 = vadd.f32 %v4155_v63, %v3971_v32  ;;  %v3984_v53 = vmul.f32 %v9126_v48, %v3632_v4 }
 0x28e   : > { %v2811_v35 = vadd.f32 %v2810_v20, %v9127_v31  ;;  %v3633_v36 = vmax.f32 %v2581_v54, 0.0  ;;  %v3635_v44 = vmax.f32 %v2742_v13, 0.0  ;;  %v2972_v33 = vadd.f32 %v2971_v27, %v9127_v31  ;;  %v8162_v2 = vpop.f32.mrb[68].mxu0  ;;  %v9128_v27 = vld [vmem:[#allocation79_spill] sm:$0xff] }
 0x28f   : > { %v3986_v38 = vmul.f32 %v9126_v48, %v3634_v8  ;;  %v4094_v9 = vadd.f32 %v4093_v16, %v3984_v53  ;;  %v2813_v58 = vadd.f32 %v2812_v10, %v9127_v31  ;;  %v2974_v55 = vadd.f32 %v2973_v18, %v9127_v31  ;;  %v2983_v26 = vpop.f32.mrb[68].mxu1  ;;  %v8166_v63 = vpop.f32.mrb[69].mxu0 }
 0x290   : > { %v3396_v41 = vmax.f32 %v2811_v35, 0.0  ;;  %v3985_v20 = vmul.f32 %v9126_v48, %v3633_v36  ;;  %v3987_v39 = vmul.f32 %v9126_v48, %v3635_v44  ;;  %v3398_v32 = vmax.f32 %v2972_v33, 0.0  ;;  %v2985_v4 = vpop.f32.mrb[69].mxu1 }
 0x291   : > { %v4136_v6 = vadd.f32 %v4135_v56, %v3986_v38  ;;  %v4095_v8 = vrot.slane %v4094_v9, 4  ;;  %v3397_v13 = vmax.f32 %v2813_v58, 0.0  ;;  %v3399_v16 = vmax.f32 %v2974_v55, 0.0  ;;  %v9129_v38 = vld [vmem:[#allocation85_spill] sm:$0xff] }
 0x292   : > { %v3748_v54 = vmul.f32 %v9128_v27, %v3396_v41  ;;  %v4115_v35 = vadd.f32 %v4114_v30, %v3985_v20  ;;  %v4157_v10 = vadd.f32 %v4156_v59, %v3987_v39  ;;  %v3750_v18 = vmul.f32 %v9128_v27, %v3398_v32 }
 0x293   : > { %v4137_v53 = vrot.slane %v4136_v6, 4  ;;  %v4096_v31 = vadd.f32 %v4095_v8, %v4094_v9  ;;  %v3749_v40 = vmul.f32 %v9128_v27, %v3397_v13  ;;  %v3751_v56 = vmul.f32 %v9128_v27, %v3399_v16  ;;  %v8175_v44 = vpop.f32.mrb[70].mxu0 }
 0x294   : > { %v2817_v36 = vadd.f32 %v2816_v11, %v9129_v38  ;;  %v4116_v48 = vrot.slane %v4115_v35, 4  ;;  %v4158_v51 = vrot.slane %v4157_v10, 4  ;;  %v2978_v41 = vadd.f32 %v2977_v29, %v9129_v38  ;;  %v8178_v58 = vpop.f32.mrb[70].mxu1  ;;  %v8180_v30 = vpop.f32.mrb[71].mxu0 }
 0x295   : > { %v4138_v33 = vadd.f32 %v4137_v53, %v4136_v6  ;;  %v4097_v59 = vrot.slane %v4096_v31, 2  ;;  %v2819_v9 = vadd.f32 %v2818_v19, %v9129_v38  ;;  %v2980_v20 = vadd.f32 %v2979_v45, %v9129_v38  ;;  %v8184_v39 = vpop.f32.mrb[71].mxu1 }
 0x296   : > { %v3412_v55 = vmax.f32 %v2817_v36, 0.0  ;;  %v4117_v32 = vadd.f32 %v4116_v48, %v4115_v35  ;;  %v4159_v8 = vadd.f32 %v4158_v51, %v4157_v10  ;;  %v3414_v6 = vmax.f32 %v2978_v41, 0.0 }
 0x297   : > { %v4139_v11 = vrot.slane %v4138_v33, 2  ;;  %v4098_v13 = vadd.f32 %v4097_v59, %v4096_v31  ;;  %v3413_v29 = vmax.f32 %v2819_v9, 0.0  ;;  %v3415_v53 = vmax.f32 %v2980_v20, 0.0  ;;  %v8187_v27 = vpop.f32.mrb[72].mxu0 }
 0x298   : > { %v3764_v16 = vmul.f32 %v7507_v21, %v3412_v55  ;;  %v4118_v24 = vrot.slane %v4117_v32, 2  ;;  %v4160_v36 = vrot.slane %v4159_v8, 2  ;;  %v3766_v19 = vmul.f32 %v7507_v21, %v3414_v6  ;;  %v2995_v0 = vpop.f32.mrb[72].mxu1  ;;  %v8190_v45 = vpop.f32.mrb[73].mxu0 }
 0x299   : > { %v4140_v23 = vadd.f32 %v4139_v11, %v4138_v33  ;;  %v4099_v38 = vrot.slane %v4098_v13, 1  ;;  %v3765_v51 = vmul.f32 %v7507_v21, %v3413_v29  ;;  %v3767_v48 = vmul.f32 %v7507_v21, %v3415_v53  ;;  %v8194_v31 = vpop.f32.mrb[73].mxu1 }
 0x29a   : > { %v4164_v57 = vadd.f32 %v3764_v16, %v3748_v54  ;;  %v4119_v10 = vadd.f32 %v4118_v24, %v4117_v32  ;;  %v4161_v41 = vadd.f32 %v4160_v36, %v4159_v8  ;;  %v4206_v59 = vadd.f32 %v3766_v19, %v3750_v18 }
 0x29b   : > { %v4141_v35 = vrot.slane %v4140_v23, 1  ;;  %v4100_v33 = vadd.f32 %v4099_v38, %v4098_v13  ;;  %v4185_v55 = vadd.f32 %v3765_v51, %v3749_v40  ;;  %v4227_v9 = vadd.f32 %v3767_v48, %v3751_v56 }
 0x29c   : > { %v2823_v20 = vadd.f32 %v8162_v2, %v7468_v22  ;;  %v4120_v6 = vrot.slane %v4119_v10, 1  ;;  %v4162_v3 = vrot.slane %v4161_v41, 1  ;;  %v2984_v54 = vadd.f32 %v2983_v26, %v7468_v22  ;;  %v8199_v16 = vpop.f32.mrb[74].mxu0  ;;  %v8201_v29 = vpop.f32.mrb[74].mxu1 }
 0x29d   : > { %v4142_v11 = vadd.f32 %v4141_v35, %v4140_v23  ;;  %v4338_v53 = vadd.f32 %v7734_v61, %v4100_v33  ;;  %v2825_v18 = vadd.f32 %v8166_v63, %v7468_v22  ;;  %v2986_v40 = vadd.f32 %v2985_v4, %v7468_v22  ;;  %v8207_v56 = vpop.f32.mrb[75].mxu0  ;;  %v8209_v2 = vpop.f32.mrb[75].mxu1 }
 0x29e   : > { %v3428_v24 = vmax.f32 %v2823_v20, 0.0  ;;  %v4121_v38 = vadd.f32 %v4120_v6, %v4119_v10  ;;  %v4163_v26 = vadd.f32 %v4162_v3, %v4161_v41  ;;  %v3430_v32 = vmax.f32 %v2984_v54, 0.0 }
 0x29f   : > { %v4340_v23 = vadd.f32 %v7734_v61, %v4142_v11  ;;  %v4629_v8 = vmul.f32 -1.442695, %v4338_v53  ;;  %v3429_v36 = vmax.f32 %v2825_v18, 0.0  ;;  %v3431_v19 = vmax.f32 %v2986_v40, 0.0 }
 0x2a0   : > { %v3780_v13 = vmul.f32 %v7549_v28, %v3428_v24  ;;  %v4339_v48 = vadd.f32 %v7734_v61, %v4121_v38  ;;  %v4341_v63 = vadd.f32 %v7734_v61, %v4163_v26  ;;  %v3782_v4 = vmul.f32 %v7549_v28, %v3430_v32 }
 0x2a1   : > { %v4631_v51 = vmul.f32 -1.442695, %v4340_v23  ;;  %4945 = vpow2.f32 %v4629_v8  ;;  %v3781_v33 = vmul.f32 %v7549_v28, %v3429_v36  ;;  %v3783_v10 = vmul.f32 %v7549_v28, %v3431_v19  ;;  %v8218_v3 = vpop.f32.mrb[76].mxu0  ;;  %v8220_v41 = vpop.f32.mrb[76].mxu1 }
 0x2a2   : > { %v4165_v35 = vadd.f32 %v4164_v57, %v3780_v13  ;;  %v4630_v20 = vmul.f32 -1.442695, %v4339_v48  ;;  %v4632_v11 = vmul.f32 -1.442695, %v4341_v63  ;;  %v4207_v6 = vadd.f32 %v4206_v59, %v3782_v4  ;;  %v8222_v54 = vpop.f32.mrb[77].mxu0  ;;  %v8224_v53 = vpop.f32.mrb[77].mxu1 }
 0x2a3   : > { %4947 = vpow2.f32 %v4631_v51  ;;  %v4186_v24 = vadd.f32 %v4185_v55, %v3781_v33  ;;  %v4228_v18 = vadd.f32 %v4227_v9, %v3783_v10  ;;  %v2829_v57 = vadd.f32 %v8175_v44, %v7470_v34 }
 0x2a4   : > { %v2990_v40 = vadd.f32 %v8178_v58, %v7470_v34  ;;  %4949 = vpow2.f32 %v4630_v20  ;;  %v2831_v23 = vadd.f32 %v8180_v30, %v7470_v34  ;;  %v2992_v38 = vadd.f32 %v8184_v39, %v7470_v34 }
 0x2a5   : > { %v2835_v59 = vadd.f32 %v8187_v27, %v7547_v12  ;;  %4951 = vpow2.f32 %v4632_v11  ;;  %v3444_v26 = vmax.f32 %v2829_v57, 0.0  ;;  %v2996_v9 = vadd.f32 %v2995_v0, %v7547_v12  ;;  %v8237_v32 = vpop.f32.mrb[78].mxu0 }
 0x2a6   : > { %v3446_v55 = vmax.f32 %v2990_v40, 0.0  ;;  %v3445_v44 = vmax.f32 %v2831_v23, 0.0  ;;  %v3447_v8 = vmax.f32 %v2992_v38, 0.0  ;;  %v2837_v13 = vadd.f32 %v8190_v45, %v7547_v12  ;;  %v8241_v30 = vpop.f32.mrb[79].mxu0 }
 0x2a7   : > { %v3460_v58 = vmax.f32 %v2835_v59, 0.0  ;;  %v3796_v39 = vmul.f32 %v7584_v50, %v3444_v26  ;;  %v3462_v27 = vmax.f32 %v2996_v9, 0.0  ;;  %v2998_v19 = vadd.f32 %v8194_v31, %v7547_v12  ;;  %v8247_v51 = vpop.f32.mrb[78].mxu1 }
 0x2a8   : > { %v3798_v36 = vmul.f32 %v7584_v50, %v3446_v55  ;;  %v3797_v0 = vmul.f32 %v7584_v50, %v3445_v44  ;;  %v3799_v48 = vmul.f32 %v7584_v50, %v3447_v8  ;;  %v3461_v4 = vmax.f32 %v2837_v13, 0.0  ;;  %v8252_v45 = vpop.f32.mrb[79].mxu1 }
 0x2a9   : > { %v3812_v63 = vmul.f32 %v7622_v47, %v3460_v58  ;;  %v4166_v33 = vadd.f32 %v4165_v35, %v3796_v39  ;;  %v3814_v20 = vmul.f32 %v7622_v47, %v3462_v27  ;;  %v3463_v11 = vmax.f32 %v2998_v19, 0.0  ;;  %v8255_v57 = vpop.f32.mrb[80].mxu0 }
 0x2aa   : > { %v4208_v10 = vadd.f32 %v4207_v6, %v3798_v36  ;;  %v4187_v40 = vadd.f32 %v4186_v24, %v3797_v0  ;;  %v4229_v31 = vadd.f32 %v4228_v18, %v3799_v48  ;;  %v3813_v23 = vmul.f32 %v7622_v47, %v3461_v4  ;;  %v8260_v59 = vpop.f32.mrb[81].mxu0 }
 0x2ab   : > { %v2841_v38 = vadd.f32 %v8199_v16, %v7582_v25  ;;  %v4946_v26 = vpop.eup %4945  ;;  %v4167_v55 = vadd.f32 %v4166_v33, %v3812_v63  ;;  %v3815_v35 = vmul.f32 %v7622_v47, %v3463_v11  ;;  %v3002_v6 = vadd.f32 %v8201_v29, %v7582_v25 }
 0x2ac   : > { %v4209_v9 = vadd.f32 %v4208_v10, %v3814_v20  ;;  %v4402_v8 = vadd.f32 1.0, %v4946_v26  ;;  %v4188_v58 = vadd.f32 %v4187_v40, %v3813_v23  ;;  %v2843_v18 = vadd.f32 %v8207_v56, %v7582_v25  ;;  %v8267_v13 = vpop.f32.mrb[80].mxu1 }
 0x2ad   : > { %v4948_v44 = vpop.eup %4947  ;;  %v3476_v24 = vmax.f32 %v2841_v38, 0.0  ;;  %v4230_v39 = vadd.f32 %v4229_v31, %v3815_v35  ;;  %v3478_v36 = vmax.f32 %v3002_v6, 0.0  ;;  %v3004_v27 = vadd.f32 %v8209_v2, %v7582_v25  ;;  %v8271_v19 = vpop.f32.mrb[81].mxu1 }
 0x2ae   : > { %v4404_v16 = vadd.f32 1.0, %v4948_v44  ;;  %v8273_v0 = vpop.f32.mrb[82].mxu0  ;;  %v4950_v29 = vpop.eup %4949  ;;  %4953 = vrcp.f32 %v4402_v8  ;;  %v3477_v63 = vmax.f32 %v2843_v18, 0.0  ;;  %v2847_v56 = vadd.f32 %v8218_v3, %v7620_v15 }
 0x2af   : > { %v3828_v48 = vmul.f32 %v7652_v7, %v3476_v24  ;;  %v8278_v4 = vpop.f32.mrb[83].mxu0  ;;  %v4952_v33 = vpop.eup %4951  ;;  %v4403_v10 = vadd.f32 1.0, %v4950_v29  ;;  %v3830_v20 = vmul.f32 %v7652_v7, %v3478_v36  ;;  %v3479_v2 = vmax.f32 %v3004_v27, 0.0 }
 0x2b0   : > { %4955 = vrcp.f32 %v4404_v16  ;;  %v4405_v11 = vadd.f32 1.0, %v4952_v33  ;;  %v3829_v31 = vmul.f32 %v7652_v7, %v3477_v63  ;;  %v3492_v23 = vmax.f32 %v2847_v56, 0.0  ;;  %v3025_v38 = vpop.f32.mrb[82].mxu1 }
 0x2b1   : > { %v4168_v40 = vadd.f32 %v4167_v55, %v3828_v48  ;;  %4957 = vrcp.f32 %v4403_v10  ;;  %v4210_v26 = vadd.f32 %v4209_v9, %v3830_v20  ;;  %v3831_v35 = vmul.f32 %v7652_v7, %v3479_v2  ;;  %v8285_v6 = vpop.f32.mrb[83].mxu1 }
 0x2b2   : > { %v3008_v3 = vadd.f32 %v8220_v41, %v7620_v15  ;;  %4959 = vrcp.f32 %v4405_v11  ;;  %v4189_v44 = vadd.f32 %v4188_v58, %v3829_v31  ;;  %v3844_v8 = vmul.f32 %v7671_v1, %v3492_v23  ;;  %v8290_v24 = vpop.f32.mrb[84].mxu0 }
 0x2b3   : > { %v2849_v55 = vadd.f32 %v8222_v54, %v7620_v15  ;;  %v4231_v18 = vadd.f32 %v4230_v39, %v3831_v35  ;;  %v3010_v9 = vadd.f32 %v8224_v53, %v7620_v15  ;;  %v2853_v36 = vadd.f32 %v8237_v32, %v7650_v60  ;;  %v8296_v41 = vpop.f32.mrb[85].mxu0 }
 0x2b4   : > { %v3494_v16 = vmax.f32 %v3008_v3, 0.0  ;;  %v4169_v27 = vadd.f32 %v4168_v40, %v3844_v8  ;;  %v3014_v58 = vadd.f32 %v8247_v51, %v7650_v60  ;;  %v2855_v54 = vadd.f32 %v8241_v30, %v7650_v60  ;;  %v8302_v48 = vpop.f32.mrb[84].mxu1 }
 0x2b5   : > { %v3493_v29 = vmax.f32 %v2849_v55, 0.0  ;;  %v3495_v63 = vmax.f32 %v3010_v9, 0.0  ;;  %v3508_v56 = vmax.f32 %v2853_v36, 0.0  ;;  %v3016_v53 = vadd.f32 %v8252_v45, %v7650_v60  ;;  %v8307_v32 = vpop.f32.mrb[85].mxu1 }
 0x2b6   : > { %v3846_v39 = vmul.f32 %v7671_v1, %v3494_v16  ;;  %v3510_v10 = vmax.f32 %v3014_v58, 0.0  ;;  %v3509_v20 = vmax.f32 %v2855_v54, 0.0  ;;  %v2859_v51 = vadd.f32 %v8255_v57, %v7669_v46 }
 0x2b7   : > { %v3845_v33 = vmul.f32 %v7671_v1, %v3493_v29  ;;  %v3847_v30 = vmul.f32 %v7671_v1, %v3495_v63  ;;  %v3860_v11 = vmul.f32 %v7698_v37, %v3508_v56  ;;  %v3511_v40 = vmax.f32 %v3016_v53, 0.0  ;;  %v8314_v31 = vpop.f32.mrb[86].mxu0 }
 0x2b8   : > { %v4211_v2 = vadd.f32 %v4210_v26, %v3846_v39  ;;  %v4954_v23 = vpop.eup %4953  ;;  %v3862_v45 = vmul.f32 %v7698_v37, %v3510_v10  ;;  %v3861_v3 = vmul.f32 %v7698_v37, %v3509_v20  ;;  %v3524_v8 = vmax.f32 %v2859_v51, 0.0  ;;  %v8318_v55 = vpop.f32.mrb[86].mxu1 }
 0x2b9   : > { %v4190_v35 = vadd.f32 %v4189_v44, %v3845_v33  ;;  %v8320_v16 = vpop.f32.mrb[87].mxu0  ;;  %v4232_v26 = vadd.f32 %v4231_v18, %v3847_v30  ;;  %v4170_v9 = vadd.f32 %v4169_v27, %v3860_v11  ;;  %v3863_v36 = vmul.f32 %v7698_v37, %v3511_v40  ;;  %v8325_v58 = vpop.f32.mrb[87].mxu1 }
 0x2ba   : > { %v4956_v57 = vpop.eup %4955  ;;  %v3020_v29 = vadd.f32 %v8267_v13, %v7669_v46  ;;  %v4212_v44 = vadd.f32 %v4211_v2, %v3862_v45  ;;  %v3876_v39 = vmul.f32 %v7728_v14, %v3524_v8  ;;  %v2861_v63 = vadd.f32 %v8260_v59, %v7669_v46 }
 0x2bb   : > { %v4191_v54 = vadd.f32 %v4190_v35, %v3861_v3  ;;  %v4958_v56 = vpop.eup %4957  ;;  %v4233_v53 = vadd.f32 %v4232_v26, %v3863_v36  ;;  %v3022_v18 = vadd.f32 %v8271_v19, %v7669_v46  ;;  %v2865_v27 = vadd.f32 %v8273_v0, %v7694_v52  ;;  %v8334_v10 = vpop.f32.mrb[88].mxu0 }
 0x2bc   : > { %v3526_v33 = vmax.f32 %v3020_v29, 0.0  ;;  %v4960_v13 = vpop.eup %4959  ;;  %v4464_v20 = vcombine.low %v4954_v23, %v4958_v56  ;;  %v4171_v51 = vadd.f32 %v4170_v9, %v3876_v39  ;;  %v3525_v2 = vmax.f32 %v2861_v63, 0.0  ;;  %v8337_v11 = vpop.f32.mrb[89].mxu0 }
 0x2bd   : > { %v3026_v30 = vadd.f32 %v3025_v38, %v7694_v52  ;;  %v4465_v59 = vcombine.low %v4956_v57, %v4960_v13  ;;  %v3527_v35 = vmax.f32 %v3022_v18, 0.0  ;;  %v3540_v45 = vmax.f32 %v2865_v27, 0.0  ;;  %v8340_v3 = vpop.f32.mrb[88].mxu1 }
 0x2be   : > { %v3878_v40 = vmul.f32 %v7728_v14, %v3526_v33  ;;  %v4486_v19 = vrot.slane %v4464_v20, %v7873_v42  ;;  %v3877_v0 = vmul.f32 %v7728_v14, %v3525_v2  ;;  %v2867_v23 = vadd.f32 %v8278_v4, %v7694_v52  ;;  %v8346_v26 = vpop.f32.mrb[89].mxu1 }
 0x2bf   : > { %v3542_v8 = vmax.f32 %v3026_v30, 0.0  ;;  %v4493_v38 = vrot.slane %v4465_v59, %v7873_v42  ;;  %v3879_v57 = vmul.f32 %v7728_v14, %v3527_v35  ;;  %v3892_v36 = vmul.f32 %v9119_v5, %v3540_v45  ;;  %v8351_v29 = vpop.f32.mrb[90].mxu0 }
 0x2c0   : > { %v4213_v9 = vadd.f32 %v4212_v44, %v3878_v40  ;;  %v4192_v39 = vadd.f32 %v4191_v54, %v3877_v0  ;;  %v3541_v56 = vmax.f32 %v2867_v23, 0.0  ;;  %v3028_v33 = vadd.f32 %v8285_v6, %v7694_v52  ;;  %v8356_v18 = vpop.f32.mrb[91].mxu0 }
 0x2c1   : > { %v3894_v63 = vmul.f32 %v9119_v5, %v3542_v8  ;;  %v4495_v4 = vcombine.low %v4486_v19, %v4493_v38  ;;  %v4234_v27 = vadd.f32 %v4233_v53, %v3879_v57  ;;  %v4172_v13 = vadd.f32 %v4171_v51, %v3892_v36  ;;  %v9130_v8 = vld [vmem:[#allocation75_spill] sm:$0xff] }
 0x2c2   : > { %v2871_v44 = vadd.f32 %v8290_v24, %v7718_v62  ;;  %v3893_v2 = vmul.f32 %v9119_v5, %v3541_v56  ;;  %v3543_v30 = vmax.f32 %v3028_v33, 0.0  ;;  %v3032_v54 = vadd.f32 %v8302_v48, %v7718_v62  ;;  %v3049_v59 = vpop.f32.mrb[90].mxu1 }
 0x2c3   : > { %v4214_v20 = vadd.f32 %v4213_v9, %v3894_v63  ;;  %v4509_v40 = vrot.slane %v4495_v4, %v7873_v42  ;;  %v2873_v35 = vadd.f32 %v8296_v41, %v7718_v62  ;;  %v3034_v53 = vadd.f32 %v8307_v32, %v7718_v62  ;;  %v3051_v51 = vpop.f32.mrb[91].mxu1  ;;  %v8368_v45 = vpop.f32.mrb[92].mxu0 }
 0x2c4   : > { %v3556_v6 = vmax.f32 %v2871_v44, 0.0  ;;  %v4193_v24 = vadd.f32 %v4192_v39, %v3893_v2  ;;  %v3895_v48 = vmul.f32 %v9119_v5, %v3543_v30  ;;  %v3558_v19 = vmax.f32 %v3032_v54, 0.0  ;;  %v8379_v41 = vpop.f32.mrb[93].mxu0 }
 0x2c5   : > { %v2877_v0 = vadd.f32 %v8314_v31, %v9121_v49  ;;  %v4510_v32 = vcombine.low %v9130_v8, %v4509_v40  ;;  %v3557_v38 = vmax.f32 %v2873_v35, 0.0  ;;  %v3559_v9 = vmax.f32 %v3034_v53, 0.0 }
 0x2c6   : > { %v3908_v23 = vmul.f32 %v7774_v17, %v3556_v6  ;;  %v4235_v57 = vadd.f32 %v4234_v27, %v3895_v48  ;;  %v3910_v36 = vmul.f32 %v7774_v17, %v3558_v19  ;;  %v3038_v39 = vadd.f32 %v8318_v55, %v9121_v49  ;;  %v3055_v56 = vpop.f32.mrb[92].mxu1 }
 0x2c7   : > { %v3572_v63 = vmax.f32 %v2877_v0, 0.0  ;;  %4562 = vst [vmem:[%s8374_s8] sm:$0xff] %v4510_v32  ;;  %v3909_v31 = vmul.f32 %v7774_v17, %v3557_v38  ;;  %v3911_v4 = vmul.f32 %v7774_v17, %v3559_v9  ;;  %v2879_v44 = vadd.f32 %v8320_v16, %v9121_v49  ;;  %v3057_v2 = vpop.f32.mrb[93].mxu1 }
 0x2c8   : > { %v4173_v33 = vadd.f32 %v4172_v13, %v3908_v23  ;;  %v4215_v30 = vadd.f32 %v4214_v20, %v3910_v36  ;;  %v3574_v54 = vmax.f32 %v3038_v39, 0.0  ;;  %v3040_v40 = vadd.f32 %v8325_v58, %v9121_v49  ;;  %v2900_v6 = vpop.f32.mrb[94].mxu0  ;;  %v9131_v13 = vld [vmem:[#allocation37_spill] sm:$0xff] }
 0x2c9   : > { %v3924_v27 = vmul.f32 %v7799_v43, %v3572_v63  ;;  %v4194_v55 = vadd.f32 %v4193_v24, %v3909_v31  ;;  %v4236_v35 = vadd.f32 %v4235_v57, %v3911_v4  ;;  %v3573_v53 = vmax.f32 %v2879_v44, 0.0  ;;  %v2902_v19 = vpop.f32.mrb[95].mxu0  ;;  %v9132_v63 = vld [vmem:[#allocation81_spill] sm:$0xff] }
 0x2ca   : > { %v2883_v48 = vadd.f32 %v8334_v10, %v9131_v13  ;;  %v3926_v8 = vmul.f32 %v7799_v43, %v3574_v54  ;;  %v3575_v16 = vmax.f32 %v3040_v40, 0.0  ;;  %v3044_v20 = vadd.f32 %v8340_v3, %v9131_v13  ;;  %v3061_v32 = vpop.f32.mrb[94].mxu1  ;;  %v9133_v3 = vld [vmem:[#allocation19_spill] sm:$0xff] }
 0x2cb   : > { %v4174_v0 = vadd.f32 %v4173_v33, %v3924_v27  ;;  %v3925_v23 = vmul.f32 %v7799_v43, %v3573_v53  ;;  %v2885_v58 = vadd.f32 %v8337_v11, %v9131_v13  ;;  %v3046_v24 = vadd.f32 %v8346_v26, %v9131_v13  ;;  %v3063_v9 = vpop.f32.mrb[95].mxu1 }
 0x2cc   : > { %v3588_v38 = vmax.f32 %v2883_v48, 0.0  ;;  %v4216_v10 = vadd.f32 %v4215_v30, %v3926_v8  ;;  %v3927_v57 = vmul.f32 %v7799_v43, %v3575_v16  ;;  %v3590_v36 = vmax.f32 %v3044_v20, 0.0 }
 0x2cd   : > { %v2889_v39 = vadd.f32 %v8351_v29, %v9132_v63  ;;  %v4195_v33 = vadd.f32 %v4194_v55, %v3925_v23  ;;  %v3589_v4 = vmax.f32 %v2885_v58, 0.0  ;;  %v3591_v44 = vmax.f32 %v3046_v24, 0.0  ;;  %v9134_v55 = vld [vmem:[#allocation91_spill] sm:$0xff]  ;;  %v9135_v58 = vld [vmem:[#allocation38_spill] sm:$0xff] }
 0x2ce   : > { %v3940_v31 = vmul.f32 %v9133_v3, %v3588_v38  ;;  %v4237_v27 = vadd.f32 %v4236_v35, %v3927_v57  ;;  %v3942_v54 = vmul.f32 %v9133_v3, %v3590_v36  ;;  %v3050_v40 = vadd.f32 %v3049_v59, %v9132_v63 }
 0x2cf   : > { %v3604_v11 = vmax.f32 %v2889_v39, 0.0  ;;  %v3941_v30 = vmul.f32 %v9133_v3, %v3589_v4  ;;  %v3943_v53 = vmul.f32 %v9133_v3, %v3591_v44  ;;  %v2891_v48 = vadd.f32 %v8356_v18, %v9132_v63  ;;  %v9136_v44 = vld [vmem:[#allocation89_spill] sm:$0xff] }
 0x2d0   : > { %v4175_v26 = vadd.f32 %v4174_v0, %v3940_v31  ;;  %v4217_v29 = vadd.f32 %v4216_v10, %v3942_v54  ;;  %v3606_v16 = vmax.f32 %v3050_v40, 0.0  ;;  %v3052_v20 = vadd.f32 %v3051_v51, %v9132_v63  ;;  %v9137_v54 = vld [vmem:[#allocation73_spill] sm:$0xff] }
 0x2d1   : > { %v3956_v8 = vmul.f32 %v9134_v55, %v3604_v11  ;;  %v4196_v35 = vadd.f32 %v4195_v33, %v3941_v30  ;;  %v4238_v23 = vadd.f32 %v4237_v27, %v3943_v53  ;;  %v3605_v38 = vmax.f32 %v2891_v48, 0.0 }
 0x2d2   : > { %v2895_v59 = vadd.f32 %v8368_v45, %v9135_v58  ;;  %v3958_v24 = vmul.f32 %v9134_v55, %v3606_v16  ;;  %v3607_v57 = vmax.f32 %v3052_v20, 0.0  ;;  %v3056_v36 = vadd.f32 %v3055_v56, %v9135_v58 }
 0x2d3   : > { %v4176_v0 = vadd.f32 %v4175_v26, %v3956_v8  ;;  %v3957_v18 = vmul.f32 %v9134_v55, %v3605_v38  ;;  %v2897_v39 = vadd.f32 %v8379_v41, %v9135_v58  ;;  %v3058_v51 = vadd.f32 %v3057_v2, %v9135_v58 }
 0x2d4   : > { %v3620_v10 = vmax.f32 %v2895_v59, 0.0  ;;  %v4218_v33 = vadd.f32 %v4217_v29, %v3958_v24  ;;  %v3959_v31 = vmul.f32 %v9134_v55, %v3607_v57  ;;  %v3622_v4 = vmax.f32 %v3056_v36, 0.0 }
 0x2d5   : > { %v2901_v45 = vadd.f32 %v2900_v6, %v9136_v44  ;;  %v4197_v27 = vadd.f32 %v4196_v35, %v3957_v18  ;;  %v3621_v40 = vmax.f32 %v2897_v39, 0.0  ;;  %v3623_v26 = vmax.f32 %v3058_v51, 0.0  ;;  %v9138_v6 = vld [vmem:[#allocation74_spill] sm:$0xff] }
 0x2d6   : > { %v3972_v11 = vmul.f32 %v9137_v54, %v3620_v10  ;;  %v4239_v56 = vadd.f32 %v4238_v23, %v3959_v31  ;;  %v3974_v30 = vmul.f32 %v9137_v54, %v3622_v4  ;;  %v3062_v48 = vadd.f32 %v3061_v32, %v9136_v44 }
 0x2d7   : > { %v3636_v53 = vmax.f32 %v2901_v45, 0.0  ;;  %v3973_v2 = vmul.f32 %v9137_v54, %v3621_v40  ;;  %v3975_v29 = vmul.f32 %v9137_v54, %v3623_v26  ;;  %v2903_v8 = vadd.f32 %v2902_v19, %v9136_v44  ;;  %v9139_v45 = vld [vmem:[#allocation84_spill] sm:$0xff] }
 0x2d8   : > { %v4177_v41 = vadd.f32 %v4176_v0, %v3972_v11  ;;  %v4219_v16 = vadd.f32 %v4218_v33, %v3974_v30  ;;  %v3638_v35 = vmax.f32 %v3062_v48, 0.0  ;;  %v3064_v38 = vadd.f32 %v3063_v9, %v9136_v44 }
 0x2d9   : > { %v3988_v20 = vmul.f32 %v9138_v6, %v3636_v53  ;;  %v4198_v59 = vadd.f32 %v4197_v27, %v3973_v2  ;;  %v4240_v23 = vadd.f32 %v4239_v56, %v3975_v29  ;;  %v3637_v24 = vmax.f32 %v2903_v8, 0.0 }
 0x2da   : > { %v3990_v36 = vmul.f32 %v9138_v6, %v3638_v35  ;;  %v3639_v32 = vmax.f32 %v3064_v38, 0.0 }
 0x2db   : > { %v4178_v57 = vadd.f32 %v4177_v41, %v3988_v20  ;;  %v3989_v0 = vmul.f32 %v9138_v6, %v3637_v24 }
 0x2dc   : > { %v4220_v10 = vadd.f32 %v4219_v16, %v3990_v36  ;;  %v3991_v39 = vmul.f32 %v9138_v6, %v3639_v32 }
 0x2dd   : > { %v4179_v18 = vrot.slane %v4178_v57, 4  ;;  %v4199_v19 = vadd.f32 %v4198_v59, %v3989_v0  ;;  %v3132_v51 = vpop.f32.mrb[96].mxu0  ;;  %v9140_v59 = vld [vmem:[#allocation79_spill] sm:$0xff] }
 0x2de   : > { %v4221_v31 = vrot.slane %v4220_v10, 4  ;;  %v4241_v4 = vadd.f32 %v4240_v23, %v3991_v39  ;;  %v3133_v9 = vadd.f32 %v3132_v51, %v9139_v45  ;;  %v3134_v27 = vpop.f32.mrb[97].mxu0 }
 0x2df   : > { %v4180_v33 = vadd.f32 %v4179_v18, %v4178_v57  ;;  %v4200_v11 = vrot.slane %v4199_v19, 4  ;;  %v3135_v40 = vadd.f32 %v3134_v27, %v9139_v45 }
 0x2e0   : > { %v4222_v56 = vadd.f32 %v4221_v31, %v4220_v10  ;;  %v4242_v30 = vrot.slane %v4241_v4, 4  ;;  %v3400_v53 = vmax.f32 %v3133_v9, 0.0  ;;  %v3293_v48 = vpop.f32.mrb[96].mxu1 }
 0x2e1   : > { %v4181_v26 = vrot.slane %v4180_v33, 2  ;;  %v4201_v41 = vadd.f32 %v4200_v11, %v4199_v19  ;;  %v3294_v2 = vadd.f32 %v3293_v48, %v9139_v45  ;;  %v3401_v29 = vmax.f32 %v3135_v40, 0.0  ;;  %v3295_v8 = vpop.f32.mrb[97].mxu1  ;;  %v3138_v16 = vpop.f32.mrb[98].mxu0  ;;  %v9141_v19 = vld [vmem:[#allocation85_spill] sm:$0xff] }
 0x2e2   : > { %v4223_v35 = vrot.slane %v4222_v56, 2  ;;  %v4243_v38 = vadd.f32 %v4242_v30, %v4241_v4  ;;  %v3752_v23 = vmul.f32 %v9140_v59, %v3400_v53  ;;  %v3140_v24 = vpop.f32.mrb[99].mxu0  ;;  %v3296_v0 = vadd.f32 %v3295_v8, %v9139_v45 }
 0x2e3   : > { %v4182_v20 = vadd.f32 %v4181_v26, %v4180_v33  ;;  %v4202_v57 = vrot.slane %v4201_v41, 2  ;;  %v3402_v36 = vmax.f32 %v3294_v2, 0.0  ;;  %v3753_v32 = vmul.f32 %v9140_v59, %v3401_v29 }
 0x2e4   : > { %v4224_v10 = vadd.f32 %v4223_v35, %v4222_v56  ;;  %v4244_v39 = vrot.slane %v4243_v38, 2  ;;  %v3139_v51 = vadd.f32 %v3138_v16, %v9141_v19  ;;  %v3299_v31 = vpop.f32.mrb[98].mxu1  ;;  %v3403_v27 = vmax.f32 %v3296_v0, 0.0 }
 0x2e5   : > { %v4183_v18 = vrot.slane %v4182_v20, 1  ;;  %v4203_v9 = vadd.f32 %v4202_v57, %v4201_v41  ;;  %v3754_v33 = vmul.f32 %v9140_v59, %v3402_v36  ;;  %v3300_v4 = vadd.f32 %v3299_v31, %v9141_v19  ;;  %v3301_v11 = vpop.f32.mrb[99].mxu1  ;;  %v3144_v40 = vpop.f32.mrb[100].mxu0 }
 0x2e6   : > { %v4225_v30 = vrot.slane %v4224_v10, 1  ;;  %v4245_v53 = vadd.f32 %v4244_v39, %v4243_v38  ;;  %v3416_v48 = vmax.f32 %v3139_v51, 0.0  ;;  %v3146_v2 = vpop.f32.mrb[101].mxu0  ;;  %v3755_v56 = vmul.f32 %v9140_v59, %v3403_v27 }
 0x2e7   : > { %v4184_v26 = vadd.f32 %v4183_v18, %v4182_v20  ;;  %v4204_v45 = vrot.slane %v4203_v9, 1  ;;  %v3418_v29 = vmax.f32 %v3300_v4, 0.0  ;;  %v3141_v8 = vadd.f32 %v3140_v24, %v9141_v19 }
 0x2e8   : > { %v4226_v16 = vadd.f32 %v4225_v30, %v4224_v10  ;;  %v4246_v35 = vrot.slane %v4245_v53, 1  ;;  %v3768_v57 = vmul.f32 %v7507_v21, %v3416_v48  ;;  %v3305_v36 = vpop.f32.mrb[100].mxu1  ;;  %v3302_v38 = vadd.f32 %v3301_v11, %v9141_v19 }
 0x2e9   : > { %v4342_v41 = vadd.f32 %v7734_v61, %v4184_v26  ;;  %v4205_v0 = vadd.f32 %v4204_v45, %v4203_v9  ;;  %v3770_v20 = vmul.f32 %v7507_v21, %v3418_v29  ;;  %v3417_v18 = vmax.f32 %v3141_v8, 0.0  ;;  %v3307_v39 = vpop.f32.mrb[101].mxu1  ;;  %v3150_v51 = vpop.f32.mrb[102].mxu0 }
 0x2ea   : > { %v4344_v59 = vadd.f32 %v7734_v61, %v4226_v16  ;;  %v4247_v27 = vadd.f32 %v4246_v35, %v4245_v53  ;;  %v4248_v24 = vadd.f32 %v3768_v57, %v3752_v23  ;;  %v3152_v4 = vpop.f32.mrb[103].mxu0  ;;  %v3419_v48 = vmax.f32 %v3302_v38, 0.0 }
 0x2eb   : > { %v4633_v31 = vmul.f32 -1.442695, %v4342_v41  ;;  %v4343_v10 = vadd.f32 %v7734_v61, %v4205_v0  ;;  %v4290_v26 = vadd.f32 %v3770_v20, %v3754_v33  ;;  %v3769_v30 = vmul.f32 %v7507_v21, %v3417_v18 }
 0x2ec   : > { %v4635_v9 = vmul.f32 -1.442695, %v4344_v59  ;;  %v4345_v45 = vadd.f32 %v7734_v61, %v4247_v27  ;;  %v3145_v19 = vadd.f32 %v3144_v40, %v7468_v22  ;;  %v3311_v11 = vpop.f32.mrb[102].mxu1  ;;  %v3771_v41 = vmul.f32 %v7507_v21, %v3419_v48 }
 0x2ed   : > { %4961 = vpow2.f32 %v4633_v31  ;;  %v4634_v29 = vmul.f32 -1.442695, %v4343_v10  ;;  %v4269_v8 = vadd.f32 %v3769_v30, %v3753_v32  ;;  %v3306_v23 = vadd.f32 %v3305_v36, %v7468_v22  ;;  %v3313_v53 = vpop.f32.mrb[103].mxu1  ;;  %v3156_v16 = vpop.f32.mrb[104].mxu0 }
 0x2ee   : > { %4963 = vpow2.f32 %v4635_v9  ;;  %v4636_v33 = vmul.f32 -1.442695, %v4345_v45  ;;  %v3432_v35 = vmax.f32 %v3145_v19, 0.0  ;;  %v3147_v57 = vadd.f32 %v3146_v2, %v7468_v22  ;;  %v3158_v0 = vpop.f32.mrb[105].mxu0 }
 0x2ef   : > { %4965 = vpow2.f32 %v4634_v29  ;;  %v4311_v20 = vadd.f32 %v3771_v41, %v3755_v56  ;;  %v3434_v18 = vmax.f32 %v3306_v23, 0.0  ;;  %v3308_v40 = vadd.f32 %v3307_v39, %v7468_v22 }
 0x2f0   : > { %4967 = vpow2.f32 %v4636_v33  ;;  %v3784_v32 = vmul.f32 %v7549_v28, %v3432_v35  ;;  %v3433_v38 = vmax.f32 %v3147_v57, 0.0  ;;  %v3151_v21 = vadd.f32 %v3150_v51, %v7470_v34  ;;  %v3317_v36 = vpop.f32.mrb[104].mxu1 }
 0x2f1   : > { %v3786_v31 = vmul.f32 %v7549_v28, %v3434_v18  ;;  %v3435_v59 = vmax.f32 %v3308_v40, 0.0  ;;  %v3312_v27 = vadd.f32 %v3311_v11, %v7470_v34  ;;  %v3153_v2 = vadd.f32 %v3152_v4, %v7470_v34  ;;  %v3319_v10 = vpop.f32.mrb[105].mxu1  ;;  %v3162_v30 = vpop.f32.mrb[106].mxu0 }
 0x2f2   : > { %v4249_v56 = vadd.f32 %v4248_v24, %v3784_v32  ;;  %v3785_v48 = vmul.f32 %v7549_v28, %v3433_v38  ;;  %v3448_v22 = vmax.f32 %v3151_v21, 0.0  ;;  %v3314_v39 = vadd.f32 %v3313_v53, %v7470_v34  ;;  %v3164_v9 = vpop.f32.mrb[107].mxu0 }
 0x2f3   : > { %v4291_v45 = vadd.f32 %v4290_v26, %v3786_v31  ;;  %v3787_v51 = vmul.f32 %v7549_v28, %v3435_v59  ;;  %v3450_v19 = vmax.f32 %v3312_v27, 0.0  ;;  %v3449_v29 = vmax.f32 %v3153_v2, 0.0 }
 0x2f4   : > { %v4270_v41 = vadd.f32 %v4269_v8, %v3785_v48  ;;  %v3800_v23 = vmul.f32 %v7584_v50, %v3448_v22  ;;  %v3451_v11 = vmax.f32 %v3314_v39, 0.0  ;;  %v3157_v4 = vadd.f32 %v3156_v16, %v7547_v12  ;;  %v3323_v33 = vpop.f32.mrb[106].mxu1 }
 0x2f5   : > { %v4312_v35 = vadd.f32 %v4311_v20, %v3787_v51  ;;  %v3802_v24 = vmul.f32 %v7584_v50, %v3450_v19  ;;  %v3801_v57 = vmul.f32 %v7584_v50, %v3449_v29  ;;  %v3318_v34 = vadd.f32 %v3317_v36, %v7547_v12  ;;  %v3325_v53 = vpop.f32.mrb[107].mxu1  ;;  %v3168_v26 = vpop.f32.mrb[108].mxu0 }
 0x2f6   : > { %v4250_v28 = vadd.f32 %v4249_v56, %v3800_v23  ;;  %v3803_v40 = vmul.f32 %v7584_v50, %v3451_v11  ;;  %v3464_v8 = vmax.f32 %v3157_v4, 0.0  ;;  %v3159_v32 = vadd.f32 %v3158_v0, %v7547_v12  ;;  %v3170_v38 = vpop.f32.mrb[109].mxu0 }
 0x2f7   : > { %v4962_v18 = vpop.eup %4961  ;;  %v4292_v16 = vadd.f32 %v4291_v45, %v3802_v24  ;;  %v4271_v31 = vadd.f32 %v4270_v41, %v3801_v57  ;;  %v3466_v20 = vmax.f32 %v3318_v34, 0.0  ;;  %v3320_v36 = vadd.f32 %v3319_v10, %v7547_v12 }
 0x2f8   : > { %v4406_v21 = vadd.f32 1.0, %v4962_v18  ;;  %v4964_v59 = vpop.eup %4963  ;;  %v4313_v27 = vadd.f32 %v4312_v35, %v3803_v40  ;;  %v3816_v2 = vmul.f32 %v7622_v47, %v3464_v8  ;;  %v3465_v48 = vmax.f32 %v3159_v32, 0.0  ;;  %v3329_v22 = vpop.f32.mrb[108].mxu1 }
 0x2f9   : > { %v4966_v39 = vpop.eup %4965  ;;  %v4408_v56 = vadd.f32 1.0, %v4964_v59  ;;  %v3818_v50 = vmul.f32 %v7622_v47, %v3466_v20  ;;  %v3163_v0 = vadd.f32 %v3162_v30, %v7582_v25  ;;  %v3331_v51 = vpop.f32.mrb[109].mxu1  ;;  %v3467_v11 = vmax.f32 %v3320_v36, 0.0 }
 0x2fa   : > { %4969 = vrcp.f32 %v4406_v21  ;;  %v3174_v19 = vpop.f32.mrb[110].mxu0  ;;  %v4968_v45 = vpop.eup %4967  ;;  %v4407_v29 = vadd.f32 1.0, %v4966_v39  ;;  %v4251_v41 = vadd.f32 %v4250_v28, %v3816_v2  ;;  %v3817_v23 = vmul.f32 %v7622_v47, %v3465_v48 }
 0x2fb   : > { %v3176_v4 = vpop.f32.mrb[111].mxu0  ;;  %4971 = vrcp.f32 %v4408_v56  ;;  %v4409_v35 = vadd.f32 1.0, %v4968_v45  ;;  %v4293_v12 = vadd.f32 %v4292_v16, %v3818_v50  ;;  %v3480_v10 = vmax.f32 %v3163_v0, 0.0 }
 0x2fc   : > { %4973 = vrcp.f32 %v4407_v29  ;;  %v4272_v24 = vadd.f32 %v4271_v31, %v3817_v23  ;;  %v3819_v57 = vmul.f32 %v7622_v47, %v3467_v11  ;;  %v3324_v34 = vadd.f32 %v3323_v33, %v7582_v25  ;;  %v3335_v30 = vpop.f32.mrb[110].mxu1 }
 0x2fd   : > { %4975 = vrcp.f32 %v4409_v35  ;;  %v3832_v18 = vmul.f32 %v7652_v7, %v3480_v10  ;;  %v3165_v28 = vadd.f32 %v3164_v9, %v7582_v25  ;;  %v3326_v40 = vadd.f32 %v3325_v53, %v7582_v25  ;;  %v3337_v8 = vpop.f32.mrb[111].mxu1  ;;  %v3180_v32 = vpop.f32.mrb[112].mxu0 }
 0x2fe   : > { %v4314_v21 = vadd.f32 %v4313_v27, %v3819_v57  ;;  %v3482_v20 = vmax.f32 %v3324_v34, 0.0  ;;  %v3169_v16 = vadd.f32 %v3168_v26, %v7620_v15  ;;  %v3330_v31 = vadd.f32 %v3329_v22, %v7620_v15  ;;  %v3182_v59 = vpop.f32.mrb[113].mxu0 }
 0x2ff   : > { %v4252_v47 = vadd.f32 %v4251_v41, %v3832_v18  ;;  %v3481_v2 = vmax.f32 %v3165_v28, 0.0  ;;  %v3483_v33 = vmax.f32 %v3326_v40, 0.0  ;;  %v3171_v48 = vadd.f32 %v3170_v38, %v7620_v15 }
 0x300   : > { %v3834_v36 = vmul.f32 %v7652_v7, %v3482_v20  ;;  %v3496_v39 = vmax.f32 %v3169_v16, 0.0  ;;  %v3498_v9 = vmax.f32 %v3330_v31, 0.0  ;;  %v3332_v25 = vadd.f32 %v3331_v51, %v7620_v15  ;;  %v3341_v53 = vpop.f32.mrb[112].mxu1 }
 0x301   : > { %v3833_v27 = vmul.f32 %v7652_v7, %v3481_v2  ;;  %v3835_v56 = vmul.f32 %v7652_v7, %v3483_v33  ;;  %v3497_v26 = vmax.f32 %v3171_v48, 0.0  ;;  %v3175_v22 = vadd.f32 %v3174_v19, %v7650_v60  ;;  %v3343_v50 = vpop.f32.mrb[113].mxu1  ;;  %v3186_v0 = vpop.f32.mrb[114].mxu0 }
 0x302   : > { %v4294_v45 = vadd.f32 %v4293_v12, %v3834_v36  ;;  %v3848_v29 = vmul.f32 %v7671_v1, %v3496_v39  ;;  %v3850_v38 = vmul.f32 %v7671_v1, %v3498_v9  ;;  %v3499_v41 = vmax.f32 %v3332_v25, 0.0  ;;  %v3188_v23 = vpop.f32.mrb[115].mxu0 }
 0x303   : > { %v4273_v35 = vadd.f32 %v4272_v24, %v3833_v27  ;;  %v4315_v15 = vadd.f32 %v4314_v21, %v3835_v56  ;;  %v3849_v51 = vmul.f32 %v7671_v1, %v3497_v26  ;;  %v3512_v10 = vmax.f32 %v3175_v22, 0.0 }
 0x304   : > { %v4970_v11 = vpop.eup %4969  ;;  %v4253_v57 = vadd.f32 %v4252_v47, %v3848_v29  ;;  %v4295_v7 = vadd.f32 %v4294_v45, %v3850_v38  ;;  %v3851_v34 = vmul.f32 %v7671_v1, %v3499_v41  ;;  %v3336_v19 = vadd.f32 %v3335_v30, %v7650_v60  ;;  %v3347_v18 = vpop.f32.mrb[114].mxu1 }
 0x305   : > { %v4972_v12 = vpop.eup %4971  ;;  %v4274_v28 = vadd.f32 %v4273_v35, %v3849_v51  ;;  %v3864_v40 = vmul.f32 %v7698_v37, %v3512_v10  ;;  %v3177_v20 = vadd.f32 %v3176_v4, %v7650_v60  ;;  %v3338_v16 = vadd.f32 %v3337_v8, %v7650_v60  ;;  %v3349_v24 = vpop.f32.mrb[115].mxu1 }
 0x306   : > { %v3192_v21 = vpop.f32.mrb[116].mxu0  ;;  %v4974_v31 = vpop.eup %4973  ;;  %v4316_v2 = vadd.f32 %v4315_v15, %v3851_v34  ;;  %v3514_v33 = vmax.f32 %v3336_v19, 0.0  ;;  %v3181_v47 = vadd.f32 %v3180_v32, %v7669_v46  ;;  %v3342_v1 = vadd.f32 %v3341_v53, %v7669_v46 }
 0x307   : > { %v3194_v48 = vpop.f32.mrb[117].mxu0  ;;  %v4976_v30 = vpop.eup %4975  ;;  %v4511_v36 = vcombine.low %v4970_v11, %v4974_v31  ;;  %v4254_v39 = vadd.f32 %v4253_v57, %v3864_v40  ;;  %v3513_v9 = vmax.f32 %v3177_v20, 0.0  ;;  %v3515_v25 = vmax.f32 %v3338_v16, 0.0 }
 0x308   : > { %v4512_v27 = vcombine.low %v4972_v12, %v4976_v30  ;;  %v3866_v4 = vmul.f32 %v7698_v37, %v3514_v33  ;;  %v3528_v56 = vmax.f32 %v3181_v47, 0.0  ;;  %v3530_v60 = vmax.f32 %v3342_v1, 0.0  ;;  %v3353_v8 = vpop.f32.mrb[116].mxu1 }
 0x309   : > { %v8506_v26 = vrot.slane %v4511_v36, %v7873_v42  ;;  %v3865_v22 = vmul.f32 %v7698_v37, %v3513_v9  ;;  %v3867_v32 = vmul.f32 %v7698_v37, %v3515_v25  ;;  %v3183_v53 = vadd.f32 %v3182_v59, %v7669_v46  ;;  %v3355_v45 = vpop.f32.mrb[117].mxu1  ;;  %v3198_v29 = vpop.f32.mrb[118].mxu0 }
 0x30a   : > { %v8512_v38 = vrot.slane %v4512_v27, %v7873_v42  ;;  %v4296_v41 = vadd.f32 %v4295_v7, %v3866_v4  ;;  %v3880_v11 = vmul.f32 %v7728_v14, %v3528_v56  ;;  %v3882_v35 = vmul.f32 %v7728_v14, %v3530_v60  ;;  %v3200_v15 = vpop.f32.mrb[119].mxu0 }
 0x30b   : > { %v4275_v51 = vadd.f32 %v4274_v28, %v3865_v22  ;;  %v4317_v10 = vadd.f32 %v4316_v2, %v3867_v32  ;;  %v3529_v57 = vmax.f32 %v3183_v53, 0.0  ;;  %v3344_v34 = vadd.f32 %v3343_v50, %v7669_v46 }
 0x30c   : > { %v4543_v37 = vcombine.low %v8506_v26, %v8512_v38  ;;  %v4255_v59 = vadd.f32 %v4254_v39, %v3880_v11  ;;  %v4297_v19 = vadd.f32 %v4296_v41, %v3882_v35  ;;  %v3187_v12 = vadd.f32 %v3186_v0, %v7694_v52  ;;  %v3359_v40 = vpop.f32.mrb[118].mxu1 }
 0x30d   : > { %v3881_v7 = vmul.f32 %v7728_v14, %v3529_v57  ;;  %v3531_v20 = vmax.f32 %v3344_v34, 0.0  ;;  %v3348_v16 = vadd.f32 %v3347_v18, %v7694_v52  ;;  %v3189_v31 = vadd.f32 %v3188_v23, %v7694_v52  ;;  %v3361_v28 = vpop.f32.mrb[119].mxu1  ;;  %v3204_v2 = vpop.f32.mrb[120].mxu0 }
 0x30e   : > { %v3544_v33 = vmax.f32 %v3187_v12, 0.0  ;;  %v3350_v46 = vadd.f32 %v3349_v24, %v7694_v52  ;;  %v3193_v50 = vadd.f32 %v3192_v21, %v7718_v62  ;;  %v3206_v47 = vpop.f32.mrb[121].mxu0  ;;  %v3354_v18 = vadd.f32 %v3353_v8, %v7718_v62 }
 0x30f   : > { %v4276_v1 = vadd.f32 %v4275_v51, %v3881_v7  ;;  %v3883_v30 = vmul.f32 %v7728_v14, %v3531_v20  ;;  %v3546_v0 = vmax.f32 %v3348_v16, 0.0  ;;  %v3545_v36 = vmax.f32 %v3189_v31, 0.0 }
 0x310   : > { %v3896_v39 = vmul.f32 %v9119_v5, %v3544_v33  ;;  %v3547_v9 = vmax.f32 %v3350_v46, 0.0  ;;  %v3560_v25 = vmax.f32 %v3193_v50, 0.0  ;;  %v3365_v23 = vpop.f32.mrb[120].mxu1  ;;  %v3195_v24 = vadd.f32 %v3194_v48, %v7718_v62 }
 0x311   : > { %v4318_v27 = vadd.f32 %v4317_v10, %v3883_v30  ;;  %v3898_v4 = vmul.f32 %v9119_v5, %v3546_v0  ;;  %v3897_v52 = vmul.f32 %v9119_v5, %v3545_v36  ;;  %v3367_v21 = vpop.f32.mrb[121].mxu1  ;;  %v3210_v56 = vpop.f32.mrb[122].mxu0  ;;  %v3562_v32 = vmax.f32 %v3354_v18, 0.0 }
 0x312   : > { %v4256_v60 = vadd.f32 %v4255_v59, %v3896_v39  ;;  %v3899_v14 = vmul.f32 %v9119_v5, %v3547_v9  ;;  %v3912_v22 = vmul.f32 %v7774_v17, %v3560_v25  ;;  %v3212_v53 = vpop.f32.mrb[123].mxu0  ;;  %v3561_v8 = vmax.f32 %v3195_v24, 0.0 }
 0x313   : > { %v4298_v41 = vadd.f32 %v4297_v19, %v3898_v4  ;;  %v4277_v11 = vadd.f32 %v4276_v1, %v3897_v52  ;;  %v3356_v35 = vadd.f32 %v3355_v45, %v7718_v62  ;;  %v3914_v57 = vmul.f32 %v7774_v17, %v3562_v32 }
 0x314   : > { %v4319_v51 = vadd.f32 %v4318_v27, %v3899_v14  ;;  %v4257_v10 = vadd.f32 %v4256_v60, %v3912_v22  ;;  %v3199_v48 = vadd.f32 %v3198_v29, %v9121_v49  ;;  %v3371_v34 = vpop.f32.mrb[122].mxu1  ;;  %v3913_v59 = vmul.f32 %v7774_v17, %v3561_v8 }
 0x315   : > { %v3563_v12 = vmax.f32 %v3356_v35, 0.0  ;;  %v3360_v5 = vadd.f32 %v3359_v40, %v9121_v49  ;;  %v3201_v7 = vadd.f32 %v3200_v15, %v9121_v49  ;;  %v3373_v20 = vpop.f32.mrb[123].mxu1  ;;  %v3216_v19 = vpop.f32.mrb[124].mxu0  ;;  %v4299_v16 = vadd.f32 %v4298_v41, %v3914_v57 }
 0x316   : > { %v3576_v31 = vmax.f32 %v3199_v48, 0.0  ;;  %v3362_v62 = vadd.f32 %v3361_v28, %v9121_v49  ;;  %v3205_v45 = vadd.f32 %v3204_v2, %v9131_v13  ;;  %v3218_v33 = vpop.f32.mrb[125].mxu0  ;;  %v4278_v46 = vadd.f32 %v4277_v11, %v3913_v59 }
 0x317   : > { %v3915_v29 = vmul.f32 %v7774_v17, %v3563_v12  ;;  %v3578_v50 = vmax.f32 %v3360_v5, 0.0  ;;  %v3577_v1 = vmax.f32 %v3201_v7, 0.0  ;;  %v3366_v15 = vadd.f32 %v3365_v23, %v9131_v13 }
 0x318   : > { %v3928_v30 = vmul.f32 %v7799_v43, %v3576_v31  ;;  %v3579_v0 = vmax.f32 %v3362_v62, 0.0  ;;  %v3592_v40 = vmax.f32 %v3205_v45, 0.0  ;;  %v3377_v36 = vpop.f32.mrb[124].mxu1  ;;  %v3207_v28 = vadd.f32 %v3206_v47, %v9131_v13 }
 0x319   : > { %v4320_v39 = vadd.f32 %v4319_v51, %v3915_v29  ;;  %v3930_v9 = vmul.f32 %v7799_v43, %v3578_v50  ;;  %v3929_v49 = vmul.f32 %v7799_v43, %v3577_v1  ;;  %v3379_v2 = vpop.f32.mrb[125].mxu1  ;;  %v3222_v25 = vpop.f32.mrb[126].mxu0  ;;  %v3594_v4 = vmax.f32 %v3366_v15, 0.0 }
 0x31a   : > { %v4258_v18 = vadd.f32 %v4257_v10, %v3928_v30  ;;  %v3931_v17 = vmul.f32 %v7799_v43, %v3579_v0  ;;  %v3944_v27 = vmul.f32 %v9133_v3, %v3592_v40  ;;  %v3224_v52 = vpop.f32.mrb[127].mxu0  ;;  %v3593_v23 = vmax.f32 %v3207_v28, 0.0 }
 0x31b   : > { %v4300_v24 = vadd.f32 %v4299_v16, %v3930_v9  ;;  %v4279_v60 = vadd.f32 %v4278_v46, %v3929_v49  ;;  %v3368_v14 = vadd.f32 %v3367_v21, %v9131_v13  ;;  %v3946_v41 = vmul.f32 %v9133_v3, %v3594_v4 }
 0x31c   : > { %v4321_v22 = vadd.f32 %v4320_v39, %v3931_v17  ;;  %v4259_v32 = vadd.f32 %v4258_v18, %v3944_v27  ;;  %v3211_v47 = vadd.f32 %v3210_v56, %v9132_v63  ;;  %v3383_v11 = vpop.f32.mrb[126].mxu1  ;;  %v3945_v8 = vmul.f32 %v9133_v3, %v3593_v23 }
 0x31d   : > { %v3595_v35 = vmax.f32 %v3368_v14, 0.0  ;;  %v3372_v43 = vadd.f32 %v3371_v34, %v9132_v63  ;;  %v3213_v51 = vadd.f32 %v3212_v53, %v9132_v63  ;;  %v3385_v10 = vpop.f32.mrb[127].mxu1  ;;  %v4301_v57 = vadd.f32 %v4300_v24, %v3946_v41 }
 0x31e   : > { %v3608_v48 = vmax.f32 %v3211_v47, 0.0  ;;  %v3374_v59 = vadd.f32 %v3373_v20, %v9132_v63  ;;  %v3217_v13 = vadd.f32 %v3216_v19, %v9135_v58  ;;  %v4280_v21 = vadd.f32 %v4279_v60, %v3945_v8 }
 0x31f   : > { %v3947_v12 = vmul.f32 %v9133_v3, %v3595_v35  ;;  %v3610_v5 = vmax.f32 %v3372_v43, 0.0  ;;  %v3609_v56 = vmax.f32 %v3213_v51, 0.0  ;;  %v3378_v34 = vadd.f32 %v3377_v36, %v9135_v58 }
 0x320   : > { %v3960_v7 = vmul.f32 %v9134_v55, %v3608_v48  ;;  %v3611_v16 = vmax.f32 %v3374_v59, 0.0  ;;  %v3624_v31 = vmax.f32 %v3217_v13, 0.0  ;;  %v3219_v63 = vadd.f32 %v3218_v33, %v9135_v58 }
 0x321   : > { %v4322_v62 = vadd.f32 %v4321_v22, %v3947_v12  ;;  %v3962_v53 = vmul.f32 %v9134_v55, %v3610_v5  ;;  %v3961_v45 = vmul.f32 %v9134_v55, %v3609_v56  ;;  %v3626_v46 = vmax.f32 %v3378_v34, 0.0 }
 0x322   : > { %v4260_v20 = vadd.f32 %v4259_v32, %v3960_v7  ;;  %v3963_v19 = vmul.f32 %v9134_v55, %v3611_v16  ;;  %v3976_v3 = vmul.f32 %v9137_v54, %v3624_v31  ;;  %v3625_v1 = vmax.f32 %v3219_v63, 0.0 }
 0x323   : > { %v4302_v29 = vadd.f32 %v4301_v57, %v3962_v53  ;;  %v4281_v50 = vadd.f32 %v4280_v21, %v3961_v45  ;;  %v3380_v30 = vadd.f32 %v3379_v2, %v9135_v58  ;;  %v3978_v15 = vmul.f32 %v9137_v54, %v3626_v46 }
 0x324   : > { %v4323_v0 = vadd.f32 %v4322_v62, %v3963_v19  ;;  %v4261_v40 = vadd.f32 %v4260_v20, %v3976_v3  ;;  %v3223_v36 = vadd.f32 %v3222_v25, %v9136_v44  ;;  %v3977_v39 = vmul.f32 %v9137_v54, %v3625_v1 }
 0x325   : > { %v3627_v33 = vmax.f32 %v3380_v30, 0.0  ;;  %v3384_v9 = vadd.f32 %v3383_v11, %v9136_v44  ;;  %v3225_v55 = vadd.f32 %v3224_v52, %v9136_v44  ;;  %v4303_v49 = vadd.f32 %v4302_v29, %v3978_v15 }
 0x326   : > { %v3640_v28 = vmax.f32 %v3223_v36, 0.0  ;;  %v3386_v18 = vadd.f32 %v3385_v10, %v9136_v44  ;;  %v4282_v17 = vadd.f32 %v4281_v50, %v3977_v39 }
 0x327   : > { %v3979_v58 = vmul.f32 %v9137_v54, %v3627_v33  ;;  %v3642_v2 = vmax.f32 %v3384_v9, 0.0  ;;  %v3641_v27 = vmax.f32 %v3225_v55, 0.0 }
 0x328   : > { %v3992_v4 = vmul.f32 %v9138_v6, %v3640_v28  ;;  %v3643_v24 = vmax.f32 %v3386_v18, 0.0 }
 0x329   : > { %v4324_v25 = vadd.f32 %v4323_v0, %v3979_v58  ;;  %v3994_v60 = vmul.f32 %v9138_v6, %v3642_v2  ;;  %v3993_v23 = vmul.f32 %v9138_v6, %v3641_v27  ;;  %v4551_v27 = vrot.slane %v4543_v37, %v7873_v42 }
 0x32a   : > { %v4262_v14 = vadd.f32 %v4261_v40, %v3992_v4  ;;  %v3995_v52 = vmul.f32 %v9138_v6, %v3643_v24 }
 0x32b   : > { %v4304_v22 = vadd.f32 %v4303_v49, %v3994_v60  ;;  %v4283_v32 = vadd.f32 %v4282_v17, %v3993_v23 }
 0x32c   : > { %v4263_v41 = vrot.slane %v4262_v14, 4  ;;  %v4325_v44 = vadd.f32 %v4324_v25, %v3995_v52 }
 0x32d   : > { %v4305_v47 = vrot.slane %v4304_v22, 4  ;;  %v4284_v11 = vrot.slane %v4283_v32, 4 }
 0x32e   : > { %v4264_v54 = vadd.f32 %v4263_v41, %v4262_v14  ;;  %v4326_v8 = vrot.slane %v4325_v44, 4 }
 0x32f   : > { %v4306_v35 = vadd.f32 %v4305_v47, %v4304_v22  ;;  %v4285_v43 = vadd.f32 %v4284_v11, %v4283_v32 }
 0x330   : > { %v4265_v51 = vrot.slane %v4264_v54, 2  ;;  %v4327_v10 = vadd.f32 %v4326_v8, %v4325_v44 }
 0x331   : > { %v4307_v57 = vrot.slane %v4306_v35, 2  ;;  %v4286_v48 = vrot.slane %v4285_v43, 2 }
 0x332   : > { %v4266_v59 = vadd.f32 %v4265_v51, %v4264_v54  ;;  %v4328_v13 = vrot.slane %v4327_v10, 2 }
 0x333   : > { %v4308_v21 = vadd.f32 %v4307_v57, %v4306_v35  ;;  %v4287_v12 = vadd.f32 %v4286_v48, %v4285_v43 }
 0x334   : > { %v4267_v5 = vrot.slane %v4266_v59, 1  ;;  %v4329_v6 = vadd.f32 %v4328_v13, %v4327_v10 }
 0x335   : > { %v4309_v56 = vrot.slane %v4308_v21, 1  ;;  %v4288_v7 = vrot.slane %v4287_v12, 1 }
 0x336   : > { %v4268_v16 = vadd.f32 %v4267_v5, %v4266_v59  ;;  %v4330_v31 = vrot.slane %v4329_v6, 1 }
 0x337   : > { %v4310_v34 = vadd.f32 %v4309_v56, %v4308_v21  ;;  %v4289_v62 = vadd.f32 %v4288_v7, %v4287_v12 }
 0x338   : > { %v4346_v53 = vadd.f32 %v7734_v61, %v4268_v16  ;;  %v4331_v45 = vadd.f32 %v4330_v31, %v4329_v6 }
 0x339   : > { %v4348_v63 = vadd.f32 %v7734_v61, %v4310_v34  ;;  %v4347_v20 = vadd.f32 %v7734_v61, %v4289_v62 }
 0x33a   : > { %v4637_v19 = vmul.f32 -1.442695, %v4346_v53  ;;  %v4349_v3 = vadd.f32 %v7734_v61, %v4331_v45 }
 0x33b   : > { %v4639_v46 = vmul.f32 -1.442695, %v4348_v63  ;;  %v4638_v29 = vmul.f32 -1.442695, %v4347_v20 }
 0x33c   : > { %4977 = vpow2.f32 %v4637_v19  ;;  %v4640_v50 = vmul.f32 -1.442695, %v4349_v3 }
 0x33d   : > { %4979 = vpow2.f32 %v4639_v46 }
 0x33e   : > { %4981 = vpow2.f32 %v4638_v29 }
 0x33f   : > { %4983 = vpow2.f32 %v4640_v50 }
 0x346   : > { %v4978_v1 = vpop.eup %4977 }
 0x347   : > { %v4980_v30 = vpop.eup %4979  ;;  %v4410_v0 = vadd.f32 1.0, %v4978_v1 }
 0x348   : > { %v4982_v40 = vpop.eup %4981  ;;  %v4412_v15 = vadd.f32 1.0, %v4980_v30 }
 0x349   : > { %v4984_v36 = vpop.eup %4983  ;;  %4985 = vrcp.f32 %v4410_v0  ;;  %v4411_v39 = vadd.f32 1.0, %v4982_v40 }
 0x34a   : > { %4987 = vrcp.f32 %v4412_v15  ;;  %v4413_v33 = vadd.f32 1.0, %v4984_v36 }
 0x34b   : > { %4989 = vrcp.f32 %v4411_v39 }
 0x34c   : > { %4991 = vrcp.f32 %v4413_v33 }
 0x353   : > { %v4986_v61 = vpop.eup %4985 }
 0x354   : > { %v4988_v9 = vpop.eup %4987 }
 0x355   : > { %v4990_v55 = vpop.eup %4989 }
 0x356   : > { %v4992_v49 = vpop.eup %4991  ;;  %v4513_v28 = vcombine.low %v4986_v61, %v4990_v55 }
 0x357   : > { %v4514_v18 = vcombine.low %v4988_v9, %v4992_v49 }
 0x358   : > { %v4535_v17 = vrot.slane %v4513_v28, %v7873_v42 }
 0x359   : > { %v4542_v58 = vrot.slane %v4514_v18, %v7873_v42 }
 0x35b   : > { %v4544_v2 = vcombine.low %v4535_v17, %v4542_v58 }
 0x35d   : > { %v4558_v4 = vrot.slane %v4544_v2, %v7873_v42 }
 0x35f   : > { %v4559_v24 = vcombine.low %v4551_v27, %v4558_v4 }
 0x361   : > { %4563 = vst [vmem:[%s8374_s8 + $0x8] sm:$0xff] %v4559_v24 }
 0x362 PF: > { %s18_s26 = sadd.s32 1, %s5018_s26  }
 0x363   : > { %p15_p4 = scmp.ge.s32.totalorder %s18_s26, 6  }
 0x365   :  { %17 = sbr.rel (!%p15_p4) target bundleno = 2 (0x2), region = 81 }

</bundles_post_ra>
